<compile_context>
chip_gen: v7x
topology: tpu7x:2x2x1
jax: 0.10.0
libtpu: 0.0.40
codegen_flags: <defaults>
</compile_context>

<pallas_src>
import functools

import numpy as np
import jax
import jax.numpy as jnp
from jax.experimental import pallas as pl
from jax.experimental.pallas import tpu as pltpu


# ---------------------------------------------------------------------------
# Kernels
# ---------------------------------------------------------------------------

def conv51_bnstats_kernel(xflat_ref, wc_ref, mask_ref,
                          h_ref, sum_ref, ssq_ref, *, K, Wp, L):
    """(conv1x1 ∘ conv5x5) as K*K shifted matmuls + per-batch BN partial sums.

    xflat_ref: (C, Lpad)  zero-padded input plane of one batch element, flattened
               row-major with padded row width Wp and K//2 leading zeros.
    wc_ref:    (K*K, C, C) folded weight, wc[dy*K+dx] = w1x1 @ w5[:, :, dy, dx].
    mask_ref:  (1, L)      1.0 on valid (non-margin) columns of the flat output.
    h_ref:     (C, L)      output in the same flat padded-row layout (margins = garbage).
    sum_ref / ssq_ref: (C, 1) per-batch partial BN statistics over valid columns.
    """
    C = h_ref.shape[0]
    xf = xflat_ref[...]                                  # (C, Lpad)
    acc = jnp.zeros((C, L), jnp.float32)
    for dy in range(K):
        for dx in range(K):
            off = dy * Wp + dx
            acc = acc + jnp.dot(wc_ref[dy * K + dx], xf[:, off:off + L],
                                preferred_element_type=jnp.float32)
    h_ref[...] = acc
    hv = acc * mask_ref[...]
    sum_ref[...] = jnp.sum(hv, axis=-1, keepdims=True)
    ssq_ref[...] = jnp.sum(hv * hv, axis=-1, keepdims=True)


def bn_swish_conv3_se_res_kernel(xflat_ref, h_ref, sum_ref, ssq_ref,
                                 gamma_ref, beta_ref, w3_ref, b3_ref,
                                 w1_ref, w2_ref, mask_ref, o_ref, *,
                                 Wp, L, inv_count, inv_hw, eps, res_off):
    """BN(batch stats) + Swish + conv3x3(+bias) + SE gate + 0.1-residual, fused."""
    C = o_ref.shape[0]

    # Reduce the per-batch partial BN statistics (tiny (B, C, 1) blocks).
    mean = jnp.sum(sum_ref[...], axis=0) * inv_count               # (C, 1)
    var = jnp.sum(ssq_ref[...], axis=0) * inv_count - mean * mean  # biased var
    scale = gamma_ref[...] * jax.lax.rsqrt(var + eps)
    shift = beta_ref[...] - mean * scale

    s = h_ref[...] * scale + shift
    s = s * jax.nn.sigmoid(s)              # Swish
    s = s * mask_ref[...]                  # re-zero margins => conv3x3 zero padding

    # conv3x3 as 9 shifted (C,C)x(C,L) matmuls on the flat padded-row layout.
    s_ext = jnp.pad(s, ((0, 0), (Wp + 1, Wp + 1)))
    acc = jnp.zeros((C, L), jnp.float32)
    for dy in range(3):
        for dx in range(3):
            off = dy * Wp + dx
            acc = acc + jnp.dot(w3_ref[dy * 3 + dx], s_ext[:, off:off + L],
                                preferred_element_type=jnp.float32)
    h3 = acc + b3_ref[...]

    # Squeeze-and-excitation (pool over the valid columns only).
    pooled = jnp.sum(h3 * mask_ref[...], axis=-1, keepdims=True) * inv_hw  # (C, 1)
    g = jnp.maximum(jnp.dot(w1_ref[...], pooled,
                            preferred_element_type=jnp.float32), 0.0)      # (Cr, 1)
    gate = jax.nn.sigmoid(jnp.dot(w2_ref[...], g,
                                  preferred_element_type=jnp.float32))     # (C, 1)

    # 0.1-scaled residual: x in the same flat row layout is a constant-offset
    # slice of the conv5x5-padded input plane (no second padded copy of x).
    xres = xflat_ref[...][:, res_off:res_off + L]
    o_ref[...] = xres + 0.1 * h3 * gate


# ---------------------------------------------------------------------------
# Wrapper
# ---------------------------------------------------------------------------

def _round_up(n, m):
    return ((n + m - 1) // m) * m


def _cparams(semantics, block_bytes):
    # Explicit scoped-VMEM budget: double-buffered blocks + generous headroom,
    # clamped to a range safe on v5e / v6e (128 MiB) and v7x (64 MiB).
    limit = int(min(max(2 * block_bytes + (4 << 20), 32 << 20), 60 << 20))
    return pltpu.CompilerParams(dimension_semantics=semantics,
                                vmem_limit_bytes=limit)


def residual_block(x, w5, w1x1, gamma, beta, w3, b3, wse1, wse2, eps=1e-5):
    B, C, H, W = x.shape
    K5, P5, K3 = 5, 2, 3
    Cr = wse1.shape[0]
    Wp = W + 2 * P5                 # padded row width carried through the block
    Hp = H + 2 * P5
    L = H * Wp                      # flat spatial length of intermediates
    Lpad = _round_up(Hp * Wp + K5, 128)
    res_off = P5 * Wp + P5          # x[y, x] lives at flat index q + res_off

    # ---- trace-time layout / weight plumbing (tiny arrays, no per-pixel FLOPs) -
    xflat = jnp.pad(x, ((0, 0), (0, 0), (P5, P5), (P5, P5))).reshape(B, C, Hp * Wp)
    xflat = jnp.pad(xflat, ((0, 0), (0, 0), (P5, Lpad - P5 - Hp * Wp)))

    col = np.arange(L) % Wp
    mask = jnp.asarray(((col >= P5) & (col < P5 + W)).astype(np.float32)).reshape(1, L)

    hp = jax.lax.Precision.HIGHEST
    w5cols = jnp.transpose(w5, (0, 2, 3, 1)).reshape(C, K5 * K5 * C)
    wc = jnp.dot(w1x1.reshape(C, C), w5cols, precision=hp)    # fold 1x1 into 5x5
    wc_taps = jnp.transpose(wc.reshape(C, K5 * K5, C), (1, 0, 2))   # (25, C, C)
    w3_taps = jnp.transpose(w3, (2, 3, 0, 1)).reshape(K3 * K3, C, C)

    # ---- kernel A: folded conv(5x5∘1x1) + per-batch BN partial statistics ------
    blk_a = 4 * (C * Lpad + K5 * K5 * C * C + L + C * L + 2 * C)
    h1, s_sum, s_ssq = pl.pallas_call(
        functools.partial(conv51_bnstats_kernel, K=K5, Wp=Wp, L=L),
        out_shape=(jax.ShapeDtypeStruct((B, C, L), jnp.float32),
                   jax.ShapeDtypeStruct((B, C, 1), jnp.float32),
                   jax.ShapeDtypeStruct((B, C, 1), jnp.float32)),
        grid_spec=pltpu.PrefetchScalarGridSpec(
            num_scalar_prefetch=0,
            grid=(B,),
            in_specs=[pl.BlockSpec((None, C, Lpad), lambda b: (b, 0, 0)),
                      pl.BlockSpec((K5 * K5, C, C), lambda b: (0, 0, 0)),
                      pl.BlockSpec((1, L), lambda b: (0, 0))],
            out_specs=(pl.BlockSpec((None, C, L), lambda b: (b, 0, 0)),
                       pl.BlockSpec((None, C, 1), lambda b: (b, 0, 0)),
                       pl.BlockSpec((None, C, 1), lambda b: (b, 0, 0)))),
        compiler_params=_cparams(("parallel",), blk_a),
    )(xflat, wc_taps, mask)

    # ---- kernel B: BN + Swish + conv3x3 + SE + 0.1-residual, fused -------------
    blk_b = 4 * (C * Lpad + 2 * C * L + 2 * B * C + 3 * C
                 + K3 * K3 * C * C + 2 * Cr * C + L)
    kern_b = functools.partial(
        bn_swish_conv3_se_res_kernel, Wp=Wp, L=L,
        inv_count=1.0 / (B * H * W), inv_hw=1.0 / (H * W), eps=eps,
        res_off=res_off)
    vec_spec = pl.BlockSpec((C, 1), lambda b: (0, 0))
    out_flat = pl.pallas_call(
        kern_b,
        out_shape=jax.ShapeDtypeStruct((B, C, L), jnp.float32),
        grid_spec=pltpu.PrefetchScalarGridSpec(
            num_scalar_prefetch=0,
            grid=(B,),
            in_specs=[pl.BlockSpec((None, C, Lpad), lambda b: (b, 0, 0)),
                      pl.BlockSpec((None, C, L), lambda b: (b, 0, 0)),
                      pl.BlockSpec((B, C, 1), lambda b: (0, 0, 0)),
                      pl.BlockSpec((B, C, 1), lambda b: (0, 0, 0)),
                      vec_spec, vec_spec,
                      pl.BlockSpec((K3 * K3, C, C), lambda b: (0, 0, 0)),
                      vec_spec,
                      pl.BlockSpec((Cr, C), lambda b: (0, 0)),
                      pl.BlockSpec((C, Cr), lambda b: (0, 0)),
                      pl.BlockSpec((1, L), lambda b: (0, 0))],
            out_specs=pl.BlockSpec((None, C, L), lambda b: (b, 0, 0))),
        compiler_params=_cparams(("parallel",), blk_b),
    )(xflat, h1, s_sum, s_ssq,
      gamma.reshape(C, 1), beta.reshape(C, 1), w3_taps, b3.reshape(C, 1),
      wse1, wse2, mask)

    # Margin columns only existed to serve as conv zero-padding; drop them.
    return out_flat.reshape(B, C, H, Wp)[:, :, :, P5:P5 + W]


# ---------------------------------------------------------------------------
# Pure-JAX reference (mirrors the PyTorch module forward)
# ---------------------------------------------------------------------------

def reference(x, w5, w1x1, gamma, beta, w3, b3, wse1, wse2, eps=1e-5):
    dn = ("NCHW", "OIHW", "NCHW")
    hp = jax.lax.Precision.HIGHEST
    h = jax.lax.conv_general_dilated(x, w5, (1, 1), ((2, 2), (2, 2)),
                                     dimension_numbers=dn, precision=hp)
    h = jax.lax.conv_general_dilated(h, w1x1, (1, 1), ((0, 0), (0, 0)),
                                     dimension_numbers=dn, precision=hp)
    mean = jnp.mean(h, axis=(0, 2, 3), keepdims=True)
    var = jnp.var(h, axis=(0, 2, 3), keepdims=True)
    h = (h - mean) * jax.lax.rsqrt(var + eps)
    h = h * gamma[None, :, None, None] + beta[None, :, None, None]
    h = h * jax.nn.sigmoid(h)                                  # Swish
    h = jax.lax.conv_general_dilated(h, w3, (1, 1), ((1, 1), (1, 1)),
                                     dimension_numbers=dn, precision=hp)
    h = h + b3[None, :, None, None]
    y = jnp.mean(h, axis=(2, 3))                               # SE squeeze
    y = jnp.maximum(jnp.dot(y, wse1.T, precision=hp), 0.0)
    y = jax.nn.sigmoid(jnp.dot(y, wse2.T, precision=hp))
    h = h * y[:, :, None, None]
    return x + 0.1 * h


if __name__ == "__main__":
    B, C, H, W = 2, 32, 16, 16          # dim=32 so SE reduction=16 gives Cr=2
    Cr = C // 16

    key = jax.random.PRNGKey(0)
    kx, k5, k1, k3, kb3, ks1, ks2 = jax.random.split(key, 7)
    x = jax.random.normal(kx, (B, C, H, W), dtype=jnp.float32)
    w5 = jax.random.normal(k5, (C, C, 5, 5), dtype=jnp.float32) * 0.05
    w1x1 = jax.random.normal(k1, (C, C, 1, 1), dtype=jnp.float32) * 0.1
    w3 = jax.random.normal(k3, (C, C, 3, 3), dtype=jnp.float32) * 0.05
    b3 = jax.random.normal(kb3, (C,), dtype=jnp.float32) * 0.05       # conv3 bias
    wse1 = jax.random.normal(ks1, (Cr, C), dtype=jnp.float32) * 0.1   # fc[0].weight
    wse2 = jax.random.normal(ks2, (C, Cr), dtype=jnp.float32) * 0.1   # fc[2].weight
    gamma = jnp.ones((C,), jnp.float32)    # fresh BatchNorm2d affine params
    beta = jnp.zeros((C,), jnp.float32)

    out = jax.jit(residual_block)(x, w5, w1x1, gamma, beta, w3, b3, wse1, wse2)
    jax.block_until_ready(out)

    ref = reference(x, w5, w1x1, gamma, beta, w3, b3, wse1, wse2)
    err = float(jnp.max(jnp.abs(out - ref)))
    assert out.shape == x.shape
    assert jnp.allclose(out, ref, atol=2e-3, rtol=2e-3), (
        f"mismatch vs reference, max abs err {err}")
    print("KERNEL_OK")
</pallas_src>

<mosaic_0001>
module attributes {stable_mosaic.version = 11 : i64} {
  func.func @bn_swish_conv3_se_res_kernel(%arg0: i32, %arg1: memref<1x32x512xf32, #tpu.memory_space<vmem>>, %arg2: memref<1x32x320xf32, #tpu.memory_space<vmem>>, %arg3: memref<2x32x1xf32, #tpu.memory_space<vmem>>, %arg4: memref<2x32x1xf32, #tpu.memory_space<vmem>>, %arg5: memref<32x1xf32, #tpu.memory_space<vmem>>, %arg6: memref<32x1xf32, #tpu.memory_space<vmem>>, %arg7: memref<9x32x32xf32, #tpu.memory_space<vmem>>, %arg8: memref<32x1xf32, #tpu.memory_space<vmem>>, %arg9: memref<2x32xf32, #tpu.memory_space<vmem>>, %arg10: memref<32x2xf32, #tpu.memory_space<vmem>>, %arg11: memref<1x320xf32, #tpu.memory_space<vmem>>, %arg12: memref<1x32x320xf32, #tpu.memory_space<vmem>>) attributes {dimension_semantics = [#tpu.dimension_semantics<parallel>], iteration_bounds = array<i64: 2>, scalar_prefetch = 0 : i64, scratch_operands = 0 : i64, tpu.core_type = #tpu.core_type<tc>, window_params = [{transform_indices = @transform_0, window_bounds = array<i64: 1, 32, 512>}, {transform_indices = @transform_1, window_bounds = array<i64: 1, 32, 320>}, {pipeline_mode = #tpu.pipeline_mode<synchronous>, transform_indices = @transform_2, window_bounds = array<i64: 2, 32, 1>}, {pipeline_mode = #tpu.pipeline_mode<synchronous>, transform_indices = @transform_3, window_bounds = array<i64: 2, 32, 1>}, {pipeline_mode = #tpu.pipeline_mode<synchronous>, transform_indices = @transform_4, window_bounds = array<i64: 32, 1>}, {pipeline_mode = #tpu.pipeline_mode<synchronous>, transform_indices = @transform_5, window_bounds = array<i64: 32, 1>}, {pipeline_mode = #tpu.pipeline_mode<synchronous>, transform_indices = @transform_6, window_bounds = array<i64: 9, 32, 32>}, {pipeline_mode = #tpu.pipeline_mode<synchronous>, transform_indices = @transform_7, window_bounds = array<i64: 32, 1>}, {pipeline_mode = #tpu.pipeline_mode<synchronous>, transform_indices = @transform_8, window_bounds = array<i64: 2, 32>}, {pipeline_mode = #tpu.pipeline_mode<synchronous>, transform_indices = @transform_9, window_bounds = array<i64: 32, 2>}, {pipeline_mode = #tpu.pipeline_mode<synchronous>, transform_indices = @transform_10, window_bounds = array<i64: 1, 320>}, {transform_indices = @transform_11, window_bounds = array<i64: 1, 32, 320>}]} {
    %c0 = arith.constant 0 : index
    %c0_0 = arith.constant 0 : index
    %c0_1 = arith.constant 0 : index
    %0 = vector.load %arg3[%c0, %c0_0, %c0_1] : memref<2x32x1xf32, #tpu.memory_space<vmem>>, vector<2x32x1xf32>
    %cst = arith.constant dense<0.000000e+00> : vector<32x1xf32>
    %1 = vector.multi_reduction <add>, %0, %cst [0] : vector<2x32x1xf32> to vector<32x1xf32>
    %cst_2 = arith.constant 0.001953125 : f32
    %2 = vector.broadcast %cst_2 : f32 to vector<32x1xf32>
    %3 = arith.mulf %1, %2 : vector<32x1xf32>
    %c0_3 = arith.constant 0 : index
    %c0_4 = arith.constant 0 : index
    %c0_5 = arith.constant 0 : index
    %4 = vector.load %arg4[%c0_3, %c0_4, %c0_5] : memref<2x32x1xf32, #tpu.memory_space<vmem>>, vector<2x32x1xf32>
    %cst_6 = arith.constant dense<0.000000e+00> : vector<32x1xf32>
    %5 = vector.multi_reduction <add>, %4, %cst_6 [0] : vector<2x32x1xf32> to vector<32x1xf32>
    %cst_7 = arith.constant 0.001953125 : f32
    %6 = vector.broadcast %cst_7 : f32 to vector<32x1xf32>
    %7 = arith.mulf %5, %6 : vector<32x1xf32>
    %8 = arith.mulf %3, %3 : vector<32x1xf32>
    %9 = arith.subf %7, %8 : vector<32x1xf32>
    %c0_8 = arith.constant 0 : index
    %c0_9 = arith.constant 0 : index
    %10 = vector.load %arg5[%c0_8, %c0_9] : memref<32x1xf32, #tpu.memory_space<vmem>>, vector<32x1xf32>
    %cst_10 = arith.constant 9.99999974E-6 : f32
    %11 = vector.broadcast %cst_10 : f32 to vector<32x1xf32>
    %12 = arith.addf %9, %11 : vector<32x1xf32>
    %13 = math.rsqrt %12 : vector<32x1xf32>
    %14 = arith.mulf %10, %13 : vector<32x1xf32>
    %c0_11 = arith.constant 0 : index
    %c0_12 = arith.constant 0 : index
    %15 = vector.load %arg6[%c0_11, %c0_12] : memref<32x1xf32, #tpu.memory_space<vmem>>, vector<32x1xf32>
    %16 = arith.mulf %3, %14 : vector<32x1xf32>
    %17 = arith.subf %15, %16 : vector<32x1xf32>
    %c0_13 = arith.constant 0 : index
    %c0_14 = arith.constant 0 : index
    %c0_15 = arith.constant 0 : index
    %18 = vector.load %arg2[%c0_13, %c0_14, %c0_15] : memref<1x32x320xf32, #tpu.memory_space<vmem>>, vector<1x32x320xf32>
    %19 = vector.shape_cast %18 : vector<1x32x320xf32> to vector<32x320xf32>
    %20 = vector.broadcast %14 : vector<32x1xf32> to vector<32x320xf32>
    %21 = arith.mulf %19, %20 : vector<32x320xf32>
    %22 = vector.broadcast %17 : vector<32x1xf32> to vector<32x320xf32>
    %23 = arith.addf %21, %22 : vector<32x320xf32>
    %24 = arith.negf %23 : vector<32x320xf32>
    %25 = math.exp %24 : vector<32x320xf32>
    %cst_16 = arith.constant 1.000000e+00 : f32
    %26 = vector.broadcast %cst_16 : f32 to vector<32x320xf32>
    %27 = arith.addf %26, %25 : vector<32x320xf32>
    %28 = arith.divf %26, %27 : vector<32x320xf32>
    %29 = arith.mulf %23, %28 : vector<32x320xf32>
    %c0_17 = arith.constant 0 : index
    %c0_18 = arith.constant 0 : index
    %30 = vector.load %arg11[%c0_17, %c0_18] : memref<1x320xf32, #tpu.memory_space<vmem>>, vector<1x320xf32>
    %31 = vector.broadcast %30 : vector<1x320xf32> to vector<32x320xf32>
    %32 = arith.mulf %29, %31 : vector<32x320xf32>
    %c0_i32 = arith.constant 0 : i32
    %33 = arith.sitofp %c0_i32 : i32 to f32
    %34 = vector.broadcast %33 : f32 to vector<32x21xf32>
    %35 = tpu.concatenate %34, %32 in 1 : vector<32x21xf32>, vector<32x320xf32> -> vector<32x341xf32>
    %36 = vector.broadcast %33 : f32 to vector<32x21xf32>
    %37 = tpu.concatenate %35, %36 in 1 : vector<32x341xf32>, vector<32x21xf32> -> vector<32x362xf32>
    %cst_19 = arith.constant 0.000000e+00 : f32
    %38 = vector.broadcast %cst_19 : f32 to vector<32x320xf32>
    %c0_20 = arith.constant 0 : index
    %c0_21 = arith.constant 0 : index
    %c0_22 = arith.constant 0 : index
    %39 = vector.load %arg7[%c0_20, %c0_21, %c0_22] : memref<9x32x32xf32, #tpu.memory_space<vmem>>, vector<1x32x32xf32>
    %40 = vector.shape_cast %39 : vector<1x32x32xf32> to vector<32x32xf32>
    %41 = vector.extract_strided_slice %37 {offsets = [0, 0], sizes = [32, 320], strides = [1, 1]} : vector<32x362xf32> to vector<32x320xf32>
    %cst_23 = arith.constant dense<0.000000e+00> : vector<32x320xf32>
    %42 = tpu.matmul %40, %41, %cst_23 {dimension_numbers = #tpu.dot_dimension_numbers<[1], [0], [0], [1], [0, 0, 1, 1], [], []>} : vector<32x32xf32>, vector<32x320xf32>, vector<32x320xf32> -> vector<32x320xf32>
    %43 = arith.addf %38, %42 : vector<32x320xf32>
    %c1 = arith.constant 1 : index
    %c0_24 = arith.constant 0 : index
    %c0_25 = arith.constant 0 : index
    %44 = vector.load %arg7[%c1, %c0_24, %c0_25] : memref<9x32x32xf32, #tpu.memory_space<vmem>>, vector<1x32x32xf32>
    %45 = vector.shape_cast %44 : vector<1x32x32xf32> to vector<32x32xf32>
    %46 = vector.extract_strided_slice %37 {offsets = [0, 1], sizes = [32, 320], strides = [1, 1]} : vector<32x362xf32> to vector<32x320xf32>
    %cst_26 = arith.constant dense<0.000000e+00> : vector<32x320xf32>
    %47 = tpu.matmul %45, %46, %cst_26 {dimension_numbers = #tpu.dot_dimension_numbers<[1], [0], [0], [1], [0, 0, 1, 1], [], []>} : vector<32x32xf32>, vector<32x320xf32>, vector<32x320xf32> -> vector<32x320xf32>
    %48 = arith.addf %43, %47 : vector<32x320xf32>
    %c2 = arith.constant 2 : index
    %c0_27 = arith.constant 0 : index
    %c0_28 = arith.constant 0 : index
    %49 = vector.load %arg7[%c2, %c0_27, %c0_28] : memref<9x32x32xf32, #tpu.memory_space<vmem>>, vector<1x32x32xf32>
    %50 = vector.shape_cast %49 : vector<1x32x32xf32> to vector<32x32xf32>
    %51 = vector.extract_strided_slice %37 {offsets = [0, 2], sizes = [32, 320], strides = [1, 1]} : vector<32x362xf32> to vector<32x320xf32>
    %cst_29 = arith.constant dense<0.000000e+00> : vector<32x320xf32>
    %52 = tpu.matmul %50, %51, %cst_29 {dimension_numbers = #tpu.dot_dimension_numbers<[1], [0], [0], [1], [0, 0, 1, 1], [], []>} : vector<32x32xf32>, vector<32x320xf32>, vector<32x320xf32> -> vector<32x320xf32>
    %53 = arith.addf %48, %52 : vector<32x320xf32>
    %c3 = arith.constant 3 : index
    %c0_30 = arith.constant 0 : index
    %c0_31 = arith.constant 0 : index
    %54 = vector.load %arg7[%c3, %c0_30, %c0_31] : memref<9x32x32xf32, #tpu.memory_space<vmem>>, vector<1x32x32xf32>
    %55 = vector.shape_cast %54 : vector<1x32x32xf32> to vector<32x32xf32>
    %56 = vector.extract_strided_slice %37 {offsets = [0, 20], sizes = [32, 320], strides = [1, 1]} : vector<32x362xf32> to vector<32x320xf32>
    %cst_32 = arith.constant dense<0.000000e+00> : vector<32x320xf32>
    %57 = tpu.matmul %55, %56, %cst_32 {dimension_numbers = #tpu.dot_dimension_numbers<[1], [0], [0], [1], [0, 0, 1, 1], [], []>} : vector<32x32xf32>, vector<32x320xf32>, vector<32x320xf32> -> vector<32x320xf32>
    %58 = arith.addf %53, %57 : vector<32x320xf32>
    %c4 = arith.constant 4 : index
    %c0_33 = arith.constant 0 : index
    %c0_34 = arith.constant 0 : index
    %59 = vector.load %arg7[%c4, %c0_33, %c0_34] : memref<9x32x32xf32, #tpu.memory_space<vmem>>, vector<1x32x32xf32>
    %60 = vector.shape_cast %59 : vector<1x32x32xf32> to vector<32x32xf32>
    %61 = vector.extract_strided_slice %37 {offsets = [0, 21], sizes = [32, 320], strides = [1, 1]} : vector<32x362xf32> to vector<32x320xf32>
    %cst_35 = arith.constant dense<0.000000e+00> : vector<32x320xf32>
    %62 = tpu.matmul %60, %61, %cst_35 {dimension_numbers = #tpu.dot_dimension_numbers<[1], [0], [0], [1], [0, 0, 1, 1], [], []>} : vector<32x32xf32>, vector<32x320xf32>, vector<32x320xf32> -> vector<32x320xf32>
    %63 = arith.addf %58, %62 : vector<32x320xf32>
    %c5 = arith.constant 5 : index
    %c0_36 = arith.constant 0 : index
    %c0_37 = arith.constant 0 : index
    %64 = vector.load %arg7[%c5, %c0_36, %c0_37] : memref<9x32x32xf32, #tpu.memory_space<vmem>>, vector<1x32x32xf32>
    %65 = vector.shape_cast %64 : vector<1x32x32xf32> to vector<32x32xf32>
    %66 = vector.extract_strided_slice %37 {offsets = [0, 22], sizes = [32, 320], strides = [1, 1]} : vector<32x362xf32> to vector<32x320xf32>
    %cst_38 = arith.constant dense<0.000000e+00> : vector<32x320xf32>
    %67 = tpu.matmul %65, %66, %cst_38 {dimension_numbers = #tpu.dot_dimension_numbers<[1], [0], [0], [1], [0, 0, 1, 1], [], []>} : vector<32x32xf32>, vector<32x320xf32>, vector<32x320xf32> -> vector<32x320xf32>
    %68 = arith.addf %63, %67 : vector<32x320xf32>
    %c6 = arith.constant 6 : index
    %c0_39 = arith.constant 0 : index
    %c0_40 = arith.constant 0 : index
    %69 = vector.load %arg7[%c6, %c0_39, %c0_40] : memref<9x32x32xf32, #tpu.memory_space<vmem>>, vector<1x32x32xf32>
    %70 = vector.shape_cast %69 : vector<1x32x32xf32> to vector<32x32xf32>
    %71 = vector.extract_strided_slice %37 {offsets = [0, 40], sizes = [32, 320], strides = [1, 1]} : vector<32x362xf32> to vector<32x320xf32>
    %cst_41 = arith.constant dense<0.000000e+00> : vector<32x320xf32>
    %72 = tpu.matmul %70, %71, %cst_41 {dimension_numbers = #tpu.dot_dimension_numbers<[1], [0], [0], [1], [0, 0, 1, 1], [], []>} : vector<32x32xf32>, vector<32x320xf32>, vector<32x320xf32> -> vector<32x320xf32>
    %73 = arith.addf %68, %72 : vector<32x320xf32>
    %c7 = arith.constant 7 : index
    %c0_42 = arith.constant 0 : index
    %c0_43 = arith.constant 0 : index
    %74 = vector.load %arg7[%c7, %c0_42, %c0_43] : memref<9x32x32xf32, #tpu.memory_space<vmem>>, vector<1x32x32xf32>
    %75 = vector.shape_cast %74 : vector<1x32x32xf32> to vector<32x32xf32>
    %76 = vector.extract_strided_slice %37 {offsets = [0, 41], sizes = [32, 320], strides = [1, 1]} : vector<32x362xf32> to vector<32x320xf32>
    %cst_44 = arith.constant dense<0.000000e+00> : vector<32x320xf32>
    %77 = tpu.matmul %75, %76, %cst_44 {dimension_numbers = #tpu.dot_dimension_numbers<[1], [0], [0], [1], [0, 0, 1, 1], [], []>} : vector<32x32xf32>, vector<32x320xf32>, vector<32x320xf32> -> vector<32x320xf32>
    %78 = arith.addf %73, %77 : vector<32x320xf32>
    %c8 = arith.constant 8 : index
    %c0_45 = arith.constant 0 : index
    %c0_46 = arith.constant 0 : index
    %79 = vector.load %arg7[%c8, %c0_45, %c0_46] : memref<9x32x32xf32, #tpu.memory_space<vmem>>, vector<1x32x32xf32>
    %80 = vector.shape_cast %79 : vector<1x32x32xf32> to vector<32x32xf32>
    %81 = vector.extract_strided_slice %37 {offsets = [0, 42], sizes = [32, 320], strides = [1, 1]} : vector<32x362xf32> to vector<32x320xf32>
    %cst_47 = arith.constant dense<0.000000e+00> : vector<32x320xf32>
    %82 = tpu.matmul %80, %81, %cst_47 {dimension_numbers = #tpu.dot_dimension_numbers<[1], [0], [0], [1], [0, 0, 1, 1], [], []>} : vector<32x32xf32>, vector<32x320xf32>, vector<32x320xf32> -> vector<32x320xf32>
    %83 = arith.addf %78, %82 : vector<32x320xf32>
    %c0_48 = arith.constant 0 : index
    %c0_49 = arith.constant 0 : index
    %84 = vector.load %arg8[%c0_48, %c0_49] : memref<32x1xf32, #tpu.memory_space<vmem>>, vector<32x1xf32>
    %85 = vector.broadcast %84 : vector<32x1xf32> to vector<32x320xf32>
    %86 = arith.addf %83, %85 : vector<32x320xf32>
    %c0_50 = arith.constant 0 : index
    %c0_51 = arith.constant 0 : index
    %87 = vector.load %arg11[%c0_50, %c0_51] : memref<1x320xf32, #tpu.memory_space<vmem>>, vector<1x320xf32>
    %88 = vector.broadcast %87 : vector<1x320xf32> to vector<32x320xf32>
    %89 = arith.mulf %86, %88 : vector<32x320xf32>
    %cst_52 = arith.constant dense<0.000000e+00> : vector<32xf32>
    %90 = vector.multi_reduction <add>, %89, %cst_52 [1] : vector<32x320xf32> to vector<32xf32>
    %91 = vector.shape_cast %90 : vector<32xf32> to vector<32x1xf32>
    %cst_53 = arith.constant 3.906250e-03 : f32
    %92 = vector.broadcast %cst_53 : f32 to vector<32x1xf32>
    %93 = arith.mulf %91, %92 : vector<32x1xf32>
    %c0_54 = arith.constant 0 : index
    %c0_55 = arith.constant 0 : index
    %94 = vector.load %arg9[%c0_54, %c0_55] : memref<2x32xf32, #tpu.memory_space<vmem>>, vector<2x32xf32>
    %cst_56 = arith.constant dense<0.000000e+00> : vector<2x1xf32>
    %95 = tpu.matmul %94, %93, %cst_56 {dimension_numbers = #tpu.dot_dimension_numbers<[1], [0], [0], [1], [0, 0, 1, 1], [], []>} : vector<2x32xf32>, vector<32x1xf32>, vector<2x1xf32> -> vector<2x1xf32>
    %cst_57 = arith.constant 0.000000e+00 : f32
    %96 = vector.broadcast %cst_57 : f32 to vector<2x1xf32>
    %97 = arith.maximumf %95, %96 : vector<2x1xf32>
    %c0_58 = arith.constant 0 : index
    %c0_59 = arith.constant 0 : index
    %98 = vector.load %arg10[%c0_58, %c0_59] : memref<32x2xf32, #tpu.memory_space<vmem>>, vector<32x2xf32>
    %cst_60 = arith.constant dense<0.000000e+00> : vector<32x1xf32>
    %99 = tpu.matmul %98, %97, %cst_60 {dimension_numbers = #tpu.dot_dimension_numbers<[1], [0], [0], [1], [0, 0, 1, 1], [], []>} : vector<32x2xf32>, vector<2x1xf32>, vector<32x1xf32> -> vector<32x1xf32>
    %100 = arith.negf %99 : vector<32x1xf32>
    %101 = math.exp %100 : vector<32x1xf32>
    %cst_61 = arith.constant 1.000000e+00 : f32
    %102 = vector.broadcast %cst_61 : f32 to vector<32x1xf32>
    %103 = arith.addf %102, %101 : vector<32x1xf32>
    %104 = arith.divf %102, %103 : vector<32x1xf32>
    %c0_62 = arith.constant 0 : index
    %c0_63 = arith.constant 0 : index
    %c0_64 = arith.constant 0 : index
    %105 = vector.load %arg1[%c0_62, %c0_63, %c0_64] : memref<1x32x512xf32, #tpu.memory_space<vmem>>, vector<1x32x512xf32>
    %106 = vector.shape_cast %105 : vector<1x32x512xf32> to vector<32x512xf32>
    %107 = vector.extract_strided_slice %106 {offsets = [0, 42], sizes = [32, 320], strides = [1, 1]} : vector<32x512xf32> to vector<32x320xf32>
    %cst_65 = arith.constant 1.000000e-01 : f32
    %108 = vector.broadcast %cst_65 : f32 to vector<32x320xf32>
    %109 = arith.mulf %108, %86 : vector<32x320xf32>
    %110 = vector.broadcast %104 : vector<32x1xf32> to vector<32x320xf32>
    %111 = arith.mulf %109, %110 : vector<32x320xf32>
    %112 = arith.addf %107, %111 : vector<32x320xf32>
    %c0_66 = arith.constant 0 : index
    %c0_67 = arith.constant 0 : index
    %c0_68 = arith.constant 0 : index
    %113 = vector.load %arg12[%c0_66, %c0_67, %c0_68] : memref<1x32x320xf32, #tpu.memory_space<vmem>>, vector<1x32x320xf32>
    %114 = vector.shape_cast %113 : vector<1x32x320xf32> to vector<32x320xf32>
    %115 = vector.shape_cast %112 : vector<32x320xf32> to vector<1x32x320xf32>
    tpu.vector_store %arg12[%c0_66, %c0_67, %c0_68], %115 {strides = array<i32>} : memref<1x32x320xf32, #tpu.memory_space<vmem>>, vector<1x32x320xf32>,
    return
  }
  func.func @transform_0(%arg0: i32) -> (i32, i32, i32) {
    %c0_i32 = arith.constant 0 : i32
    %c0_i32_0 = arith.constant 0 : i32
    %c0_i32_1 = arith.constant 0 : i32
    return %arg0, %c0_i32, %c0_i32_0 : i32, i32, i32
  }
  func.func @transform_1(%arg0: i32) -> (i32, i32, i32) {
    %c0_i32 = arith.constant 0 : i32
    %c0_i32_0 = arith.constant 0 : i32
    %c0_i32_1 = arith.constant 0 : i32
    return %arg0, %c0_i32, %c0_i32_0 : i32, i32, i32
  }
  func.func @transform_2(%arg0: i32) -> (i32, i32, i32) {
    %c0_i32 = arith.constant 0 : i32
    %c0_i32_0 = arith.constant 0 : i32
    %c0_i32_1 = arith.constant 0 : i32
    %c0_i32_2 = arith.constant 0 : i32
    return %c0_i32, %c0_i32_0, %c0_i32_1 : i32, i32, i32
  }
  func.func @transform_3(%arg0: i32) -> (i32, i32, i32) {
    %c0_i32 = arith.constant 0 : i32
    %c0_i32_0 = arith.constant 0 : i32
    %c0_i32_1 = arith.constant 0 : i32
    %c0_i32_2 = arith.constant 0 : i32
    return %c0_i32, %c0_i32_0, %c0_i32_1 : i32, i32, i32
  }
  func.func @transform_4(%arg0: i32) -> (i32, i32) {
    %c0_i32 = arith.constant 0 : i32
    %c0_i32_0 = arith.constant 0 : i32
    %c0_i32_1 = arith.constant 0 : i32
    return %c0_i32, %c0_i32_0 : i32, i32
  }
  func.func @transform_5(%arg0: i32) -> (i32, i32) {
    %c0_i32 = arith.constant 0 : i32
    %c0_i32_0 = arith.constant 0 : i32
    %c0_i32_1 = arith.constant 0 : i32
    return %c0_i32, %c0_i32_0 : i32, i32
  }
  func.func @transform_6(%arg0: i32) -> (i32, i32, i32) {
    %c0_i32 = arith.constant 0 : i32
    %c0_i32_0 = arith.constant 0 : i32
    %c0_i32_1 = arith.constant 0 : i32
    %c0_i32_2 = arith.constant 0 : i32
    return %c0_i32, %c0_i32_0, %c0_i32_1 : i32, i32, i32
  }
  func.func @transform_7(%arg0: i32) -> (i32, i32) {
    %c0_i32 = arith.constant 0 : i32
    %c0_i32_0 = arith.constant 0 : i32
    %c0_i32_1 = arith.constant 0 : i32
    return %c0_i32, %c0_i32_0 : i32, i32
  }
  func.func @transform_8(%arg0: i32) -> (i32, i32) {
    %c0_i32 = arith.constant 0 : i32
    %c0_i32_0 = arith.constant 0 : i32
    %c0_i32_1 = arith.constant 0 : i32
    return %c0_i32, %c0_i32_0 : i32, i32
  }
  func.func @transform_9(%arg0: i32) -> (i32, i32) {
    %c0_i32 = arith.constant 0 : i32
    %c0_i32_0 = arith.constant 0 : i32
    %c0_i32_1 = arith.constant 0 : i32
    return %c0_i32, %c0_i32_0 : i32, i32
  }
  func.func @transform_10(%arg0: i32) -> (i32, i32) {
    %c0_i32 = arith.constant 0 : i32
    %c0_i32_0 = arith.constant 0 : i32
    %c0_i32_1 = arith.constant 0 : i32
    return %c0_i32, %c0_i32_0 : i32, i32
  }
  func.func @transform_11(%arg0: i32) -> (i32, i32, i32) {
    %c0_i32 = arith.constant 0 : i32
    %c0_i32_0 = arith.constant 0 : i32
    %c0_i32_1 = arith.constant 0 : i32
    return %arg0, %c0_i32, %c0_i32_0 : i32, i32, i32
  }
}

module attributes {stable_mosaic.version = 11 : i64} {
  func.func @conv51_bnstats_kernel(%arg0: i32, %arg1: memref<1x32x512xf32, #tpu.memory_space<vmem>>, %arg2: memref<25x32x32xf32, #tpu.memory_space<vmem>>, %arg3: memref<1x320xf32, #tpu.memory_space<vmem>>, %arg4: memref<1x32x320xf32, #tpu.memory_space<vmem>>, %arg5: memref<1x32x1xf32, #tpu.memory_space<vmem>>, %arg6: memref<1x32x1xf32, #tpu.memory_space<vmem>>) attributes {dimension_semantics = [#tpu.dimension_semantics<parallel>], iteration_bounds = array<i64: 2>, scalar_prefetch = 0 : i64, scratch_operands = 0 : i64, tpu.core_type = #tpu.core_type<tc>, window_params = [{transform_indices = @transform_0, window_bounds = array<i64: 1, 32, 512>}, {pipeline_mode = #tpu.pipeline_mode<synchronous>, transform_indices = @transform_1, window_bounds = array<i64: 25, 32, 32>}, {pipeline_mode = #tpu.pipeline_mode<synchronous>, transform_indices = @transform_2, window_bounds = array<i64: 1, 320>}, {transform_indices = @transform_3, window_bounds = array<i64: 1, 32, 320>}, {transform_indices = @transform_4, window_bounds = array<i64: 1, 32, 1>}, {transform_indices = @transform_5, window_bounds = array<i64: 1, 32, 1>}]} {
    %c0 = arith.constant 0 : index
    %c0_0 = arith.constant 0 : index
    %c0_1 = arith.constant 0 : index
    %0 = vector.load %arg1[%c0, %c0_0, %c0_1] : memref<1x32x512xf32, #tpu.memory_space<vmem>>, vector<1x32x512xf32>
    %1 = vector.shape_cast %0 : vector<1x32x512xf32> to vector<32x512xf32>
    %cst = arith.constant 0.000000e+00 : f32
    %2 = vector.broadcast %cst : f32 to vector<32x320xf32>
    %c0_2 = arith.constant 0 : index
    %c0_3 = arith.constant 0 : index
    %c0_4 = arith.constant 0 : index
    %3 = vector.load %arg2[%c0_2, %c0_3, %c0_4] : memref<25x32x32xf32, #tpu.memory_space<vmem>>, vector<1x32x32xf32>
    %4 = vector.shape_cast %3 : vector<1x32x32xf32> to vector<32x32xf32>
    %5 = vector.extract_strided_slice %1 {offsets = [0, 0], sizes = [32, 320], strides = [1, 1]} : vector<32x512xf32> to vector<32x320xf32>
    %cst_5 = arith.constant dense<0.000000e+00> : vector<32x320xf32>
    %6 = tpu.matmul %4, %5, %cst_5 {dimension_numbers = #tpu.dot_dimension_numbers<[1], [0], [0], [1], [0, 0, 1, 1], [], []>} : vector<32x32xf32>, vector<32x320xf32>, vector<32x320xf32> -> vector<32x320xf32>
    %7 = arith.addf %2, %6 : vector<32x320xf32>
    %c1 = arith.constant 1 : index
    %c0_6 = arith.constant 0 : index
    %c0_7 = arith.constant 0 : index
    %8 = vector.load %arg2[%c1, %c0_6, %c0_7] : memref<25x32x32xf32, #tpu.memory_space<vmem>>, vector<1x32x32xf32>
    %9 = vector.shape_cast %8 : vector<1x32x32xf32> to vector<32x32xf32>
    %10 = vector.extract_strided_slice %1 {offsets = [0, 1], sizes = [32, 320], strides = [1, 1]} : vector<32x512xf32> to vector<32x320xf32>
    %cst_8 = arith.constant dense<0.000000e+00> : vector<32x320xf32>
    %11 = tpu.matmul %9, %10, %cst_8 {dimension_numbers = #tpu.dot_dimension_numbers<[1], [0], [0], [1], [0, 0, 1, 1], [], []>} : vector<32x32xf32>, vector<32x320xf32>, vector<32x320xf32> -> vector<32x320xf32>
    %12 = arith.addf %7, %11 : vector<32x320xf32>
    %c2 = arith.constant 2 : index
    %c0_9 = arith.constant 0 : index
    %c0_10 = arith.constant 0 : index
    %13 = vector.load %arg2[%c2, %c0_9, %c0_10] : memref<25x32x32xf32, #tpu.memory_space<vmem>>, vector<1x32x32xf32>
    %14 = vector.shape_cast %13 : vector<1x32x32xf32> to vector<32x32xf32>
    %15 = vector.extract_strided_slice %1 {offsets = [0, 2], sizes = [32, 320], strides = [1, 1]} : vector<32x512xf32> to vector<32x320xf32>
    %cst_11 = arith.constant dense<0.000000e+00> : vector<32x320xf32>
    %16 = tpu.matmul %14, %15, %cst_11 {dimension_numbers = #tpu.dot_dimension_numbers<[1], [0], [0], [1], [0, 0, 1, 1], [], []>} : vector<32x32xf32>, vector<32x320xf32>, vector<32x320xf32> -> vector<32x320xf32>
    %17 = arith.addf %12, %16 : vector<32x320xf32>
    %c3 = arith.constant 3 : index
    %c0_12 = arith.constant 0 : index
    %c0_13 = arith.constant 0 : index
    %18 = vector.load %arg2[%c3, %c0_12, %c0_13] : memref<25x32x32xf32, #tpu.memory_space<vmem>>, vector<1x32x32xf32>
    %19 = vector.shape_cast %18 : vector<1x32x32xf32> to vector<32x32xf32>
    %20 = vector.extract_strided_slice %1 {offsets = [0, 3], sizes = [32, 320], strides = [1, 1]} : vector<32x512xf32> to vector<32x320xf32>
    %cst_14 = arith.constant dense<0.000000e+00> : vector<32x320xf32>
    %21 = tpu.matmul %19, %20, %cst_14 {dimension_numbers = #tpu.dot_dimension_numbers<[1], [0], [0], [1], [0, 0, 1, 1], [], []>} : vector<32x32xf32>, vector<32x320xf32>, vector<32x320xf32> -> vector<32x320xf32>
    %22 = arith.addf %17, %21 : vector<32x320xf32>
    %c4 = arith.constant 4 : index
    %c0_15 = arith.constant 0 : index
    %c0_16 = arith.constant 0 : index
    %23 = vector.load %arg2[%c4, %c0_15, %c0_16] : memref<25x32x32xf32, #tpu.memory_space<vmem>>, vector<1x32x32xf32>
    %24 = vector.shape_cast %23 : vector<1x32x32xf32> to vector<32x32xf32>
    %25 = vector.extract_strided_slice %1 {offsets = [0, 4], sizes = [32, 320], strides = [1, 1]} : vector<32x512xf32> to vector<32x320xf32>
    %cst_17 = arith.constant dense<0.000000e+00> : vector<32x320xf32>
    %26 = tpu.matmul %24, %25, %cst_17 {dimension_numbers = #tpu.dot_dimension_numbers<[1], [0], [0], [1], [0, 0, 1, 1], [], []>} : vector<32x32xf32>, vector<32x320xf32>, vector<32x320xf32> -> vector<32x320xf32>
    %27 = arith.addf %22, %26 : vector<32x320xf32>
    %c5 = arith.constant 5 : index
    %c0_18 = arith.constant 0 : index
    %c0_19 = arith.constant 0 : index
    %28 = vector.load %arg2[%c5, %c0_18, %c0_19] : memref<25x32x32xf32, #tpu.memory_space<vmem>>, vector<1x32x32xf32>
    %29 = vector.shape_cast %28 : vector<1x32x32xf32> to vector<32x32xf32>
    %30 = vector.extract_strided_slice %1 {offsets = [0, 20], sizes = [32, 320], strides = [1, 1]} : vector<32x512xf32> to vector<32x320xf32>
    %cst_20 = arith.constant dense<0.000000e+00> : vector<32x320xf32>
    %31 = tpu.matmul %29, %30, %cst_20 {dimension_numbers = #tpu.dot_dimension_numbers<[1], [0], [0], [1], [0, 0, 1, 1], [], []>} : vector<32x32xf32>, vector<32x320xf32>, vector<32x320xf32> -> vector<32x320xf32>
    %32 = arith.addf %27, %31 : vector<32x320xf32>
    %c6 = arith.constant 6 : index
    %c0_21 = arith.constant 0 : index
    %c0_22 = arith.constant 0 : index
    %33 = vector.load %arg2[%c6, %c0_21, %c0_22] : memref<25x32x32xf32, #tpu.memory_space<vmem>>, vector<1x32x32xf32>
    %34 = vector.shape_cast %33 : vector<1x32x32xf32> to vector<32x32xf32>
    %35 = vector.extract_strided_slice %1 {offsets = [0, 21], sizes = [32, 320], strides = [1, 1]} : vector<32x512xf32> to vector<32x320xf32>
    %cst_23 = arith.constant dense<0.000000e+00> : vector<32x320xf32>
    %36 = tpu.matmul %34, %35, %cst_23 {dimension_numbers = #tpu.dot_dimension_numbers<[1], [0], [0], [1], [0, 0, 1, 1], [], []>} : vector<32x32xf32>, vector<32x320xf32>, vector<32x320xf32> -> vector<32x320xf32>
    %37 = arith.addf %32, %36 : vector<32x320xf32>
    %c7 = arith.constant 7 : index
    %c0_24 = arith.constant 0 : index
    %c0_25 = arith.constant 0 : index
    %38 = vector.load %arg2[%c7, %c0_24, %c0_25] : memref<25x32x32xf32, #tpu.memory_space<vmem>>, vector<1x32x32xf32>
    %39 = vector.shape_cast %38 : vector<1x32x32xf32> to vector<32x32xf32>
    %40 = vector.extract_strided_slice %1 {offsets = [0, 22], sizes = [32, 320], strides = [1, 1]} : vector<32x512xf32> to vector<32x320xf32>
    %cst_26 = arith.constant dense<0.000000e+00> : vector<32x320xf32>
    %41 = tpu.matmul %39, %40, %cst_26 {dimension_numbers = #tpu.dot_dimension_numbers<[1], [0], [0], [1], [0, 0, 1, 1], [], []>} : vector<32x32xf32>, vector<32x320xf32>, vector<32x320xf32> -> vector<32x320xf32>
    %42 = arith.addf %37, %41 : vector<32x320xf32>
    %c8 = arith.constant 8 : index
    %c0_27 = arith.constant 0 : index
    %c0_28 = arith.constant 0 : index
    %43 = vector.load %arg2[%c8, %c0_27, %c0_28] : memref<25x32x32xf32, #tpu.memory_space<vmem>>, vector<1x32x32xf32>
    %44 = vector.shape_cast %43 : vector<1x32x32xf32> to vector<32x32xf32>
    %45 = vector.extract_strided_slice %1 {offsets = [0, 23], sizes = [32, 320], strides = [1, 1]} : vector<32x512xf32> to vector<32x320xf32>
    %cst_29 = arith.constant dense<0.000000e+00> : vector<32x320xf32>
    %46 = tpu.matmul %44, %45, %cst_29 {dimension_numbers = #tpu.dot_dimension_numbers<[1], [0], [0], [1], [0, 0, 1, 1], [], []>} : vector<32x32xf32>, vector<32x320xf32>, vector<32x320xf32> -> vector<32x320xf32>
    %47 = arith.addf %42, %46 : vector<32x320xf32>
    %c9 = arith.constant 9 : index
    %c0_30 = arith.constant 0 : index
    %c0_31 = arith.constant 0 : index
    %48 = vector.load %arg2[%c9, %c0_30, %c0_31] : memref<25x32x32xf32, #tpu.memory_space<vmem>>, vector<1x32x32xf32>
    %49 = vector.shape_cast %48 : vector<1x32x32xf32> to vector<32x32xf32>
    %50 = vector.extract_strided_slice %1 {offsets = [0, 24], sizes = [32, 320], strides = [1, 1]} : vector<32x512xf32> to vector<32x320xf32>
    %cst_32 = arith.constant dense<0.000000e+00> : vector<32x320xf32>
    %51 = tpu.matmul %49, %50, %cst_32 {dimension_numbers = #tpu.dot_dimension_numbers<[1], [0], [0], [1], [0, 0, 1, 1], [], []>} : vector<32x32xf32>, vector<32x320xf32>, vector<32x320xf32> -> vector<32x320xf32>
    %52 = arith.addf %47, %51 : vector<32x320xf32>
    %c10 = arith.constant 10 : index
    %c0_33 = arith.constant 0 : index
    %c0_34 = arith.constant 0 : index
    %53 = vector.load %arg2[%c10, %c0_33, %c0_34] : memref<25x32x32xf32, #tpu.memory_space<vmem>>, vector<1x32x32xf32>
    %54 = vector.shape_cast %53 : vector<1x32x32xf32> to vector<32x32xf32>
    %55 = vector.extract_strided_slice %1 {offsets = [0, 40], sizes = [32, 320], strides = [1, 1]} : vector<32x512xf32> to vector<32x320xf32>
    %cst_35 = arith.constant dense<0.000000e+00> : vector<32x320xf32>
    %56 = tpu.matmul %54, %55, %cst_35 {dimension_numbers = #tpu.dot_dimension_numbers<[1], [0], [0], [1], [0, 0, 1, 1], [], []>} : vector<32x32xf32>, vector<32x320xf32>, vector<32x320xf32> -> vector<32x320xf32>
    %57 = arith.addf %52, %56 : vector<32x320xf32>
    %c11 = arith.constant 11 : index
    %c0_36 = arith.constant 0 : index
    %c0_37 = arith.constant 0 : index
    %58 = vector.load %arg2[%c11, %c0_36, %c0_37] : memref<25x32x32xf32, #tpu.memory_space<vmem>>, vector<1x32x32xf32>
    %59 = vector.shape_cast %58 : vector<1x32x32xf32> to vector<32x32xf32>
    %60 = vector.extract_strided_slice %1 {offsets = [0, 41], sizes = [32, 320], strides = [1, 1]} : vector<32x512xf32> to vector<32x320xf32>
    %cst_38 = arith.constant dense<0.000000e+00> : vector<32x320xf32>
    %61 = tpu.matmul %59, %60, %cst_38 {dimension_numbers = #tpu.dot_dimension_numbers<[1], [0], [0], [1], [0, 0, 1, 1], [], []>} : vector<32x32xf32>, vector<32x320xf32>, vector<32x320xf32> -> vector<32x320xf32>
    %62 = arith.addf %57, %61 : vector<32x320xf32>
    %c12 = arith.constant 12 : index
    %c0_39 = arith.constant 0 : index
    %c0_40 = arith.constant 0 : index
    %63 = vector.load %arg2[%c12, %c0_39, %c0_40] : memref<25x32x32xf32, #tpu.memory_space<vmem>>, vector<1x32x32xf32>
    %64 = vector.shape_cast %63 : vector<1x32x32xf32> to vector<32x32xf32>
    %65 = vector.extract_strided_slice %1 {offsets = [0, 42], sizes = [32, 320], strides = [1, 1]} : vector<32x512xf32> to vector<32x320xf32>
    %cst_41 = arith.constant dense<0.000000e+00> : vector<32x320xf32>
    %66 = tpu.matmul %64, %65, %cst_41 {dimension_numbers = #tpu.dot_dimension_numbers<[1], [0], [0], [1], [0, 0, 1, 1], [], []>} : vector<32x32xf32>, vector<32x320xf32>, vector<32x320xf32> -> vector<32x320xf32>
    %67 = arith.addf %62, %66 : vector<32x320xf32>
    %c13 = arith.constant 13 : index
    %c0_42 = arith.constant 0 : index
    %c0_43 = arith.constant 0 : index
    %68 = vector.load %arg2[%c13, %c0_42, %c0_43] : memref<25x32x32xf32, #tpu.memory_space<vmem>>, vector<1x32x32xf32>
    %69 = vector.shape_cast %68 : vector<1x32x32xf32> to vector<32x32xf32>
    %70 = vector.extract_strided_slice %1 {offsets = [0, 43], sizes = [32, 320], strides = [1, 1]} : vector<32x512xf32> to vector<32x320xf32>
    %cst_44 = arith.constant dense<0.000000e+00> : vector<32x320xf32>
    %71 = tpu.matmul %69, %70, %cst_44 {dimension_numbers = #tpu.dot_dimension_numbers<[1], [0], [0], [1], [0, 0, 1, 1], [], []>} : vector<32x32xf32>, vector<32x320xf32>, vector<32x320xf32> -> vector<32x320xf32>
    %72 = arith.addf %67, %71 : vector<32x320xf32>
    %c14 = arith.constant 14 : index
    %c0_45 = arith.constant 0 : index
    %c0_46 = arith.constant 0 : index
    %73 = vector.load %arg2[%c14, %c0_45, %c0_46] : memref<25x32x32xf32, #tpu.memory_space<vmem>>, vector<1x32x32xf32>
    %74 = vector.shape_cast %73 : vector<1x32x32xf32> to vector<32x32xf32>
    %75 = vector.extract_strided_slice %1 {offsets = [0, 44], sizes = [32, 320], strides = [1, 1]} : vector<32x512xf32> to vector<32x320xf32>
    %cst_47 = arith.constant dense<0.000000e+00> : vector<32x320xf32>
    %76 = tpu.matmul %74, %75, %cst_47 {dimension_numbers = #tpu.dot_dimension_numbers<[1], [0], [0], [1], [0, 0, 1, 1], [], []>} : vector<32x32xf32>, vector<32x320xf32>, vector<32x320xf32> -> vector<32x320xf32>
    %77 = arith.addf %72, %76 : vector<32x320xf32>
    %c15 = arith.constant 15 : index
    %c0_48 = arith.constant 0 : index
    %c0_49 = arith.constant 0 : index
    %78 = vector.load %arg2[%c15, %c0_48, %c0_49] : memref<25x32x32xf32, #tpu.memory_space<vmem>>, vector<1x32x32xf32>
    %79 = vector.shape_cast %78 : vector<1x32x32xf32> to vector<32x32xf32>
    %80 = vector.extract_strided_slice %1 {offsets = [0, 60], sizes = [32, 320], strides = [1, 1]} : vector<32x512xf32> to vector<32x320xf32>
    %cst_50 = arith.constant dense<0.000000e+00> : vector<32x320xf32>
    %81 = tpu.matmul %79, %80, %cst_50 {dimension_numbers = #tpu.dot_dimension_numbers<[1], [0], [0], [1], [0, 0, 1, 1], [], []>} : vector<32x32xf32>, vector<32x320xf32>, vector<32x320xf32> -> vector<32x320xf32>
    %82 = arith.addf %77, %81 : vector<32x320xf32>
    %c16 = arith.constant 16 : index
    %c0_51 = arith.constant 0 : index
    %c0_52 = arith.constant 0 : index
    %83 = vector.load %arg2[%c16, %c0_51, %c0_52] : memref<25x32x32xf32, #tpu.memory_space<vmem>>, vector<1x32x32xf32>
    %84 = vector.shape_cast %83 : vector<1x32x32xf32> to vector<32x32xf32>
    %85 = vector.extract_strided_slice %1 {offsets = [0, 61], sizes = [32, 320], strides = [1, 1]} : vector<32x512xf32> to vector<32x320xf32>
    %cst_53 = arith.constant dense<0.000000e+00> : vector<32x320xf32>
    %86 = tpu.matmul %84, %85, %cst_53 {dimension_numbers = #tpu.dot_dimension_numbers<[1], [0], [0], [1], [0, 0, 1, 1], [], []>} : vector<32x32xf32>, vector<32x320xf32>, vector<32x320xf32> -> vector<32x320xf32>
    %87 = arith.addf %82, %86 : vector<32x320xf32>
    %c17 = arith.constant 17 : index
    %c0_54 = arith.constant 0 : index
    %c0_55 = arith.constant 0 : index
    %88 = vector.load %arg2[%c17, %c0_54, %c0_55] : memref<25x32x32xf32, #tpu.memory_space<vmem>>, vector<1x32x32xf32>
    %89 = vector.shape_cast %88 : vector<1x32x32xf32> to vector<32x32xf32>
    %90 = vector.extract_strided_slice %1 {offsets = [0, 62], sizes = [32, 320], strides = [1, 1]} : vector<32x512xf32> to vector<32x320xf32>
    %cst_56 = arith.constant dense<0.000000e+00> : vector<32x320xf32>
    %91 = tpu.matmul %89, %90, %cst_56 {dimension_numbers = #tpu.dot_dimension_numbers<[1], [0], [0], [1], [0, 0, 1, 1], [], []>} : vector<32x32xf32>, vector<32x320xf32>, vector<32x320xf32> -> vector<32x320xf32>
    %92 = arith.addf %87, %91 : vector<32x320xf32>
    %c18 = arith.constant 18 : index
    %c0_57 = arith.constant 0 : index
    %c0_58 = arith.constant 0 : index
    %93 = vector.load %arg2[%c18, %c0_57, %c0_58] : memref<25x32x32xf32, #tpu.memory_space<vmem>>, vector<1x32x32xf32>
    %94 = vector.shape_cast %93 : vector<1x32x32xf32> to vector<32x32xf32>
    %95 = vector.extract_strided_slice %1 {offsets = [0, 63], sizes = [32, 320], strides = [1, 1]} : vector<32x512xf32> to vector<32x320xf32>
    %cst_59 = arith.constant dense<0.000000e+00> : vector<32x320xf32>
    %96 = tpu.matmul %94, %95, %cst_59 {dimension_numbers = #tpu.dot_dimension_numbers<[1], [0], [0], [1], [0, 0, 1, 1], [], []>} : vector<32x32xf32>, vector<32x320xf32>, vector<32x320xf32> -> vector<32x320xf32>
    %97 = arith.addf %92, %96 : vector<32x320xf32>
    %c19 = arith.constant 19 : index
    %c0_60 = arith.constant 0 : index
    %c0_61 = arith.constant 0 : index
    %98 = vector.load %arg2[%c19, %c0_60, %c0_61] : memref<25x32x32xf32, #tpu.memory_space<vmem>>, vector<1x32x32xf32>
    %99 = vector.shape_cast %98 : vector<1x32x32xf32> to vector<32x32xf32>
    %100 = vector.extract_strided_slice %1 {offsets = [0, 64], sizes = [32, 320], strides = [1, 1]} : vector<32x512xf32> to vector<32x320xf32>
    %cst_62 = arith.constant dense<0.000000e+00> : vector<32x320xf32>
    %101 = tpu.matmul %99, %100, %cst_62 {dimension_numbers = #tpu.dot_dimension_numbers<[1], [0], [0], [1], [0, 0, 1, 1], [], []>} : vector<32x32xf32>, vector<32x320xf32>, vector<32x320xf32> -> vector<32x320xf32>
    %102 = arith.addf %97, %101 : vector<32x320xf32>
    %c20 = arith.constant 20 : index
    %c0_63 = arith.constant 0 : index
    %c0_64 = arith.constant 0 : index
    %103 = vector.load %arg2[%c20, %c0_63, %c0_64] : memref<25x32x32xf32, #tpu.memory_space<vmem>>, vector<1x32x32xf32>
    %104 = vector.shape_cast %103 : vector<1x32x32xf32> to vector<32x32xf32>
    %105 = vector.extract_strided_slice %1 {offsets = [0, 80], sizes = [32, 320], strides = [1, 1]} : vector<32x512xf32> to vector<32x320xf32>
    %cst_65 = arith.constant dense<0.000000e+00> : vector<32x320xf32>
    %106 = tpu.matmul %104, %105, %cst_65 {dimension_numbers = #tpu.dot_dimension_numbers<[1], [0], [0], [1], [0, 0, 1, 1], [], []>} : vector<32x32xf32>, vector<32x320xf32>, vector<32x320xf32> -> vector<32x320xf32>
    %107 = arith.addf %102, %106 : vector<32x320xf32>
    %c21 = arith.constant 21 : index
    %c0_66 = arith.constant 0 : index
    %c0_67 = arith.constant 0 : index
    %108 = vector.load %arg2[%c21, %c0_66, %c0_67] : memref<25x32x32xf32, #tpu.memory_space<vmem>>, vector<1x32x32xf32>
    %109 = vector.shape_cast %108 : vector<1x32x32xf32> to vector<32x32xf32>
    %110 = vector.extract_strided_slice %1 {offsets = [0, 81], sizes = [32, 320], strides = [1, 1]} : vector<32x512xf32> to vector<32x320xf32>
    %cst_68 = arith.constant dense<0.000000e+00> : vector<32x320xf32>
    %111 = tpu.matmul %109, %110, %cst_68 {dimension_numbers = #tpu.dot_dimension_numbers<[1], [0], [0], [1], [0, 0, 1, 1], [], []>} : vector<32x32xf32>, vector<32x320xf32>, vector<32x320xf32> -> vector<32x320xf32>
    %112 = arith.addf %107, %111 : vector<32x320xf32>
    %c22 = arith.constant 22 : index
    %c0_69 = arith.constant 0 : index
    %c0_70 = arith.constant 0 : index
    %113 = vector.load %arg2[%c22, %c0_69, %c0_70] : memref<25x32x32xf32, #tpu.memory_space<vmem>>, vector<1x32x32xf32>
    %114 = vector.shape_cast %113 : vector<1x32x32xf32> to vector<32x32xf32>
    %115 = vector.extract_strided_slice %1 {offsets = [0, 82], sizes = [32, 320], strides = [1, 1]} : vector<32x512xf32> to vector<32x320xf32>
    %cst_71 = arith.constant dense<0.000000e+00> : vector<32x320xf32>
    %116 = tpu.matmul %114, %115, %cst_71 {dimension_numbers = #tpu.dot_dimension_numbers<[1], [0], [0], [1], [0, 0, 1, 1], [], []>} : vector<32x32xf32>, vector<32x320xf32>, vector<32x320xf32> -> vector<32x320xf32>
    %117 = arith.addf %112, %116 : vector<32x320xf32>
    %c23 = arith.constant 23 : index
    %c0_72 = arith.constant 0 : index
    %c0_73 = arith.constant 0 : index
    %118 = vector.load %arg2[%c23, %c0_72, %c0_73] : memref<25x32x32xf32, #tpu.memory_space<vmem>>, vector<1x32x32xf32>
    %119 = vector.shape_cast %118 : vector<1x32x32xf32> to vector<32x32xf32>
    %120 = vector.extract_strided_slice %1 {offsets = [0, 83], sizes = [32, 320], strides = [1, 1]} : vector<32x512xf32> to vector<32x320xf32>
    %cst_74 = arith.constant dense<0.000000e+00> : vector<32x320xf32>
    %121 = tpu.matmul %119, %120, %cst_74 {dimension_numbers = #tpu.dot_dimension_numbers<[1], [0], [0], [1], [0, 0, 1, 1], [], []>} : vector<32x32xf32>, vector<32x320xf32>, vector<32x320xf32> -> vector<32x320xf32>
    %122 = arith.addf %117, %121 : vector<32x320xf32>
    %c24 = arith.constant 24 : index
    %c0_75 = arith.constant 0 : index
    %c0_76 = arith.constant 0 : index
    %123 = vector.load %arg2[%c24, %c0_75, %c0_76] : memref<25x32x32xf32, #tpu.memory_space<vmem>>, vector<1x32x32xf32>
    %124 = vector.shape_cast %123 : vector<1x32x32xf32> to vector<32x32xf32>
    %125 = vector.extract_strided_slice %1 {offsets = [0, 84], sizes = [32, 320], strides = [1, 1]} : vector<32x512xf32> to vector<32x320xf32>
    %cst_77 = arith.constant dense<0.000000e+00> : vector<32x320xf32>
    %126 = tpu.matmul %124, %125, %cst_77 {dimension_numbers = #tpu.dot_dimension_numbers<[1], [0], [0], [1], [0, 0, 1, 1], [], []>} : vector<32x32xf32>, vector<32x320xf32>, vector<32x320xf32> -> vector<32x320xf32>
    %127 = arith.addf %122, %126 : vector<32x320xf32>
    %c0_78 = arith.constant 0 : index
    %c0_79 = arith.constant 0 : index
    %c0_80 = arith.constant 0 : index
    %128 = vector.load %arg4[%c0_78, %c0_79, %c0_80] : memref<1x32x320xf32, #tpu.memory_space<vmem>>, vector<1x32x320xf32>
    %129 = vector.shape_cast %128 : vector<1x32x320xf32> to vector<32x320xf32>
    %130 = vector.shape_cast %127 : vector<32x320xf32> to vector<1x32x320xf32>
    tpu.vector_store %arg4[%c0_78, %c0_79, %c0_80], %130 {strides = array<i32>} : memref<1x32x320xf32, #tpu.memory_space<vmem>>, vector<1x32x320xf32>,
    %c0_81 = arith.constant 0 : index
    %c0_82 = arith.constant 0 : index
    %131 = vector.load %arg3[%c0_81, %c0_82] : memref<1x320xf32, #tpu.memory_space<vmem>>, vector<1x320xf32>
    %132 = vector.broadcast %131 : vector<1x320xf32> to vector<32x320xf32>
    %133 = arith.mulf %127, %132 : vector<32x320xf32>
    %cst_83 = arith.constant dense<0.000000e+00> : vector<32xf32>
    %134 = vector.multi_reduction <add>, %133, %cst_83 [1] : vector<32x320xf32> to vector<32xf32>
    %135 = vector.shape_cast %134 : vector<32xf32> to vector<32x1xf32>
    %c0_84 = arith.constant 0 : index
    %c0_85 = arith.constant 0 : index
    %c0_86 = arith.constant 0 : index
    %136 = vector.load %arg5[%c0_84, %c0_85, %c0_86] : memref<1x32x1xf32, #tpu.memory_space<vmem>>, vector<1x32x1xf32>
    %137 = vector.shape_cast %136 : vector<1x32x1xf32> to vector<32x1xf32>
    %138 = vector.shape_cast %135 : vector<32x1xf32> to vector<1x32x1xf32>
    tpu.vector_store %arg5[%c0_84, %c0_85, %c0_86], %138 {strides = array<i32>} : memref<1x32x1xf32, #tpu.memory_space<vmem>>, vector<1x32x1xf32>,
    %139 = arith.mulf %133, %133 : vector<32x320xf32>
    %cst_87 = arith.constant dense<0.000000e+00> : vector<32xf32>
    %140 = vector.multi_reduction <add>, %139, %cst_87 [1] : vector<32x320xf32> to vector<32xf32>
    %141 = vector.shape_cast %140 : vector<32xf32> to vector<32x1xf32>
    %c0_88 = arith.constant 0 : index
    %c0_89 = arith.constant 0 : index
    %c0_90 = arith.constant 0 : index
    %142 = vector.load %arg6[%c0_88, %c0_89, %c0_90] : memref<1x32x1xf32, #tpu.memory_space<vmem>>, vector<1x32x1xf32>
    %143 = vector.shape_cast %142 : vector<1x32x1xf32> to vector<32x1xf32>
    %144 = vector.shape_cast %141 : vector<32x1xf32> to vector<1x32x1xf32>
    tpu.vector_store %arg6[%c0_88, %c0_89, %c0_90], %144 {strides = array<i32>} : memref<1x32x1xf32, #tpu.memory_space<vmem>>, vector<1x32x1xf32>,
    return
  }
  func.func @transform_0(%arg0: i32) -> (i32, i32, i32) {
    %c0_i32 = arith.constant 0 : i32
    %c0_i32_0 = arith.constant 0 : i32
    %c0_i32_1 = arith.constant 0 : i32
    return %arg0, %c0_i32, %c0_i32_0 : i32, i32, i32
  }
  func.func @transform_1(%arg0: i32) -> (i32, i32, i32) {
    %c0_i32 = arith.constant 0 : i32
    %c0_i32_0 = arith.constant 0 : i32
    %c0_i32_1 = arith.constant 0 : i32
    %c0_i32_2 = arith.constant 0 : i32
    return %c0_i32, %c0_i32_0, %c0_i32_1 : i32, i32, i32
  }
  func.func @transform_2(%arg0: i32) -> (i32, i32) {
    %c0_i32 = arith.constant 0 : i32
    %c0_i32_0 = arith.constant 0 : i32
    %c0_i32_1 = arith.constant 0 : i32
    return %c0_i32, %c0_i32_0 : i32, i32
  }
  func.func @transform_3(%arg0: i32) -> (i32, i32, i32) {
    %c0_i32 = arith.constant 0 : i32
    %c0_i32_0 = arith.constant 0 : i32
    %c0_i32_1 = arith.constant 0 : i32
    return %arg0, %c0_i32, %c0_i32_0 : i32, i32, i32
  }
  func.func @transform_4(%arg0: i32) -> (i32, i32, i32) {
    %c0_i32 = arith.constant 0 : i32
    %c0_i32_0 = arith.constant 0 : i32
    %c0_i32_1 = arith.constant 0 : i32
    return %arg0, %c0_i32, %c0_i32_0 : i32, i32, i32
  }
  func.func @transform_5(%arg0: i32) -> (i32, i32, i32) {
    %c0_i32 = arith.constant 0 : i32
    %c0_i32_0 = arith.constant 0 : i32
    %c0_i32_1 = arith.constant 0 : i32
    return %arg0, %c0_i32, %c0_i32_0 : i32, i32, i32
  }
}

</mosaic_0001>

<bundles_post_ra>
// kernel: residual_block.3
= control target key start
LH: loop header
LB: loop body
LE: loop exit
PB: predicated region body
PF: predicated region fallthrough
CT: control target
= control target key end

     0   :  { %s4534_s17 = smov 0   ;;  %s5685_s0 = inlined_call_operand.vmem [shape: f32[2,32,512], index: 0, kind: input, shape index: {}]   ;;  %s5686_s1 = inlined_call_operand.vmem [shape: f32[2,32,320], index: 1, kind: input, shape index: {}]   ;;  %s5687_s2 = inlined_call_operand.vmem [shape: f32[2,32,1], index: 2, kind: input, shape index: {}]   ;;  %s5688_s3 = inlined_call_operand.vmem [shape: f32[2,32,1], index: 3, kind: input, shape index: {}]   ;;  %s5689_s4 = inlined_call_operand.vmem [shape: f32[32,1], index: 4, kind: input, shape index: {}]   ;;  %s5690_s5 = inlined_call_operand.vmem [shape: f32[32,1], index: 5, kind: input, shape index: {}]   ;;  %s5691_s6 = inlined_call_operand.vmem [shape: f32[9,32,32], index: 6, kind: input, shape index: {}]   ;;  %s5692_s7 = inlined_call_operand.vmem [shape: f32[32,1], index: 7, kind: input, shape index: {}]   ;;  %s5693_s8 = inlined_call_operand.vmem [shape: f32[2,32], index: 8, kind: input, shape index: {}]   ;;  %s5694_s9 = inlined_call_operand.vmem [shape: f32[32,2], index: 9, kind: input, shape index: {}]   ;;  %s5695_s10 = inlined_call_operand.vmem [shape: f32[1,320], index: 10, kind: input, shape index: {}]   ;;  %s5696_s11 = inlined_call_operand.vmem [shape: f32[2,32,320], index: 11, kind: output, shape index: {}]  }
   0x1 LB: > { %s3456_s18 = sadd.s32 4294967295, %s4458_s17   ;;  %p3460_p0 = scmp.ge.s32.totalorder %s4458_s17, 1  ;;  %s4458_s17 = sphi %s4534_s17, %s21_s17  }
   0x2   : > { %p347_p1 = scmp.lt.s32.totalorder %s4458_s17, 3 }
   0x4   : > { %p348_p2 = pnand %p3460_p0, %p347_p1 }
   0x5   : > { %v410_v0 = vld [vmem:[%s5687_s2 + $0x18] sm:$0xff] (!%p348_p2)  ;;  %vm415_vm0 = vcmask (!%p348_p2), 7168   ;;  %v4460_v3 = vmov (!%p348_p2), 0   ;;  %v407_v8 = vld [vmem:[%s5687_s2] sm:$0xff] (!%p348_p2)  ;;  %v408_v19 = vld [vmem:[%s5687_s2 + $0x8] sm:$0xff] (!%p348_p2)  ;;  %p392_p3 = scmp.lt.s32.totalorder (!%p348_p2), %s3456_s18, 1 }
   0x6   : > { %351 = sbr.rel (%p348_p2) target bundleno = 1794 (0x702), region = 64  ;;  %v414_v1 = vld [vmem:[%s5687_s2 + $0x38] sm:$0xff] (!%p348_p2)  ;;  %4109 = vset.pattern.permute.xlu1 (!%p348_p2), %v4460_v3  ;;  %4108 = vset.pattern.permute.xlu0 (!%p348_p2), %v4460_v3  ;;  %v425_v4 = vsel (!%p348_p2), %vm415_vm0, %v410_v0, 0.0  ;;  %v411_v11 = vld [vmem:[%s5687_s2 + $0x20] sm:$0xff] (!%p348_p2)  ;;  %v416_v12 = vsel (!%p348_p2), %vm415_vm0, %v407_v8, 0.0  ;;  %v412_v20 = vld [vmem:[%s5687_s2 + $0x28] sm:$0xff] (!%p348_p2) }
   0x7   : > { %v435_v2 = vld [vmem:[%s5688_s3 + $0x18] sm:$0xff] (!%p348_p2)  ;;  %v426_v5 = vsel (!%p348_p2), %vm415_vm0, %v414_v1, 0.0  ;;  %v432_v13 = vld [vmem:[%s5688_s3] sm:$0xff] (!%p348_p2)  ;;  %v417_v16 = vsel (!%p348_p2), %vm415_vm0, %v411_v11, 0.0  ;;  %v419_v24 = vsel (!%p348_p2), %vm415_vm0, %v408_v19, 0.0  ;;  %v433_v25 = vld [vmem:[%s5688_s3 + $0x8] sm:$0xff] (!%p348_p2) }
   0x8   : > { %v439_v6 = vld [vmem:[%s5688_s3 + $0x38] sm:$0xff] (!%p348_p2)  ;;  %v449_v7 = vsel (!%p348_p2), %vm415_vm0, %v435_v2, 0.0  ;;  %v427_v9 = vadd.f32 (!%p348_p2), %v426_v5, %v425_v4  ;;  %v436_v14 = vld [vmem:[%s5688_s3 + $0x20] sm:$0xff] (!%p348_p2)  ;;  %v440_v17 = vsel (!%p348_p2), %vm415_vm0, %v432_v13, 0.0  ;;  %v418_v22 = vadd.f32 (!%p348_p2), %v417_v16, %v416_v12  ;;  %v437_v26 = vld [vmem:[%s5688_s3 + $0x28] sm:$0xff] (!%p348_p2)  ;;  %s4461_s22 = smov (!%p348_p2), 21  }
   0x9   : > { %v450_v10 = vsel (!%p348_p2), %vm415_vm0, %v439_v6, 0.0  ;;  %v441_v18 = vsel (!%p348_p2), %vm415_vm0, %v436_v14, 0.0  ;;  %v420_v28 = vsel (!%p348_p2), %vm415_vm0, %v412_v20, 0.0  ;;  %v443_v29 = vsel (!%p348_p2), %vm415_vm0, %v433_v25, 0.0  ;;  %v409_v31 = vld [vmem:[%s5687_s2 + $0x10] sm:$0xff] (!%p348_p2)  ;;  %v467_v61 = vld [vmem:[%s5689_s4 + $0x18] sm:$0xff] (!%p348_p2) }
   0xa   : > { %v451_v15 = vadd.f32 (!%p348_p2), %v450_v10, %v449_v7  ;;  %v4580_v21 = vmul.f32 (!%p348_p2), 0.001953125, %v427_v9  ;;  %v442_v23 = vadd.f32 (!%p348_p2), %v441_v18, %v440_v17  ;;  %v444_v30 = vsel (!%p348_p2), %vm415_vm0, %v437_v26, 0.0  ;;  %v413_v36 = vld [vmem:[%s5687_s2 + $0x30] sm:$0xff] (!%p348_p2)  ;;  %v464_v63 = vld [vmem:[%s5689_s4] sm:$0xff] (!%p348_p2)  ;;  %v465_v2 = vld [vmem:[%s5689_s4 + $0x8] sm:$0xff] (!%p348_p2)  ;;  %s4462_s23 = smov (!%p348_p2), 126  }
   0xb   : > { %v428_v33 = vmul.f32 (!%p348_p2), 0.001953125, %v418_v22  ;;  %v421_v35 = vadd.f32 (!%p348_p2), %v420_v28, %v419_v24  ;;  %v434_v37 = vld [vmem:[%s5688_s3 + $0x10] sm:$0xff] (!%p348_p2)  ;;  %v445_v39 = vadd.f32 (!%p348_p2), %v444_v30, %v443_v29  ;;  %v422_v40 = vsel (!%p348_p2), %vm415_vm0, %v409_v31, 0.0  ;;  %v480_v5 = vld [vmem:[%s5690_s5] sm:$0xff] (!%p348_p2)  ;;  %v481_v9 = vld [vmem:[%s5690_s5 + $0x8] sm:$0xff] (!%p348_p2)  ;;  %s4463_s24 = smov (!%p348_p2), 127  }
   0xc   : > { %v455_v27 = vmul.f32 (!%p348_p2), 0.001953125, %v451_v15  ;;  %v459_v32 = vmul.f32 (!%p348_p2), %v4580_v21, %v4580_v21  ;;  %v452_v34 = vmul.f32 (!%p348_p2), 0.001953125, %v442_v23  ;;  %v438_v38 = vld [vmem:[%s5688_s3 + $0x30] sm:$0xff] (!%p348_p2)  ;;  %v423_v41 = vsel (!%p348_p2), %vm415_vm0, %v413_v36, 0.0  ;;  %v483_v18 = vld [vmem:[%s5690_s5 + $0x18] sm:$0xff] (!%p348_p2)  ;;  %s4464_s25 = smov (!%p348_p2), 108  }
   0xd   : > { %v446_v42 = vsel %vm415_vm0, %v434_v37, 0.0  ;;  %v456_v44 = vmul.f32 %v428_v33, %v428_v33  ;;  %v429_v45 = vmul.f32 0.001953125, %v421_v35  ;;  %v424_v46 = vadd.f32 %v423_v41, %v422_v40  ;;  %v466_v8 = vld [vmem:[%s5689_s4 + $0x10] sm:$0xff]  ;;  %s5718_s18 = smov (!%p392_p3, %s3456_s18), 1  ;;  %s4466_s26 = smov 107  }
   0xe   : > { %v463_v43 = vsub.f32 %v455_v27, %v459_v32  ;;  %v453_v47 = vmul.f32 0.001953125, %v445_v39  ;;  %v447_v48 = vsel %vm415_vm0, %v438_v38, 0.0  ;;  %v482_v16 = vld [vmem:[%s5690_s5 + $0x10] sm:$0xff]  ;;  %s4085_s14 = smul.u32 96, %s5718_s18  ;;  %vm717_vm1 = vcmask 171008   ;;  %s4467_s27 = smov 106  }
   0xf   : > { %v460_v50 = vsub.f32 %v452_v34, %v456_v44  ;;  %v457_v51 = vmul.f32 %v429_v45, %v429_v45  ;;  %v430_v52 = vmul.f32 0.001953125, %v424_v46  ;;  %v448_v53 = vadd.f32 %v447_v48, %v446_v42  ;;  %s4468_s28 = smov 88   ;;  %s4469_s29 = smov 87   ;;  %vm5035_vm8 = vmneg %vm717_vm1 }
  0x10   : > { %v471_v49 = vadd.f32 1e-05, %v463_v43  ;;  %s4647_s19 = scalar_lea.vmem %s5686_s1, %s4085_s14  ;;  %vm742_vm2 = vcmask 695296   ;;  %s4470_s30 = smov 86   ;;  %vm1211_vm3 = vcmask 1031168   ;;  %vm788_vm4 = vcmask 1039360   ;;  %vm3852_vm9 = vmpackc.low %vm5035_vm8, %vm5035_vm8 }
  0x11   : > { %v468_v54 = vadd.f32 1e-05, %v460_v50  ;;  %v461_v55 = vsub.f32 %v453_v47, %v457_v51  ;;  %v458_v56 = vmul.f32 %v430_v52, %v430_v52  ;;  %v454_v57 = vmul.f32 0.001953125, %v448_v53  ;;  %v492_v23 = vld [vmem:[%s4647_s19] sm:$0xff]  ;;  %v493_v24 = vld [vmem:[%s4647_s19 + $0x8] sm:$0xff]  ;;  %v494_v25 = vld [vmem:[%s4647_s19 + $0x10] sm:$0xff] }
  0x12   : > { %4380 = vrsqrt.f32 %v471_v49  ;;  %v495_v30 = vld [vmem:[%s4647_s19 + $0x18] sm:$0xff]  ;;  %v496_v32 = vld [vmem:[%s4647_s19 + $0x20] sm:$0xff]  ;;  %v501_v35 = vld [vmem:[%s4647_s19 + $0x48] sm:$0xff]  ;;  %vm809_vm5 = vcmask 261120   ;;  %vm1459_vm6 = vcmask 883712   ;;  %vm1707_vm7 = vcmask 875520  }
  0x13   : > { %4382 = vrsqrt.f32 %v468_v54  ;;  %v469_v58 = vadd.f32 1e-05, %v461_v55  ;;  %v462_v59 = vsub.f32 %v454_v57, %v458_v56  ;;  %v498_v40 = vld [vmem:[%s4647_s19 + $0x30] sm:$0xff]  ;;  %v499_v46 = vld [vmem:[%s4647_s19 + $0x38] sm:$0xff]  ;;  %v500_v47 = vld [vmem:[%s4647_s19 + $0x40] sm:$0xff]  ;;  %vm1955_vm10 = vcmask 867328  }
  0x14   : > { %v502_v49 = vld [vmem:[%s4647_s19 + $0x50] sm:$0xff]  ;;  %v503_v54 = vld [vmem:[%s4647_s19 + $0x58] sm:$0xff]  ;;  %vm5095_vm11 = vmpackc.low %vm742_vm2, %vm742_vm2  ;;  %vm2203_vm12 = vcmask 719872   ;;  %vm2451_vm13 = vcmask 711680   ;;  %vm2699_vm14 = vcmask 703488   ;;  %vm2967_vm15 = vcmask 523264  }
  0x15   : > { %4384 = vrsqrt.f32 %v469_v58  ;;  %v470_v60 = vadd.f32 1e-05, %v462_v59  ;;  %vm4472_vm0 = vmmov 0   ;;  %s4473_s12 = smov 42   ;;  %s3605_s13 = sshll.u32 %s5718_s18, 7 }
  0x17   : > { %4386 = vrsqrt.f32 %v470_v60 }
  0x1c   : > { %v4381_v62 = vpop.eup %4380 }
  0x1d   : > { %v479_v0 = vmul.f32 %v4381_v62, %v467_v61  ;;  %v4383_v1 = vpop.eup %4382 }
  0x1e   : > { %v476_v3 = vmul.f32 %v4383_v1, %v464_v63 }
  0x1f   : > { %521 = vperm.xlu1 %4109, %v479_v0   ;;  %v4385_v4 = vpop.eup %4384  ;;  %v487_v14 = vmul.f32 %v479_v0, %v4580_v21 }
  0x20   : > { %506 = vperm.xlu0 %4108, %v476_v3   ;;  %v484_v6 = vmul.f32 %v476_v3, %v428_v33  ;;  %v477_v7 = vmul.f32 %v4385_v4, %v465_v2  ;;  %v497_v33 = vld [vmem:[%s4647_s19 + $0x28] sm:$0xff]  ;;  %s5617_s19 = scalar_lea.vmem %s5685_s0, %s3605_s13 }
  0x21   : > { %v4387_v10 = vpop.eup %4386  ;;  %v491_v20 = vsub.f32 %v483_v18, %v487_v14 }
  0x22   : > { %v488_v11 = vsub.f32 %v480_v5, %v484_v6  ;;  %v485_v12 = vmul.f32 %v477_v7, %v429_v45  ;;  %v478_v13 = vmul.f32 %v4387_v10, %v466_v8 }
  0x24   : > { %511 = vperm.xlu0 %4108, %v477_v7   ;;  %538 = vperm.xlu1 %4109, %v488_v11   ;;  %v489_v15 = vsub.f32 %v481_v9, %v485_v12  ;;  %v486_v17 = vmul.f32 %v478_v13, %v430_v52 }
  0x26   : > { %v490_v19 = vsub.f32 %v482_v16, %v486_v17 }
  0x28   : > { %516 = vperm.xlu0 %4108, %v478_v13   ;;  %543 = vperm.xlu1 %4109, %v489_v15   ;;  %v654_v15 = vlaneseq }
  0x2c   : > { %548 = vperm.xlu0 %4108, %v490_v19   ;;  %553 = vperm.xlu1 %4109, %v491_v20  }
  0x9e   : > { %v522_v21 = vpop.permute.xlu1 %521 }
  0x9f   : > { %v507_v22 = vpop.permute.xlu0 %506  ;;  %v533_v50 = vmul.f32 %v522_v21, %v501_v35  ;;  %v534_v58 = vmul.f32 %v522_v21, %v502_v49  ;;  %v535_v4 = vmul.f32 %v522_v21, %v503_v54  ;;  %v655_v21 = vshrl.u32 %v654_v15, 7 }
  0xa0   : > { %v524_v26 = vmul.f32 %v507_v22, %v492_v23  ;;  %v525_v27 = vmul.f32 %v507_v22, %v493_v24  ;;  %v526_v28 = vmul.f32 %v507_v22, %v494_v25 }
  0xa1   : > { %v664_v35 = vsub.s32 2, %v655_v21 }
  0xa3   : > { %v512_v29 = vpop.permute.xlu0 %511  ;;  %v539_v31 = vpop.permute.xlu1 %538 }
  0xa4   : > { %v4655_v34 = vadd.f32 %v539_v31, %v524_v26  ;;  %v4658_v36 = vadd.f32 %v539_v31, %v525_v27  ;;  %v4660_v37 = vadd.f32 %v539_v31, %v526_v28  ;;  %v527_v38 = vmul.f32 %v512_v29, %v495_v30 }
  0xa5   : > { %v528_v41 = vmul.f32 %v512_v29, %v496_v32  ;;  %v529_v42 = vmul.f32 %v512_v29, %v497_v33  ;;  %v660_v30 = vsub.s32 1, %v655_v21  ;;  %v652_v33 = vld [vmem:[%s5695_s10] sm:$0x7] }
  0xa6   : > { %v3465_v39 = vmul.f32 -1.442695, %v4655_v34  ;;  %v3466_v43 = vmul.f32 -1.442695, %v4658_v36  ;;  %v3467_v44 = vmul.f32 -1.442695, %v4660_v37 }
  0xa7   : > { %v517_v45 = vpop.permute.xlu0 %516  ;;  %v544_v48 = vpop.permute.xlu1 %543 }
  0xa8   : > { %4388 = vpow2.f32 %v3465_v39  ;;  %v4669_v51 = vadd.f32 %v544_v48, %v527_v38  ;;  %v4671_v52 = vadd.f32 %v544_v48, %v528_v41  ;;  %v4673_v53 = vadd.f32 %v544_v48, %v529_v42 }
  0xa9   : > { %4390 = vpow2.f32 %v3466_v43  ;;  %v530_v55 = vmul.f32 %v517_v45, %v498_v40  ;;  %v531_v56 = vmul.f32 %v517_v45, %v499_v46  ;;  %v532_v57 = vmul.f32 %v517_v45, %v500_v47 }
  0xaa   : > { %4392 = vpow2.f32 %v3467_v44  ;;  %v3468_v59 = vmul.f32 -1.442695, %v4669_v51  ;;  %v3469_v60 = vmul.f32 -1.442695, %v4671_v52  ;;  %v3470_v61 = vmul.f32 -1.442695, %v4673_v53 }
  0xab   : > { %v549_v62 = vpop.permute.xlu0 %548  ;;  %v554_v63 = vpop.permute.xlu1 %553  ;;  %v4700_v44 = vrot.slane %v652_v33, %v660_v30  ;;  %v656_v45 = vsub.s32 0, %v655_v21  ;;  %v4702_v47 = vrot.slane %v652_v33, %v664_v35 }
  0xac   : > { %v4679_v0 = vadd.f32 %v549_v62, %v530_v55  ;;  %v4681_v1 = vadd.f32 %v549_v62, %v531_v56  ;;  %v4683_v2 = vadd.f32 %v549_v62, %v532_v57  ;;  %v4685_v3 = vadd.f32 %v554_v63, %v533_v50 }
  0xad   : > { %4394 = vpow2.f32 %v3468_v59  ;;  %v4687_v5 = vadd.f32 %v554_v63, %v534_v58  ;;  %v4693_v10 = vadd.f32 %v554_v63, %v535_v4  ;;  %v4708_v58 = vrot.slane %v652_v33, %v656_v45 }
  0xae   : > { %4396 = vpow2.f32 %v3469_v60  ;;  %v3471_v6 = vmul.f32 -1.442695, %v4679_v0  ;;  %v3472_v7 = vmul.f32 -1.442695, %v4681_v1  ;;  %v3473_v8 = vmul.f32 -1.442695, %v4683_v2 }
  0xaf   : > { %4398 = vpow2.f32 %v3470_v61  ;;  %v3474_v9 = vmul.f32 -1.442695, %v4685_v3  ;;  %v3475_v11 = vmul.f32 -1.442695, %v4687_v5  ;;  %v3476_v18 = vmul.f32 -1.442695, %v4693_v10 }
  0xb0   : > { %4400 = vpow2.f32 %v3471_v6 }
  0xb1   : > { %4402 = vpow2.f32 %v3472_v7 }
  0xb2   : > { %v4389_v12 = vpop.eup %4388  ;;  %4404 = vpow2.f32 %v3473_v8 }
  0xb3   : > { %v4391_v13 = vpop.eup %4390  ;;  %v604_v14 = vadd.f32 1.0, %v4389_v12  ;;  %4406 = vpow2.f32 %v3474_v9 }
  0xb4   : > { %v4393_v16 = vpop.eup %4392  ;;  %v605_v17 = vadd.f32 1.0, %v4391_v13  ;;  %4408 = vpow2.f32 %v3475_v11 }
  0xb5   : > { %v606_v19 = vadd.f32 1.0, %v4393_v16  ;;  %4410 = vrcp.f32 %v604_v14 }
  0xb6   : > { %4412 = vrcp.f32 %v605_v17 }
  0xb7   : > { %v4395_v20 = vpop.eup %4394  ;;  %4414 = vrcp.f32 %v606_v19 }
  0xb8   : > { %v4397_v22 = vpop.eup %4396  ;;  %v607_v23 = vadd.f32 1.0, %v4395_v20  ;;  %4416 = vpow2.f32 %v3476_v18 }
  0xb9   : > { %v4399_v24 = vpop.eup %4398  ;;  %v608_v25 = vadd.f32 1.0, %v4397_v22 }
  0xba   : > { %v4401_v26 = vpop.eup %4400  ;;  %v609_v27 = vadd.f32 1.0, %v4399_v24  ;;  %4418 = vrcp.f32 %v607_v23 }
  0xbb   : > { %v4403_v28 = vpop.eup %4402  ;;  %4420 = vrcp.f32 %v608_v25  ;;  %v610_v29 = vadd.f32 1.0, %v4401_v26 }
  0xbc   : > { %v4405_v31 = vpop.eup %4404  ;;  %4422 = vrcp.f32 %v609_v27  ;;  %v611_v32 = vadd.f32 1.0, %v4403_v28 }
  0xbd   : > { %v4407_v38 = vpop.eup %4406  ;;  %v612_v39 = vadd.f32 1.0, %v4405_v31  ;;  %4424 = vrcp.f32 %v610_v29 }
  0xbe   : > { %v4409_v40 = vpop.eup %4408  ;;  %4426 = vrcp.f32 %v611_v32  ;;  %v613_v41 = vadd.f32 1.0, %v4407_v38 }
  0xbf   : > { %v4411_v42 = vpop.eup %4410  ;;  %4428 = vrcp.f32 %v612_v39  ;;  %v614_v43 = vadd.f32 1.0, %v4409_v40 }
  0xc0   : > { %v4413_v46 = vpop.eup %4412  ;;  %4430 = vrcp.f32 %v613_v41  ;;  %v640_v55 = vmul.f32 %v4411_v42, %v4655_v34 }
  0xc1   : > { %v4415_v48 = vpop.eup %4414  ;;  %v641_v49 = vmul.f32 %v4413_v46, %v4658_v36  ;;  %4432 = vrcp.f32 %v614_v43 }
  0xc2   : > { %v4417_v50 = vpop.eup %4416  ;;  %v642_v54 = vmul.f32 %v4415_v48, %v4660_v37  ;;  %v669_v34 = vmul.f32 %v4708_v58, %v640_v55 }
  0xc3   : > { %v615_v56 = vadd.f32 1.0, %v4417_v50  ;;  %v670_v57 = vmul.f32 %v4700_v44, %v641_v49 }
  0xc4   : > { %v4419_v59 = vpop.eup %4418  ;;  %v671_v60 = vmul.f32 %v4702_v47, %v642_v54 }
  0xc5   : > { %v4421_v61 = vpop.eup %4420  ;;  %v643_v62 = vmul.f32 %v4419_v59, %v4669_v51  ;;  %4434 = vrcp.f32 %v615_v56 }
  0xc6   : > { %v4423_v63 = vpop.eup %4422  ;;  %v644_v36 = vmul.f32 %v4421_v61, %v4671_v52  ;;  %v4110_v4 = vpack.i.bf16 %v671_v60, %v670_v57 }
  0xc7   : > { %v4425_v6 = vpop.eup %4424  ;;  %v645_v37 = vmul.f32 %v4423_v63, %v4673_v53  ;;  %v672_v7 = vmul.f32 %v4708_v58, %v643_v62 }
  0xc8   : > { %v4427_v8 = vpop.eup %4426  ;;  %4111 = vrot.lane.b32.xlu0 %v4110_v4, %s4461_s22  ;;  %v673_v9 = vmul.f32 %v4700_v44, %v644_v36  ;;  %v646_v53 = vmul.f32 %v4425_v6, %v4679_v0 }
  0xc9   : > { %v4429_v11 = vpop.eup %4428  ;;  %v647_v51 = vmul.f32 %v4427_v8, %v4681_v1  ;;  %v674_v12 = vmul.f32 %v4702_v47, %v645_v37  ;;  %v4120_v13 = vpack.i.bf16 %v672_v7, %v669_v34 }
  0xca   : > { %v4431_v52 = vpop.eup %4430  ;;  %v648_v14 = vmul.f32 %v4429_v11, %v4683_v2  ;;  %v675_v22 = vmul.f32 %v4708_v58, %v646_v53  ;;  %v4465_v53 = vmov 0.0  }
  0xcb   : > { %v4433_v15 = vpop.eup %4432  ;;  %v649_v16 = vmul.f32 %v4431_v52, %v4685_v3  ;;  %v4115_v17 = vpack.i.bf16 %v674_v12, %v673_v9  ;;  %v676_v18 = vmul.f32 %v4700_v44, %v647_v51  ;;  %1308 = vmatprep.mubr.f32.mxu0 %v4465_v53  ;;  %886 = vmatprep.mubr.f32.mxu1 %v4465_v53 }
  0xcc   : > { %v650_v19 = vmul.f32 %v4433_v15, %v4687_v5  ;;  %4121 = vrot.lane.b32.xlu0 %v4120_v13, %s4461_s22  ;;  %v677_v20 = vmul.f32 %v4702_v47, %v648_v14 }
  0xcd   : > { %4116 = vrot.lane.b32.xlu1 %v4115_v17, %s4461_s22  ;;  %v678_v2 = vmul.f32 %v4708_v58, %v649_v16  ;;  %v2918_v16 = vld [vmem:[%s5692_s7] sm:$0xff]  ;;  %v2920_v17 = vld [vmem:[%s5692_s7 + $0x10] sm:$0xff] }
  0xce   : > { %v4125_v1 = vpack.i.bf16 %v677_v20, %v676_v18  ;;  %v679_v0 = vmul.f32 %v4700_v44, %v650_v19  ;;  %v2919_v18 = vld [vmem:[%s5692_s7 + $0x8] sm:$0xff]  ;;  %v2921_v19 = vld [vmem:[%s5692_s7 + $0x18] sm:$0xff] }
  0xcf   : > { %v4435_v21 = vpop.eup %4434  ;;  %v4135_v24 = vpack.i.bf16 %v678_v2, %v675_v22 }
  0xd0   : > { %v651_v23 = vmul.f32 %v4435_v21, %v4693_v10 }
  0xd1   : > { %4126 = vrot.lane.b32.xlu1 %v4125_v1, %s4461_s22 }
  0xd2   : > { %v680_v3 = vmul.f32 %v4702_v47, %v651_v23 }
  0xd4   : > { %v4130_v25 = vpack.i.bf16 %v680_v3, %v679_v0 }
  0xd5   : > { %4136 = vrot.lane.b32.xlu1 %v4135_v24, %s4461_s22 }
  0xd6   : > { %4131 = vrot.lane.b32.xlu0 %v4130_v25, %s4461_s22  ;;  %s5656_s22 = scalar_lea.vmem %s5696_s11, %s4085_s14 }
 0x13a   : > { %v4112_v5 = vpop.permute.xlu0 %4111 }
 0x13b   : > { %v4114_v26 = vunpack.i.h.bf16 %v4112_v5  ;;  %v4113_v27 = vunpack.i.l.bf16 %v4112_v5 }
 0x13d   : > { %v719_v39 = vsel %vm717_vm1, %v4113_v27, %v4114_v26 }
 0x13e   : > { %v4122_v28 = vpop.permute.xlu0 %4121  ;;  %v743_v50 = vsel %vm742_vm2, %v719_v39, 0.0 }
 0x13f   : > { %v4117_v29 = vpop.permute.xlu1 %4116  ;;  %v4730_v30 = vunpack.i.h.bf16 %v4122_v28  ;;  %v4732_v31 = vunpack.i.l.bf16 %v4122_v28 }
 0x140   : > { %v4119_v10 = vunpack.i.h.bf16 %v4117_v29  ;;  %v4118_v32 = vunpack.i.l.bf16 %v4117_v29 }
 0x141   : > { %v739_v33 = vsel %vm717_vm1, 0.0, %v4730_v30  ;;  %v738_v35 = vsel %vm717_vm1, 0.0, %v4732_v31  ;;  %v3851_v38 = vpack.c.bf16 %v4730_v30, %v4732_v31  ;;  %v4750_v48 = vsel %vm717_vm1, %v4732_v31, %v4113_v27 }
 0x142   : > { %v721_v40 = vsel %vm717_vm1, %v4118_v32, %v4119_v10  ;;  %v4742_v41 = vpack.i.bf16 %v739_v33, %v738_v35  ;;  %v4761_v61 = vpack.i.bf16 %v743_v50, %v4750_v48  ;;  %v4779_v7 = vsel %vm717_vm1, %v4730_v30, %v4118_v32 }
 0x143   : > { %v4744_v42 = vpack.c.bf16 %v721_v40, %v719_v39  ;;  %v4127_v43 = vpop.permute.xlu1 %4126  ;;  %v744_v34 = vsel %vm742_vm2, %v721_v40, 0.0  ;;  %v3849_v14 = vpack.c.bf16 %v4779_v7, %v4750_v48  ;;  %v5010_v48 = vld [vmem:[%s5691_s6 + $0x60] sm:$0xff] }
 0x144   : > { %v4129_v45 = vunpack.i.h.bf16 %v4127_v43  ;;  %v4128_v46 = vunpack.i.l.bf16 %v4127_v43  ;;  %4141 = vrot.lane.b32.xlu0 %v4742_v41, %s4462_s23  ;;  %v4330_v13 = vpack.i.bf16 %v744_v34, %v4779_v7 }
 0x146   : > { %v723_v54 = vsel %vm717_vm1, %v4128_v46, %v4129_v45 }
 0x147   : > { %v4137_v49 = vpop.permute.xlu1 %4136  ;;  %v745_v11 = vsel %vm742_vm2, %v723_v54, 0.0 }
 0x148   : > { %v4132_v55 = vpop.permute.xlu0 %4131  ;;  %v4754_v56 = vunpack.i.h.bf16 %v4137_v49  ;;  %v4756_v57 = vunpack.i.l.bf16 %v4137_v49  ;;  %4151 = vrot.lane.b32.xlu0 %v4742_v41, %s4463_s24 }
 0x149   : > { %v4134_v59 = vunpack.i.h.bf16 %v4132_v55  ;;  %v4133_v60 = vunpack.i.l.bf16 %v4132_v55 }
 0x14a   : > { %v741_v62 = vsel %vm717_vm1, 0.0, %v4754_v56  ;;  %v740_v63 = vsel %vm717_vm1, 0.0, %v4756_v57  ;;  %v3856_v36 = vpack.c.bf16 %v4754_v56, %v4756_v57  ;;  %v4789_v9 = vsel %vm717_vm1, %v4756_v57, %v4128_v46 }
 0x14b   : > { %v725_v4 = vsel %vm717_vm1, %v4133_v60, %v4134_v59  ;;  %v4770_v6 = vpack.i.bf16 %v741_v62, %v740_v63  ;;  %v4783_v8 = vsel %vm717_vm1, %v4754_v56, %v4133_v60  ;;  %v4335_v52 = vpack.i.bf16 %v745_v11, %v4789_v9 }
 0x14c   : > { %v4772_v37 = vpack.c.bf16 %v725_v4, %v723_v54  ;;  %4161 = vrot.lane.b32.xlu0 %v4742_v41, %s4464_s25  ;;  %v746_v51 = vsel %vm742_vm2, %v725_v4, 0.0  ;;  %v3854_v15 = vpack.c.bf16 %v4783_v8, %v4789_v9  ;;  %v5104_v9 = vld [vmem:[%s5691_s6 + $0x78] sm:$0xff]  ;;  %vm3070_vm1 = vcmask 15360  }
 0x14d   : > { %4146 = vrot.lane.b32.xlu1 %v4770_v6, %s4462_s23  ;;  %v4180_v12 = vpack.i.bf16 %v746_v51, %v4783_v8  ;;  %vm3083_vm2 = vcmask 1041408  }
 0x150   : > { %4166 = vrot.lane.b32.xlu0 %v4761_v61, %s4462_s23 }
 0x151   : > { %4156 = vrot.lane.b32.xlu1 %v4770_v6, %s4463_s24 }
 0x154   : > { %4181 = vrot.lane.b32.xlu0 %v4180_v12, %s4462_s23 }
 0x155   : > { %4171 = vrot.lane.b32.xlu1 %v4330_v13, %s4462_s23 }
 0x158   : > { %4186 = vrot.lane.b32.xlu0 %v4761_v61, %s4463_s24 }
 0x159   : > { %4176 = vrot.lane.b32.xlu1 %v4335_v52, %s4462_s23 }
 0x15c   : > { %4201 = vrot.lane.b32.xlu0 %v4180_v12, %s4463_s24 }
 0x15d   : > { %4191 = vrot.lane.b32.xlu1 %v4330_v13, %s4463_s24 }
 0x160   : > { %4206 = vrot.lane.b32.xlu0 %v4761_v61, %s4464_s25 }
 0x161   : > { %4196 = vrot.lane.b32.xlu1 %v4335_v52, %s4463_s24 }
 0x164   : > { %4221 = vrot.lane.b32.xlu0 %v4180_v12, %s4464_s25 }
 0x165   : > { %4211 = vrot.lane.b32.xlu1 %v4330_v13, %s4464_s25 }
 0x168   : > { %4231 = vrot.lane.b32.xlu0 %v4742_v41, %s4466_s26 }
 0x169   : > { %4216 = vrot.lane.b32.xlu1 %v4335_v52, %s4464_s25 }
 0x16c   : > { %4236 = vrot.lane.b32.xlu0 %v4761_v61, %s4466_s26 }
 0x16d   : > { %4226 = vrot.lane.b32.xlu1 %v4770_v6, %s4464_s25 }
 0x170   : > { %4251 = vrot.lane.b32.xlu0 %v4180_v12, %s4466_s26 }
 0x171   : > { %4241 = vrot.lane.b32.xlu1 %v4330_v13, %s4466_s26 }
 0x174   : > { %4261 = vrot.lane.b32.xlu0 %v4742_v41, %s4467_s27 }
 0x175   : > { %4246 = vrot.lane.b32.xlu1 %v4335_v52, %s4466_s26 }
 0x178   : > { %4266 = vrot.lane.b32.xlu0 %v4761_v61, %s4467_s27 }
 0x179   : > { %4256 = vrot.lane.b32.xlu1 %v4770_v6, %s4466_s26 }
 0x17c   : > { %4281 = vrot.lane.b32.xlu0 %v4180_v12, %s4467_s27 }
 0x17d   : > { %4271 = vrot.lane.b32.xlu1 %v4330_v13, %s4467_s27 }
 0x180   : > { %4291 = vrot.lane.b32.xlu0 %v4742_v41, %s4468_s28 }
 0x181   : > { %4276 = vrot.lane.b32.xlu1 %v4335_v52, %s4467_s27 }
 0x184   : > { %4296 = vrot.lane.b32.xlu0 %v4761_v61, %s4468_s28 }
 0x185   : > { %4286 = vrot.lane.b32.xlu1 %v4770_v6, %s4467_s27 }
 0x188   : > { %4311 = vrot.lane.b32.xlu0 %v4180_v12, %s4468_s28 }
 0x189   : > { %4301 = vrot.lane.b32.xlu1 %v4330_v13, %s4468_s28 }
 0x18c   : > { %4321 = vrot.lane.b32.xlu0 %v4742_v41, %s4469_s29 }
 0x18d   : > { %4306 = vrot.lane.b32.xlu1 %v4335_v52, %s4468_s28 }
 0x190   : > { %4326 = vrot.lane.b32.xlu0 %v4761_v61, %s4469_s29 }
 0x191   : > { %4316 = vrot.lane.b32.xlu1 %v4770_v6, %s4468_s28 }
 0x194   : > { %4341 = vrot.lane.b32.xlu0 %v4180_v12, %s4469_s29 }
 0x195   : > { %4331 = vrot.lane.b32.xlu1 %v4330_v13, %s4469_s29 }
 0x198   : > { %4351 = vrot.lane.b32.xlu0 %v4742_v41, %s4470_s30 }
 0x199   : > { %4336 = vrot.lane.b32.xlu1 %v4335_v52, %s4469_s29 }
 0x19c   : > { %4356 = vrot.lane.b32.xlu0 %v4761_v61, %s4470_s30 }
 0x19d   : > { %4346 = vrot.lane.b32.xlu1 %v4770_v6, %s4469_s29 }
 0x1a0   : > { %4371 = vrot.lane.b32.xlu0 %v4180_v12, %s4470_s30 }
 0x1a1   : > { %4361 = vrot.lane.b32.xlu1 %v4330_v13, %s4470_s30 }
 0x1a4   : > { %2924 = vperm.xlu0 %4108, %v2918_v16  }
 0x1a5   : > { %4366 = vrot.lane.b32.xlu1 %v4335_v52, %s4470_s30 }
 0x1a8   : > { %2934 = vperm.xlu0 %4108, %v2920_v17  }
 0x1a9   : > { %4376 = vrot.lane.b32.xlu1 %v4770_v6, %s4470_s30 }
 0x1ad   : > { %2929 = vperm.xlu1 %4109, %v2919_v18  }
 0x1b1   : > { %2939 = vperm.xlu1 %4109, %v2921_v19  }
 0x1b6   : > { %v4142_v20 = vpop.permute.xlu0 %4141 }
 0x1b7   : > { %v4144_v5 = vunpack.i.h.bf16 %v4142_v20  ;;  %v4143_v26 = vunpack.i.l.bf16 %v4142_v20 }
 0x1ba   : > { %v4152_v1 = vpop.permute.xlu0 %4151 }
 0x1bb   : > { %v4154_v51 = vunpack.i.h.bf16 %v4152_v1  ;;  %v4153_v12 = vunpack.i.l.bf16 %v4152_v1  ;;  %v4907_v1 = vld [vmem:[%s5691_s6 + $0x40] sm:$0xff] }
 0x1be   : > { %v4854_v21 = vpop.permute.xlu0 %4161 }
 0x1bf   : > { %v4147_v22 = vpop.permute.xlu1 %4146 }
 0x1c0   : > { %v4149_v41 = vunpack.i.h.bf16 %v4147_v22  ;;  %v4148_v49 = vunpack.i.l.bf16 %v4147_v22 }
 0x1c2   : > { %v4856_v2 = vpop.permute.xlu0 %4166 }
 0x1c3   : > { %v4858_v23 = vpop.permute.xlu1 %4156  ;;  %v4169_v0 = vunpack.i.h.bf16 %v4856_v2  ;;  %v4168_v3 = vunpack.i.l.bf16 %v4856_v2 }
 0x1c5   : > { %v1213_v33 = vsel %vm1211_vm3, %v4168_v3, %v4169_v0  ;;  %v1212_v39 = vsel %vm1211_vm3, %v4143_v26, %v4168_v3 }
 0x1c6   : > { %v4862_v24 = vpop.permute.xlu0 %4181 }
 0x1c7   : > { %v4864_v25 = vpop.permute.xlu1 %4171  ;;  %v4184_v29 = vunpack.i.h.bf16 %v4862_v24  ;;  %v4183_v10 = vunpack.i.l.bf16 %v4862_v24 }
 0x1c8   : > { %v4174_v27 = vunpack.i.h.bf16 %v4864_v25  ;;  %v4173_v28 = vunpack.i.l.bf16 %v4864_v25  ;;  %v749_v25 = vld [vmem:[%s5691_s6 + $0x10] sm:$0xff] }
 0x1c9   : > { %v1219_v55 = vsel %vm1211_vm3, %v4183_v10, %v4184_v29  ;;  %v1218_v59 = vsel %vm1211_vm3, %v4149_v41, %v4183_v10  ;;  %v4159_v10 = vunpack.i.h.bf16 %v4858_v23 }
 0x1ca   : > { %v4870_v32 = vpop.permute.xlu0 %4186  ;;  %v1215_v35 = vsel %vm1211_vm3, %v4173_v28, %v4174_v27  ;;  %v1214_v40 = vsel %vm1211_vm3, %v4144_v5, %v4173_v28 }
 0x1cb   : > { %v4880_v43 = vpop.permute.xlu1 %4176  ;;  %v3871_v45 = vpack.c.bf16 %v1215_v35, %v1213_v33  ;;  %v3873_v46 = vpack.c.bf16 %v1214_v40, %v1212_v39  ;;  %v4189_v60 = vunpack.i.h.bf16 %v4870_v32  ;;  %v4188_v61 = vunpack.i.l.bf16 %v4870_v32 }
 0x1cc   : > { %v4179_v50 = vunpack.i.h.bf16 %v4880_v43  ;;  %v4178_v54 = vunpack.i.l.bf16 %v4880_v43  ;;  %v4158_v32 = vunpack.i.l.bf16 %v4858_v23 }
 0x1cd   : > { %3872 = vmatprep.subr.bf16.mxu0 %v3871_v45  ;;  %v790_v19 = vsel %vm788_vm4, %v4188_v61, %v4189_v60  ;;  %v789_v22 = vsel %vm788_vm4, %v4153_v12, %v4188_v61 }
 0x1ce   : > { %3874 = vmatpush1.bf16.msra.mxu0 %v3873_v46  ;;  %v4890_v62 = vpop.permute.xlu0 %4201  ;;  %v1217_v63 = vsel %vm1211_vm3, %v4178_v54, %v4179_v50  ;;  %v1216_v4 = vsel %vm1211_vm3, %v4148_v49, %v4178_v54  ;;  %v4925_v54 = vld [vmem:[%s5691_s6 + $0x48] sm:$0xff]  ;;  %vm3288_vm3 = vcmask 343040  }
 0x1cf   : > { %v4192_v6 = vpop.permute.xlu1 %4191  ;;  %v3875_v34 = vpack.c.bf16 %v1219_v55, %v1217_v63  ;;  %v3877_v11 = vpack.c.bf16 %v1218_v59, %v1216_v4  ;;  %v4204_v16 = vunpack.i.h.bf16 %v4890_v62  ;;  %v4203_v17 = vunpack.i.l.bf16 %v4890_v62 }
 0x1d0   : > { %v4194_v13 = vunpack.i.h.bf16 %v4192_v6  ;;  %v4193_v52 = vunpack.i.l.bf16 %v4192_v6  ;;  %v4163_v55 = vunpack.i.l.bf16 %v4854_v21  ;;  %v4164_v63 = vunpack.i.h.bf16 %v4854_v21 }
 0x1d1   : > { %3876 = vmatprep.subr.bf16.mxu0 %v3875_v34  ;;  %v796_v41 = vsel %vm788_vm4, %v4203_v17, %v4204_v16  ;;  %v795_v49 = vsel %vm788_vm4, %v4159_v10, %v4203_v17 }
 0x1d2   : > { %3878 = vmatpush1.bf16.msra.mxu0 %v3877_v11  ;;  %v4898_v18 = vpop.permute.xlu0 %4206  ;;  %v792_v20 = vsel %vm788_vm4, %v4193_v52, %v4194_v13  ;;  %v791_v3 = vsel %vm788_vm4, %v4154_v51, %v4193_v52  ;;  %v3841_v34 = vpack.c.bf16 %v4194_v13, %v4189_v60  ;;  %v4945_v60 = vld [vmem:[%s5691_s6 + $0x20] sm:$0xff] }
 0x1d3   : > { %v4197_v5 = vpop.permute.xlu1 %4196  ;;  %v3833_v26 = vpack.c.bf16 %v792_v20, %v790_v19  ;;  %v3835_v28 = vpack.c.bf16 %v791_v3, %v789_v22  ;;  %v4209_v39 = vunpack.i.h.bf16 %v4898_v18  ;;  %v4208_v40 = vunpack.i.l.bf16 %v4898_v18 }
 0x1d4   : > { %v4199_v33 = vunpack.i.h.bf16 %v4197_v5  ;;  %v4198_v35 = vunpack.i.l.bf16 %v4197_v5 }
 0x1d5   : > { %3834 = vmatprep.subr.bf16.mxu1 %v3833_v26  ;;  %3513 = vmatmul.mubr.msk.f32.vlgmr.msra.gmra.mrb[0].mxu0 %vm809_vm5, %v4907_v1  ;;  %v1460_v11 = vsel %vm1459_vm6, %v4163_v55, %v4208_v40  ;;  %v1461_v51 = vsel %vm1459_vm6, %v4208_v40, %v4209_v39  ;;  %v4985_v55 = vld [vmem:[%s5691_s6 + $0x58] sm:$0xff] }
 0x1d6   : > { %3836 = vmatpush1.bf16.msra.mxu1 %v3835_v28  ;;  %v4916_v45 = vpop.permute.xlu0 %4221  ;;  %v794_v46 = vsel %vm788_vm4, %v4198_v35, %v4199_v33  ;;  %v793_v23 = vsel %vm788_vm4, %v4158_v32, %v4198_v35  ;;  %1314 = vmatprep.mubr.f32.mxu0 %v4465_v53  ;;  %v3845_v26 = vpack.c.bf16 %v4204_v16, %v4199_v33  ;;  %v4960_v28 = vld [vmem:[%s5691_s6 + $0x50] sm:$0xff]  ;;  %v4967_v32 = vld [vmem:[%s5691_s6 + $0x28] sm:$0xff] }
 0x1d7   : > { %v4928_v59 = vpop.permute.xlu1 %4211  ;;  %v3837_v61 = vpack.c.bf16 %v796_v41, %v794_v46  ;;  %v3839_v62 = vpack.c.bf16 %v795_v49, %v793_v23  ;;  %v4224_v52 = vunpack.i.h.bf16 %v4916_v45  ;;  %v4223_v21 = vunpack.i.l.bf16 %v4916_v45 }
 0x1d8   : > { %v4214_v4 = vunpack.i.h.bf16 %v4928_v59  ;;  %v4213_v6 = vunpack.i.l.bf16 %v4928_v59 }
 0x1d9   : > { %3838 = vmatprep.subr.bf16.mxu1 %v3837_v61  ;;  %3514 = vmatmul.mubr.msk.f32.gmra.mrb[2].mxu0 %vm809_vm5, %v4925_v54  ;;  %v1467_v33 = vsel %vm1459_vm6, %v4223_v21, %v4224_v52 }
 0x1da   : > { %v1462_v12 = vsel %vm1459_vm6, %v4164_v63, %v4213_v6  ;;  %3840 = vmatpush1.bf16.msra.mxu1 %v3839_v62  ;;  %v4232_v17 = vpop.permute.xlu0 %4231  ;;  %v1463_v13 = vsel %vm1459_vm6, %v4213_v6, %v4214_v4  ;;  %1320 = vmatprep.mubr.f32.mxu0 %v4465_v53  ;;  %v3479_v6 = vld [vmem:[%s5691_s6 + $0x30] sm:$0xff] }
 0x1db   : > { %v3889_v19 = vpack.c.bf16 %v1462_v12, %v1460_v11  ;;  %v4951_v20 = vpop.permute.xlu1 %4216  ;;  %3842 = vmatprep.subr.bf16.mxu1 %v3841_v34  ;;  %v3887_v22 = vpack.c.bf16 %v1463_v13, %v1461_v51  ;;  %v4234_v12 = vunpack.i.h.bf16 %v4232_v17 }
 0x1dc   : > { %v4219_v3 = vunpack.i.h.bf16 %v4951_v20  ;;  %v4218_v5 = vunpack.i.l.bf16 %v4951_v20  ;;  %v5334_v20 = vld [vmem:[%s5691_s6 + $0xb8] sm:$0xff] }
 0x1dd   : > { %3481 = vmatmul.mubr.msk.f32.vlgmr.msra.gmra.mrb[0].mxu1 %vm809_vm5, %v4945_v60  ;;  %3888 = vmatprep.subr.bf16.mxu0 %v3887_v22 }
 0x1de   : > { %3844 = vmatpush3.bf16.msra.mxu1 %v3841_v34  ;;  %3890 = vmatpush1.bf16.msra.mxu0 %v3889_v19  ;;  %v4962_v10 = vpop.permute.xlu0 %4236  ;;  %v1465_v16 = vsel %vm1459_vm6, %v4218_v5, %v4219_v3  ;;  %v4233_v34 = vunpack.i.l.bf16 %v4232_v17 }
 0x1df   : > { %v4227_v35 = vpop.permute.xlu1 %4226  ;;  %3846 = vmatprep.subr.bf16.mxu1 %v3845_v26  ;;  %892 = vmatprep.mubr.f32.mxu1 %v4465_v53  ;;  %v3891_v40 = vpack.c.bf16 %v1467_v33, %v1465_v16  ;;  %v4239_v23 = vunpack.i.h.bf16 %v4962_v10  ;;  %v4238_v49 = vunpack.i.l.bf16 %v4962_v10 }
 0x1e0   : > { %v4229_v41 = vunpack.i.h.bf16 %v4227_v35  ;;  %v4228_v46 = vunpack.i.l.bf16 %v4227_v35  ;;  %3515 = vmatmul.mubr.msk.f32.gmra.mrb[4].mxu0 %vm809_vm5, %v4960_v28 }
 0x1e1   : > { %3482 = vmatmul.mubr.msk.f32.gmra.mrb[2].mxu1 %vm809_vm5, %v4967_v32  ;;  %3892 = vmatprep.subr.bf16.mxu0 %v3891_v40  ;;  %v1708_v19 = vsel %vm1707_vm7, %v4233_v34, %v4238_v49  ;;  %v1709_v7 = vsel %vm1707_vm7, %v4238_v49, %v4239_v23 }
 0x1e2   : > { %v1464_v61 = vsel %vm1459_vm6, %v4228_v46, %v4218_v5  ;;  %v1466_v62 = vsel %vm1459_vm6, %v4229_v41, %v4223_v21  ;;  %3848 = vmatpush3.bf16.msra.mxu1 %v3845_v26  ;;  %v4989_v63 = vpop.permute.xlu0 %4251  ;;  %1326 = vmatprep.mubr.f32.mxu0 %v4465_v53  ;;  %v3480_v26 = vld [vmem:[%s5691_s6 + $0x38] sm:$0xff] }
 0x1e3   : > { %v3893_v11 = vpack.c.bf16 %v1466_v62, %v1464_v61  ;;  %v4995_v51 = vpop.permute.xlu1 %4241  ;;  %3850 = vmatprep.subr.bf16.mxu1 %v3849_v14  ;;  %898 = vmatprep.mubr.f32.mxu1 %v4465_v53  ;;  %v5703_v17 = vunpack.i.h.bf16 %v4989_v63  ;;  %v4253_v22 = vunpack.i.l.bf16 %v4989_v63  ;;  %v5043_v61 = vld [vmem:[%s5691_s6 + $0x68] sm:$0xff] }
 0x1e4   : > { %v4244_v21 = vunpack.i.h.bf16 %v4995_v51  ;;  %v4243_v13 = vunpack.i.l.bf16 %v4995_v51  ;;  %3516 = vmatmul.mubr.msk.f32.gmra.mrb[6].mxu0 %vm809_vm5, %v4985_v55 }
 0x1e5   : > { %3483 = vmatmul.mubr.msk.f32.gmra.mrb[4].mxu1 %vm809_vm5, %v3479_v6  ;;  %3894 = vmatpush1.bf16.msra.mxu0 %v3893_v11  ;;  %v1715_v11 = vsel %vm1707_vm7, %v4253_v22, %v5703_v17 }
 0x1e6   : > { %v1710_v14 = vsel %vm1707_vm7, %v4234_v12, %v4243_v13  ;;  %v5018_v5 = vpop.permute.xlu0 %4261  ;;  %1556 = vmatprep.mubr.f32.mxu0 %v4465_v53  ;;  %904 = vmatprep.mubr.f32.mxu1 %v4465_v53  ;;  %v1711_v16 = vsel %vm1707_vm7, %v4243_v13, %v4244_v21  ;;  %v3911_v45 = vpack.c.bf16 %v4244_v21, %v4239_v23 }
 0x1e7   : > { %v3905_v33 = vpack.c.bf16 %v1710_v14, %v1708_v19  ;;  %v5028_v35 = vpop.permute.xlu1 %4246  ;;  %v3903_v40 = vpack.c.bf16 %v1711_v16, %v1709_v7  ;;  %v5066_v14 = vld [vmem:[%s5691_s6 + $0x70] sm:$0xff]  ;;  %v4264_v8 = vunpack.i.h.bf16 %v5018_v5  ;;  %v4263_v49 = vunpack.i.l.bf16 %v5018_v5 }
 0x1e8   : > { %v5704_v41 = vunpack.i.h.bf16 %v5028_v35  ;;  %v4248_v46 = vunpack.i.l.bf16 %v5028_v35  ;;  %3525 = vmatmul.mubr.msk.f32.vlgmr.msra.gmra.mrb[0].mxu0 %vm809_vm5, %v5010_v48 }
 0x1e9   : > { %3484 = vmatmul.mubr.msk.f32.gmra.mrb[6].mxu1 %vm809_vm5, %v3480_v26  ;;  %3904 = vmatprep.subr.bf16.mxu0 %v3903_v40 }
 0x1ea   : > { %3906 = vmatpush1.bf16.msra.mxu0 %v3905_v33  ;;  %v5045_v62 = vpop.permute.xlu0 %4266  ;;  %1562 = vmatprep.mubr.f32.mxu0 %v4465_v53  ;;  %v1713_v34 = vsel %vm1707_vm7, %v4248_v46, %v5704_v41  ;;  %v3883_v41 = vpack.c.bf16 %v4184_v29, %v4179_v50 }
 0x1eb   : > { %v4257_v12 = vpop.permute.xlu1 %4256  ;;  %3696 = vmatprep.mubr.msk.f32.mxu1 %vm809_vm5, %v4945_v60  ;;  %v3907_v13 = vpack.c.bf16 %v1715_v11, %v1713_v34  ;;  %v5702_v33 = vunpack.i.h.bf16 %v5045_v62  ;;  %v4268_v40 = vunpack.i.l.bf16 %v5045_v62  ;;  %v5122_v34 = vld [vmem:[%s5691_s6] sm:$0xff] }
 0x1ec   : > { %v4259_v19 = vunpack.i.h.bf16 %v4257_v12  ;;  %v4258_v7 = vunpack.i.l.bf16 %v4257_v12  ;;  %3526 = vmatmul.mubr.msk.f32.gmra.mrb[2].mxu0 %vm809_vm5, %v5043_v61 }
 0x1ed   : > { %3697 = vmatmul.mubr.msk.f32.vlgmr.msra.gmra.mrb[8].mxu1 %vm809_vm5, %v4967_v32  ;;  %3908 = vmatprep.subr.bf16.mxu0 %v3907_v13  ;;  %v1957_v11 = vsel %vm1955_vm10, %v4268_v40, %v5702_v33  ;;  %v1956_v5 = vsel %vm1955_vm10, %v4263_v49, %v4268_v40  ;;  %v5182_v49 = vld [vmem:[%s5691_s6 + $0x88] sm:$0xff] }
 0x1ee   : > { %v1712_v60 = vsel %vm1707_vm7, %v4258_v7, %v4248_v46  ;;  %v1714_v16 = vsel %vm1707_vm7, %v4259_v19, %v4253_v22  ;;  %3853 = vmatpush1.bf16.msk.msra.mxu1 %vm3852_vm9, %v3851_v38  ;;  %v5080_v32 = vpop.permute.xlu0 %4281  ;;  %1568 = vmatprep.mubr.f32.mxu0 %v4465_v53  ;;  %v5147_v7 = vld [vmem:[%s5691_s6 + $0x80] sm:$0xff] }
 0x1ef   : > { %v3909_v46 = vpack.c.bf16 %v1714_v16, %v1712_v60  ;;  %3855 = vmatprep.subr.bf16.mxu1 %v3854_v15  ;;  %v5086_v22 = vpop.permute.xlu1 %4271  ;;  %3699 = vmatprep.mubr.msk.f32.mxu1 %vm809_vm5, %v3479_v6  ;;  %v5699_v15 = vunpack.i.h.bf16 %v5080_v32  ;;  %v4283_v6 = vunpack.i.l.bf16 %v5080_v32  ;;  %v5159_v16 = vld [vmem:[%s5691_s6 + $0x8] sm:$0xff] }
 0x1f0   : > { %v5701_v30 = vunpack.i.h.bf16 %v5086_v22  ;;  %v4273_v31 = vunpack.i.l.bf16 %v5086_v22  ;;  %3527 = vmatmul.mubr.msk.f32.gmra.mrb[4].mxu0 %vm809_vm5, %v5066_v14 }
 0x1f1   : > { %3700 = vmatmul.mubr.msk.f32.gmra.mrb[10].mxu1 %vm809_vm5, %v3480_v26  ;;  %3910 = vmatpush1.bf16.msra.mxu0 %v3909_v46  ;;  %v1963_v40 = vsel %vm1955_vm10, %v4283_v6, %v5699_v15 }
 0x1f2   : > { %3858 = vmatpush1.bf16.msk.msra.mxu1 %vm3852_vm9, %v3856_v36  ;;  %v5116_v26 = vpop.permute.xlu0 %4291  ;;  %1574 = vmatprep.mubr.f32.mxu0 %v4465_v53  ;;  %v1959_v56 = vsel %vm1955_vm10, %v4273_v31, %v5701_v30  ;;  %v1958_v12 = vsel %vm1955_vm10, %v4264_v8, %v4273_v31 }
 0x1f3   : > { %3861 = vmatprep.subr.msk.bf16.mxu1 %vm5095_vm11, %v4744_v42  ;;  %v5133_v57 = vpop.permute.xlu1 %4276  ;;  %1072 = vmatprep.mubr.f32.mxu1 %v4465_v53  ;;  %v3919_v36 = vpack.c.bf16 %v1959_v56, %v1957_v11  ;;  %v3921_v31 = vpack.c.bf16 %v1958_v12, %v1956_v5 }
 0x1f4   : > { %v5700_v13 = vunpack.i.h.bf16 %v5133_v57  ;;  %v4278_v19 = vunpack.i.l.bf16 %v5133_v57  ;;  %3528 = vmatmul.mubr.msk.f32.gmra.mrb[6].mxu0 %vm809_vm5, %v5104_v9 }
 0x1f5   : > { %3497 = vmatmul.mubr.msk.f32.vlgmr.msra.gmra.mrb[0].mxu1 %vm809_vm5, %v5122_v34  ;;  %3920 = vmatprep.subr.bf16.mxu0 %v3919_v36  ;;  %v3879_v36 = vpack.c.bf16 %v4174_v27, %v4169_v0 }
 0x1f6   : > { %3864 = vmatpush3.bf16.msk.msra.mxu1 %vm5095_vm11, %v4744_v42  ;;  %v5153_v60 = vpop.permute.xlu0 %4296  ;;  %1804 = vmatprep.mubr.f32.mxu0 %v4465_v53  ;;  %v1961_v46 = vsel %vm1955_vm10, %v4278_v19, %v5700_v13 }
 0x1f7   : > { %3867 = vmatprep.subr.msk.bf16.mxu1 %vm5095_vm11, %v4772_v37  ;;  %v4287_v42 = vpop.permute.xlu1 %4286  ;;  %1078 = vmatprep.mubr.f32.mxu1 %v4465_v53  ;;  %v3923_v8 = vpack.c.bf16 %v1963_v40, %v1961_v46  ;;  %v5698_v46 = vunpack.i.h.bf16 %v5153_v60  ;;  %v4298_v2 = vunpack.i.l.bf16 %v5153_v60 }
 0x1f8   : > { %v4289_v11 = vunpack.i.h.bf16 %v4287_v42  ;;  %v4288_v56 = vunpack.i.l.bf16 %v4287_v42  ;;  %3537 = vmatmul.mubr.msk.f32.vlgmr.msra.gmra.mrb[0].mxu0 %vm809_vm5, %v5147_v7 }
 0x1f9   : > { %3922 = vmatpush1.bf16.msra.mxu0 %v3921_v31  ;;  %3498 = vmatmul.mubr.msk.f32.gmra.mrb[2].mxu1 %vm809_vm5, %v5159_v16  ;;  %v750_v31 = vld [vmem:[%s5691_s6 + $0x18] sm:$0xff]  ;;  %v2205_v42 = vsel %vm2203_vm12, %v4298_v2, %v5698_v46 }
 0x1fa   : > { %v1960_v12 = vsel %vm1955_vm10, %v4288_v56, %v4278_v19  ;;  %v1962_v5 = vsel %vm1955_vm10, %v4289_v11, %v4283_v6  ;;  %3870 = vmatpush3.bf16.msk.msra.mxu1 %vm5095_vm11, %v4772_v37  ;;  %3924 = vmatprep.subr.bf16.mxu0 %v3923_v8  ;;  %v5191_v0 = vpop.permute.xlu0 %4311  ;;  %v5208_v37 = vld [vmem:[%s5691_s6 + $0x90] sm:$0xff] }
 0x1fb   : > { %v3925_v27 = vpack.c.bf16 %v1962_v5, %v1960_v12  ;;  %3880 = vmatprep.subr.bf16.mxu1 %v3879_v36  ;;  %v5196_v19 = vpop.permute.xlu1 %4301  ;;  %1810 = vmatprep.mubr.f32.mxu0 %v4465_v53  ;;  %v4314_v46 = vunpack.i.h.bf16 %v5191_v0 }
 0x1fc   : > { %v5697_v6 = vunpack.i.h.bf16 %v5196_v19  ;;  %v4303_v40 = vunpack.i.l.bf16 %v5196_v19  ;;  %1084 = vmatprep.mubr.f32.mxu1 %v4465_v53  ;;  %3538 = vmatmul.mubr.msk.f32.gmra.mrb[2].mxu0 %vm809_vm5, %v5182_v49 }
 0x1fd   : > { %3499 = vmatmul.mubr.msk.f32.gmra.mrb[4].mxu1 %vm809_vm5, %v749_v25  ;;  %3926 = vmatpush1.bf16.msra.mxu0 %v3925_v27  ;;  %v5233_v27 = vld [vmem:[%s5691_s6 + $0x98] sm:$0xff] }
 0x1fe   : > { %v5210_v38 = vpop.permute.xlu0 %4321  ;;  %1816 = vmatprep.mubr.f32.mxu0 %v4465_v53  ;;  %1090 = vmatprep.mubr.f32.mxu1 %v4465_v53  ;;  %v2207_v8 = vsel %vm2203_vm12, %v4303_v40, %v5697_v6  ;;  %v4294_v6 = vunpack.i.h.bf16 %v5116_v26 }
 0x1ff   : > { %v5223_v11 = vpop.permute.xlu1 %4306  ;;  %v3935_v56 = vpack.c.bf16 %v2207_v8, %v2205_v42  ;;  %v4313_v42 = vunpack.i.l.bf16 %v5191_v0 }
 0x200   : > { %v4309_v12 = vunpack.i.h.bf16 %v5223_v11  ;;  %v4308_v5 = vunpack.i.l.bf16 %v5223_v11  ;;  %3539 = vmatmul.mubr.msk.f32.gmra.mrb[4].mxu0 %vm809_vm5, %v5208_v37  ;;  %v2206_v13 = vsel %vm2203_vm12, %v4294_v6, %v4303_v40 }
 0x201   : > { %3500 = vmatmul.mubr.msk.f32.gmra.mrb[6].mxu1 %vm809_vm5, %v750_v31  ;;  %3936 = vmatprep.subr.bf16.mxu0 %v3935_v56  ;;  %v4293_v56 = vunpack.i.l.bf16 %v5116_v26  ;;  %v2211_v24 = vsel %vm2203_vm12, %v4313_v42, %v4314_v46 }
 0x202   : > { %v5238_v8 = vpop.permute.xlu0 %4326  ;;  %1822 = vmatprep.mubr.f32.mxu0 %v4465_v53  ;;  %3710 = vmatprep.mubr.msk.f32.mxu1 %vm809_vm5, %v5122_v34  ;;  %v2209_v17 = vsel %vm2203_vm12, %v4308_v5, %v4309_v12 }
 0x203   : > { %v4317_v15 = vpop.permute.xlu1 %4316  ;;  %v2204_v26 = vsel %vm2203_vm12, %v4293_v56, %v4298_v2  ;;  %v4329_v34 = vunpack.i.h.bf16 %v5238_v8  ;;  %v4328_v6 = vunpack.i.l.bf16 %v5238_v8  ;;  %v3939_v50 = vpack.c.bf16 %v2211_v24, %v2209_v17  ;;  %v5287_v17 = vld [vmem:[%s5691_s6 + $0xa8] sm:$0xff] }
 0x204   : > { %v4319_v30 = vunpack.i.h.bf16 %v4317_v15  ;;  %v4318_v33 = vunpack.i.l.bf16 %v4317_v15  ;;  %3540 = vmatmul.mubr.msk.f32.gmra.mrb[6].mxu0 %vm809_vm5, %v5233_v27  ;;  %v5260_v15 = vld [vmem:[%s5691_s6 + $0xa0] sm:$0xff]  ;;  %v3937_v29 = vpack.c.bf16 %v2206_v13, %v2204_v26  ;;  %v3895_v13 = vpack.c.bf16 %v4214_v4, %v4209_v39 }
 0x205   : > { %3711 = vmatmul.mubr.msk.f32.vlgmr.msra.gmra.mrb[8].mxu1 %vm809_vm5, %v5159_v16  ;;  %2052 = vmatprep.mubr.f32.mxu0 %v4465_v53 }
 0x206   : > { %3882 = vmatpush3.bf16.msra.mxu1 %v3879_v36  ;;  %3713 = vmatprep.mubr.msk.f32.mxu1 %vm809_vm5, %v749_v25  ;;  %v2208_v16 = vsel %vm2203_vm12, %v4318_v33, %v4308_v5  ;;  %v2210_v2 = vsel %vm2203_vm12, %v4319_v30, %v4313_v42  ;;  %v5275_v56 = vpop.permute.xlu0 %4341  ;;  %v2453_v33 = vsel %vm2451_vm13, %v4328_v6, %v4329_v34  ;;  %v5313_v30 = vld [vmem:[%s5691_s6 + $0xb0] sm:$0xff]  ;;  %v5710_v42 = vunpack.i.h.bf16 %v4989_v63 }
 0x207   : > { %3884 = vmatprep.subr.bf16.mxu1 %v3883_v41  ;;  %v5269_v43 = vpop.permute.xlu1 %4331  ;;  %v3941_v39 = vpack.c.bf16 %v2210_v2, %v2208_v16  ;;  %v4343_v10 = vunpack.i.l.bf16 %v5275_v56 }
 0x208   : > { %v4334_v40 = vunpack.i.h.bf16 %v5269_v43  ;;  %v4333_v36 = vunpack.i.l.bf16 %v5269_v43  ;;  %3549 = vmatmul.mubr.msk.f32.vlgmr.msra.gmra.mrb[0].mxu0 %vm809_vm5, %v5260_v15 }
 0x209   : > { %3938 = vmatpush1.bf16.msra.mxu0 %v3937_v29  ;;  %3714 = vmatmul.mubr.msk.f32.gmra.mrb[10].mxu1 %vm809_vm5, %v750_v31 }
 0x20a   : > { %3886 = vmatpush3.bf16.msra.mxu1 %v3883_v41  ;;  %3940 = vmatprep.subr.bf16.mxu0 %v3939_v50  ;;  %v2455_v18 = vsel %vm2451_vm13, %v4333_v36, %v4334_v40  ;;  %v3899_v41 = vpack.c.bf16 %v4224_v52, %v4219_v3  ;;  %v5315_v25 = vpop.permute.xlu0 %4351  ;;  %v4324_v3 = vunpack.i.h.bf16 %v5210_v38 }
 0x20b   : > { %3896 = vmatprep.subr.bf16.mxu1 %v3895_v13  ;;  %v5297_v59 = vpop.permute.xlu1 %4336  ;;  %2058 = vmatprep.mubr.f32.mxu0 %v4465_v53  ;;  %v3951_v4 = vpack.c.bf16 %v2455_v18, %v2453_v33  ;;  %v5712_v33 = vunpack.i.h.bf16 %v5086_v22 }
 0x20c   : > { %3724 = vmatprep.mubr.msk.f32.mxu1 %vm809_vm5, %v4907_v1  ;;  %3550 = vmatmul.mubr.msk.f32.gmra.mrb[2].mxu0 %vm809_vm5, %v5287_v17  ;;  %v4338_v52 = vunpack.i.l.bf16 %v5297_v59  ;;  %v2454_v51 = vsel %vm2451_vm13, %v4324_v3, %v4333_v36  ;;  %v3559_v3 = vld [vmem:[%s5691_s6 + $0xd0] sm:$0xff] }
 0x20d   : > { %3942 = vmatpush1.bf16.msra.mxu0 %v3941_v39  ;;  %3725 = vmatmul.mubr.msk.f32.vlgmr.msra.gmra.mrb[8].mxu1 %vm809_vm5, %v4925_v54  ;;  %v4339_v54 = vunpack.i.h.bf16 %v5297_v59  ;;  %v5389_v39 = vld [vmem:[%s5691_s6 + $0xc8] sm:$0xff]  ;;  %v3581_v59 = vld [vmem:[%s5691_s6 + $0x100] sm:$0xff] }
 0x20e   : > { %3898 = vmatpush3.bf16.msra.mxu1 %v3895_v13  ;;  %3952 = vmatprep.subr.bf16.mxu0 %v3951_v4  ;;  %v5345_v5 = vpop.permute.xlu0 %4356 }
 0x20f   : > { %3900 = vmatprep.subr.bf16.mxu1 %v3899_v41  ;;  %v4347_v1 = vpop.permute.xlu1 %4346  ;;  %2064 = vmatprep.mubr.f32.mxu0 %v4465_v53  ;;  %v4359_v50 = vunpack.i.h.bf16 %v5345_v5  ;;  %v4358_v16 = vunpack.i.l.bf16 %v5345_v5 }
 0x210   : > { %3727 = vmatprep.mubr.msk.f32.mxu1 %vm809_vm5, %v4960_v28  ;;  %3551 = vmatmul.mubr.msk.f32.gmra.mrb[4].mxu0 %vm809_vm5, %v5313_v30  ;;  %v4344_v28 = vunpack.i.h.bf16 %v5275_v56  ;;  %v4349_v21 = vunpack.i.h.bf16 %v4347_v1  ;;  %v4348_v31 = vunpack.i.l.bf16 %v4347_v1  ;;  %v5713_v1 = vunpack.i.h.bf16 %v5133_v57 }
 0x211   : > { %3728 = vmatmul.mubr.msk.f32.gmra.mrb[10].mxu1 %vm809_vm5, %v4985_v55  ;;  %2070 = vmatprep.mubr.f32.mxu0 %v4465_v53  ;;  %v4323_v55 = vunpack.i.l.bf16 %v5210_v38  ;;  %v5361_v38 = vld [vmem:[%s5691_s6 + $0xc0] sm:$0xff]  ;;  %v2701_v22 = vsel %vm2699_vm14, %v4358_v16, %v4359_v50  ;;  %v5716_v57 = vunpack.i.h.bf16 %v5196_v19 }
 0x212   : > { %3902 = vmatpush3.bf16.msra.mxu1 %v3899_v41  ;;  %3738 = vmatprep.mubr.msk.f32.mxu1 %vm809_vm5, %v5010_v48  ;;  %v5709_v48 = vunpack.i.h.bf16 %v5028_v35  ;;  %v2457_v35 = vsel %vm2451_vm13, %v4338_v52, %v4339_v54  ;;  %v2459_v2 = vsel %vm2451_vm13, %v4343_v10, %v4344_v28  ;;  %v2456_v36 = vsel %vm2451_vm13, %v4348_v31, %v4338_v52 }
 0x213   : > { %3912 = vmatprep.subr.bf16.mxu1 %v3911_v45  ;;  %v5341_v23 = vpop.permute.xlu1 %4361  ;;  %v2452_v63 = vsel %vm2451_vm13, %v4323_v55, %v4328_v6  ;;  %v2458_v13 = vsel %vm2451_vm13, %v4349_v21, %v4343_v10  ;;  %v3955_v6 = vpack.c.bf16 %v2459_v2, %v2457_v35  ;;  %v4354_v21 = vunpack.i.h.bf16 %v5315_v25 }
 0x214   : > { %3552 = vmatmul.mubr.msk.f32.gmra.mrb[6].mxu0 %vm809_vm5, %v5334_v20  ;;  %v3915_v26 = vpack.c.bf16 %v5710_v42, %v5709_v48  ;;  %v4364_v24 = vunpack.i.h.bf16 %v5341_v23  ;;  %v4363_v29 = vunpack.i.l.bf16 %v5341_v23  ;;  %v3957_v41 = vpack.c.bf16 %v2458_v13, %v2456_v36 }
 0x215   : > { %3739 = vmatmul.mubr.msk.f32.vlgmr.msra.gmra.mrb[8].mxu1 %vm809_vm5, %v5043_v61  ;;  %2300 = vmatprep.mubr.f32.mxu0 %v4465_v53  ;;  %v3953_v61 = vpack.c.bf16 %v2454_v51, %v2452_v63  ;;  %v4353_v31 = vunpack.i.l.bf16 %v5315_v25  ;;  %v3959_v35 = vpack.c.bf16 %v4334_v40, %v4329_v34  ;;  %v3963_v8 = vpack.c.bf16 %v4344_v28, %v4339_v54  ;;  %v3571_v34 = vld [vmem:[%s5691_s6 + $0xf0] sm:$0xff]  ;;  %v3572_v40 = vld [vmem:[%s5691_s6 + $0xf8] sm:$0xff]  ;;  %v3582_v54 = vld [vmem:[%s5691_s6 + $0x108] sm:$0xff] }
 0x216   : > { %3914 = vmatpush3.bf16.msra.mxu1 %v3911_v45  ;;  %3741 = vmatprep.mubr.msk.f32.mxu1 %vm809_vm5, %v5066_v14  ;;  %v5711_v14 = vunpack.i.h.bf16 %v5045_v62  ;;  %v2703_v4 = vsel %vm2699_vm14, %v4363_v29, %v4364_v24  ;;  %v5714_v45 = vunpack.i.h.bf16 %v5080_v32  ;;  %v5715_v32 = vunpack.i.h.bf16 %v5153_v60  ;;  %v3584_v28 = vld [vmem:[%s5691_s6 + $0x118] sm:$0xff] }
 0x217   : > { %3916 = vmatprep.subr.bf16.mxu1 %v3915_v26  ;;  %v5394_v62 = vpop.permute.xlu1 %4366  ;;  %v3975_v43 = vpack.c.bf16 %v4364_v24, %v4359_v50 }
 0x218   : > { %3561 = vmatmul.mubr.msk.f32.vlgmr.msra.gmra.mrb[0].mxu0 %vm809_vm5, %v5361_v38  ;;  %v3927_v18 = vpack.c.bf16 %v5712_v33, %v5711_v14  ;;  %v3931_v52 = vpack.c.bf16 %v5714_v45, %v5713_v1  ;;  %v4369_v10 = vunpack.i.h.bf16 %v5394_v62  ;;  %v4368_v55 = vunpack.i.l.bf16 %v5394_v62 }
 0x219   : > { %3954 = vmatpush1.bf16.msra.mxu0 %v3953_v61  ;;  %3742 = vmatmul.mubr.msk.f32.gmra.mrb[10].mxu1 %vm809_vm5, %v5104_v9  ;;  %v3967_v9 = vpack.c.bf16 %v2703_v4, %v2701_v22 }
 0x21a   : > { %3918 = vmatpush3.bf16.msra.mxu1 %v3915_v26  ;;  %3956 = vmatprep.subr.bf16.mxu0 %v3955_v6  ;;  %v3947_v26 = vpack.c.bf16 %v4314_v46, %v4309_v12  ;;  %v2705_v25 = vsel %vm2699_vm14, %v4368_v55, %v4369_v10 }
 0x21b   : > { %3928 = vmatprep.subr.bf16.mxu1 %v3927_v18  ;;  %2306 = vmatprep.mubr.f32.mxu0 %v4465_v53  ;;  %v4377_v51 = vpop.permute.xlu1 %4376 }
 0x21c   : > { %3752 = vmatprep.mubr.msk.f32.mxu1 %vm809_vm5, %v5147_v7  ;;  %3562 = vmatmul.mubr.msk.f32.gmra.mrb[2].mxu0 %vm809_vm5, %v5389_v39  ;;  %v5414_v7 = vpop.permute.xlu0 %4371  ;;  %v4379_v48 = vunpack.i.h.bf16 %v4377_v51  ;;  %v4378_v42 = vunpack.i.l.bf16 %v4377_v51 }
 0x21d   : > { %3958 = vmatpush1.bf16.msra.mxu0 %v3957_v41  ;;  %3753 = vmatmul.mubr.msk.f32.vlgmr.msra.gmra.mrb[8].mxu1 %vm809_vm5, %v5182_v49  ;;  %v3943_v49 = vpack.c.bf16 %v5716_v57, %v5715_v32  ;;  %v4374_v60 = vunpack.i.h.bf16 %v5414_v7  ;;  %v4373_v19 = vunpack.i.l.bf16 %v5414_v7 }
 0x21e   : > { %3930 = vmatpush3.bf16.msra.mxu1 %v3927_v18  ;;  %3968 = vmatprep.subr.bf16.mxu0 %v3967_v9  ;;  %v2704_v0 = vsel %vm2699_vm14, %v4378_v42, %v4368_v55 }
 0x21f   : > { %3932 = vmatprep.subr.bf16.mxu1 %v3931_v52  ;;  %2312 = vmatprep.mubr.f32.mxu0 %v4465_v53  ;;  %v2707_v46 = vsel %vm2699_vm14, %v4373_v19, %v4374_v60  ;;  %v2706_v12 = vsel %vm2699_vm14, %v4379_v48, %v4373_v19  ;;  %v3979_v56 = vpack.c.bf16 %v4374_v60, %v4369_v10 }
 0x220   : > { %3755 = vmatprep.mubr.msk.f32.mxu1 %vm809_vm5, %v5208_v37  ;;  %3563 = vmatmul.mubr.msk.f32.gmra.mrb[4].mxu0 %vm809_vm5, %v3559_v3  ;;  %v3560_v37 = vld [vmem:[%s5691_s6 + $0xd8] sm:$0xff]  ;;  %v3973_v63 = vpack.c.bf16 %v2706_v12, %v2704_v0 }
 0x221   : > { %3756 = vmatmul.mubr.msk.f32.gmra.mrb[10].mxu1 %vm809_vm5, %v5233_v27  ;;  %2318 = vmatprep.mubr.f32.mxu0 %v4465_v53  ;;  %v2702_v27 = vsel %vm2699_vm14, %v4354_v21, %v4363_v29  ;;  %v2700_v29 = vsel %vm2699_vm14, %v4353_v31, %v4358_v16 }
 0x222   : > { %3934 = vmatpush3.bf16.msra.mxu1 %v3931_v52  ;;  %3766 = vmatprep.mubr.msk.f32.mxu1 %vm809_vm5, %v5260_v15  ;;  %v3569_v15 = vld [vmem:[%s5691_s6 + $0xe0] sm:$0xff]  ;;  %v3969_v11 = vpack.c.bf16 %v2702_v27, %v2700_v29 }
 0x223   : > { %3944 = vmatprep.subr.bf16.mxu1 %v3943_v49  ;;  %v2925_v14 = vpop.permute.xlu0 %2924 }
 0x224   : > { %3564 = vmatmul.mubr.msk.f32.gmra.mrb[6].mxu0 %vm809_vm5, %v3560_v37 }
 0x225   : > { %3767 = vmatmul.mubr.msk.f32.vlgmr.msra.gmra.mrb[8].mxu1 %vm809_vm5, %v5287_v17  ;;  %2548 = vmatprep.mubr.f32.mxu0 %v4465_v53  ;;  %v3971_v17 = vpack.c.bf16 %v2707_v46, %v2705_v25 }
 0x226   : > { %3946 = vmatpush3.bf16.msra.mxu1 %v3943_v49  ;;  %3769 = vmatprep.mubr.msk.f32.mxu1 %vm809_vm5, %v5313_v30  ;;  %v3570_v30 = vld [vmem:[%s5691_s6 + $0xe8] sm:$0xff] }
 0x227   : > { %3948 = vmatprep.subr.bf16.mxu1 %v3947_v26  ;;  %v2935_v19 = vpop.permute.xlu0 %2934 }
 0x228   : > { %3573 = vmatmul.mubr.msk.f32.vlgmr.msra.gmra.mrb[0].mxu0 %vm809_vm5, %v3569_v15 }
 0x229   : > { %3970 = vmatpush1.bf16.msra.mxu0 %v3969_v11  ;;  %3770 = vmatmul.mubr.msk.f32.gmra.mrb[10].mxu1 %vm809_vm5, %v5334_v20  ;;  %v3583_v20 = vld [vmem:[%s5691_s6 + $0x110] sm:$0xff] }
 0x22a   : > { %3950 = vmatpush3.bf16.msra.mxu1 %v3947_v26  ;;  %3972 = vmatprep.subr.bf16.mxu0 %v3971_v17 }
 0x22b   : > { %3960 = vmatprep.subr.bf16.mxu1 %v3959_v35  ;;  %2554 = vmatprep.mubr.f32.mxu0 %v4465_v53 }
 0x22c   : > { %3780 = vmatprep.mubr.msk.f32.mxu1 %vm809_vm5, %v5361_v38  ;;  %3574 = vmatmul.mubr.msk.f32.gmra.mrb[2].mxu0 %vm809_vm5, %v3570_v30 }
 0x22d   : > { %3974 = vmatpush1.bf16.msra.mxu0 %v3973_v63  ;;  %3781 = vmatmul.mubr.msk.f32.vlgmr.msra.gmra.mrb[8].mxu1 %vm809_vm5, %v5389_v39  ;;  %v2930_v39 = vpop.permute.xlu1 %2929 }
 0x22e   : > { %3962 = vmatpush3.bf16.msra.mxu1 %v3959_v35  ;;  %2560 = vmatprep.mubr.f32.mxu0 %v4465_v53 }
 0x22f   : > { %3964 = vmatprep.subr.bf16.mxu1 %v3963_v8  ;;  %3783 = vmatprep.mubr.msk.f32.mxu1 %vm809_vm5, %v3559_v3 }
 0x230   : > { %3575 = vmatmul.mubr.msk.f32.gmra.mrb[4].mxu0 %vm809_vm5, %v3571_v34 }
 0x231   : > { %3784 = vmatmul.mubr.msk.f32.gmra.mrb[10].mxu1 %vm809_vm5, %v3560_v37  ;;  %2566 = vmatprep.mubr.f32.mxu0 %v4465_v53  ;;  %v2940_v17 = vpop.permute.xlu1 %2939 }
 0x232   : > { %3966 = vmatpush3.bf16.msra.mxu1 %v3963_v8  ;;  %3794 = vmatprep.mubr.msk.f32.mxu1 %vm809_vm5, %v3569_v15 }
 0x233   : > { %3976 = vmatprep.subr.bf16.mxu1 %v3975_v43 }
 0x234   : > { %3576 = vmatmul.mubr.msk.f32.gmra.mrb[6].mxu0 %vm809_vm5, %v3572_v40 }
 0x235   : > { %3795 = vmatmul.mubr.msk.f32.vlgmr.msra.gmra.mrb[8].mxu1 %vm809_vm5, %v3570_v30  ;;  %2796 = vmatprep.mubr.f32.mxu0 %v4465_v53 }
 0x236   : > { %3978 = vmatpush3.bf16.msra.mxu1 %v3975_v43  ;;  %3797 = vmatprep.mubr.msk.f32.mxu1 %vm809_vm5, %v3571_v34 }
 0x237   : > { %3980 = vmatprep.subr.bf16.mxu1 %v3979_v56 }
 0x238   : > { %3585 = vmatmul.mubr.msk.f32.vlgmr.msra.gmra.mrb[0].mxu0 %vm809_vm5, %v3581_v59 }
 0x239   : > { %3798 = vmatmul.mubr.msk.f32.gmra.mrb[10].mxu1 %vm809_vm5, %v3572_v40  ;;  %2802 = vmatprep.mubr.f32.mxu0 %v4465_v53 }
 0x23a   : > { %3982 = vmatpush3.bf16.msra.mxu1 %v3979_v56  ;;  %3808 = vmatprep.mubr.msk.f32.mxu1 %vm809_vm5, %v3581_v59 }
 0x23c   : > { %3586 = vmatmul.mubr.msk.f32.gmra.mrb[2].mxu0 %vm809_vm5, %v3582_v54 }
 0x23d   : > { %3809 = vmatmul.mubr.msk.f32.vlgmr.msra.gmra.mrb[8].mxu1 %vm809_vm5, %v3582_v54  ;;  %2808 = vmatprep.mubr.f32.mxu0 %v4465_v53 }
 0x23e   : > { %3811 = vmatprep.mubr.msk.f32.mxu1 %vm809_vm5, %v3583_v20 }
 0x240   : > { %3587 = vmatmul.mubr.msk.f32.gmra.mrb[4].mxu0 %vm809_vm5, %v3583_v20 }
 0x241   : > { %3812 = vmatmul.mubr.msk.f32.gmra.mrb[10].mxu1 %vm809_vm5, %v3584_v28  ;;  %2814 = vmatprep.mubr.f32.mxu0 %v4465_v53 }
 0x242   : > { %3822 = vmatprep.mubr.msk.f32.mxu1 %vm4472_vm0, %v4465_v53  ;;  %v3066_v53 = vld [vmem:[%s5694_s9] sm:$0xff] }
 0x244   : > { %3588 = vmatmul.mubr.msk.f32.gmra.mrb[6].mxu0 %vm809_vm5, %v3584_v28 }
 0x2c8   : > { %v1074_v23 = vpop.f32.mrb[0].mxu1 }
 0x2c9   : > { %v1076_v5 = vpop.f32.mrb[1].mxu1 }
 0x2cc   : > { %v1080_v24 = vpop.f32.mrb[2].mxu1 }
 0x2cd   : > { %v1082_v38 = vpop.f32.mrb[3].mxu1 }
 0x2d0   : > { %v1086_v61 = vpop.f32.mrb[4].mxu1 }
 0x2d1   : > { %v1088_v50 = vpop.f32.mrb[5].mxu1 }
 0x2d4   : > { %v1092_v16 = vpop.f32.mrb[6].mxu1 }
 0x2d5   : > { %v1094_v2 = vpop.f32.mrb[7].mxu1 }
 0x30b   : > { %v2798_v36 = vpop.f32.mrb[0].mxu0 }
 0x30c   : > { %v3989_v13 = vadd.f32 %v2798_v36, %v1074_v23  ;;  %v2800_v6 = vpop.f32.mrb[1].mxu0  ;;  %v4471_v36 = vmov 0.0|0.0  }
 0x30d   : > { %v3990_v33 = vadd.f32 %v2800_v6, %v1076_v5  ;;  %3983 = vmatprep.subr.bf16.mxu1 %v4471_v36 }
 0x30e   : > { %v5520_v18 = vadd.f32 %v3989_v13, %v2925_v14 }
 0x30f   : > { %v5522_v4 = vadd.f32 %v3990_v33, %v2925_v14  ;;  %v2804_v41 = vpop.f32.mrb[2].mxu0 }
 0x310   : > { %v2954_v62 = vmul.f32 %v5520_v18, %v4708_v58  ;;  %v3991_v22 = vadd.f32 %v2804_v41, %v1080_v24  ;;  %v2806_v9 = vpop.f32.mrb[3].mxu0  ;;  %v3810_v1 = vpop.f32.mrb[8].mxu1 }
 0x311   : > { %v2955_v45 = vmul.f32 %v5522_v4, %v4700_v44  ;;  %v3992_v52 = vadd.f32 %v2806_v9, %v1082_v38  ;;  %v5528_v3 = vadd.f32 %v3810_v1, %v2930_v39  ;;  %v2887_v7 = vpop.f32.mrb[9].mxu1 }
 0x312   : > { %v5530_v32 = vadd.f32 %v3991_v22, %v2930_v39  ;;  %v5532_v57 = vadd.f32 %v2925_v14, %v2887_v7  ;;  %v2991_v22 = vld [vmem:[%s5693_s8] sm:$0x3]  ;;  %v3068_v7 = vld [vmem:[%s5694_s9 + $0x10] sm:$0xff] }
 0x313   : > { %v5534_v49 = vadd.f32 %v3992_v52, %v2930_v39  ;;  %v2810_v10 = vpop.f32.mrb[4].mxu0  ;;  %v2966_v55 = vadd.f32 %v2955_v45, %v2954_v62  ;;  %v2959_v27 = vmul.f32 %v5528_v3, %v4702_v47  ;;  %v3067_v52 = vld [vmem:[%s5694_s9 + $0x8] sm:$0xff] }
 0x314   : > { %v2957_v51 = vmul.f32 %v5530_v32, %v4708_v58  ;;  %v2956_v37 = vmul.f32 %v5532_v57, %v4702_v47  ;;  %v2812_v21 = vpop.f32.mrb[5].mxu0  ;;  %v3813_v60 = vpop.f32.mrb[10].mxu1  ;;  %v3993_v48 = vadd.f32 %v2810_v10, %v1086_v61  ;;  %v3069_v10 = vld [vmem:[%s5694_s9 + $0x18] sm:$0xff] }
 0x315   : > { %v2958_v31 = vmul.f32 %v5534_v49, %v4700_v44  ;;  %v3994_v42 = vadd.f32 %v2812_v21, %v1088_v50  ;;  %v2897_v26 = vpop.f32.mrb[11].mxu1  ;;  %v5557_v34 = vadd.f32 %v3813_v60, %v2940_v17  ;;  %v2973_v43 = vsel %vm2967_vm15, %v2959_v27, 0.0 }
 0x316   : > { %v5544_v15 = vadd.f32 %v2935_v19, %v2897_v26  ;;  %v2968_v25 = vsel %vm2967_vm15, %v2956_v37, 0.0  ;;  %v5547_v29 = vadd.f32 %v3993_v48, %v2935_v19 }
 0x317   : > { %v5549_v11 = vadd.f32 %v3994_v42, %v2935_v19  ;;  %v2816_v46 = vpop.f32.mrb[6].mxu0  ;;  %v2969_v0 = vadd.f32 %v2968_v25, %v2966_v55  ;;  %v2972_v12 = vadd.f32 %v2958_v31, %v2957_v51  ;;  %v2965_v5 = vmul.f32 %v5557_v34, %v4702_v47 }
 0x318   : > { %v2962_v35 = vmul.f32 %v5544_v15, %v4702_v47  ;;  %v2818_v30 = vpop.f32.mrb[7].mxu0  ;;  %v2960_v63 = vmul.f32 %v5547_v29, %v4708_v58  ;;  %v3995_v40 = vadd.f32 %v2816_v46, %v1092_v16 }
 0x319   : > { %v2961_v8 = vmul.f32 %v5549_v11, %v4700_v44  ;;  %2970 = vadd.xlane.f32.xlu0 %v2969_v0  ;;  %v3996_v56 = vadd.f32 %v2818_v30, %v1094_v2  ;;  %v2974_v59 = vadd.f32 %v2973_v43, %v2972_v12  ;;  %v2983_v16 = vsel %vm2967_vm15, %v2965_v5, 0.0 }
 0x31a   : > { %v5560_v20 = vadd.f32 %v3995_v40, %v2940_v17  ;;  %v2978_v23 = vsel %vm2967_vm15, %v2962_v35, 0.0  ;;  %v3211_v43 = vmul.f32 0.1, %v5530_v32  ;;  %v3212_v40 = vmul.f32 0.1, %v5534_v49 }
 0x31b   : > { %v2977_v54 = vadd.f32 %v2961_v8, %v2960_v63  ;;  %v5562_v28 = vadd.f32 %v3996_v56, %v2940_v17  ;;  %2975 = vadd.xlane.f32.xlu1 %v2974_v59  ;;  %v3208_v5 = vmul.f32 0.1, %v5520_v18  ;;  %v3209_v32 = vmul.f32 0.1, %v5522_v4 }
 0x31c   : > { %v2963_v38 = vmul.f32 %v5560_v20, %v4708_v58  ;;  %v3210_v49 = vmul.f32 0.1, %v5532_v57  ;;  %v3215_v57 = vmul.f32 0.1, %v5549_v11 }
 0x31d   : > { %v2979_v24 = vadd.f32 %v2978_v23, %v2977_v54  ;;  %v2964_v61 = vmul.f32 %v5562_v28, %v4700_v44 }
 0x31f   : > { %2980 = vadd.xlane.f32.xlu0 %v2979_v24  ;;  %v2982_v50 = vadd.f32 %v2964_v61, %v2963_v38  ;;  %v3213_v24 = vmul.f32 0.1, %v5528_v3  ;;  %v3214_v3 = vmul.f32 0.1, %v5547_v29  ;;  %v3219_v29 = vmul.f32 0.1, %v5557_v34 }
 0x321   : > { %v2984_v2 = vadd.f32 %v2983_v16, %v2982_v50 }
 0x323   : > { %2985 = vadd.xlane.f32.xlu0 %v2984_v2 }
 0x3a6   : > { %v2971_v13 = vpop.xlane.xlu0 %2970 }
 0x3a7   : > { %v2987_v6 = vmul.f32 0.00390625, %v2971_v13 }
 0x3a8   : > { %v2976_v47 = vpop.xlane.xlu1 %2975 }
 0x3a9   : > { %v2988_v14 = vmul.f32 0.00390625, %v2976_v47  ;;  %v3216_v47 = vmul.f32 0.1, %v5544_v15  ;;  %v3199_v15 = vld [vmem:[%s5617_s19 + $0x20] sm:$0xff] }
 0x3ab   : > { %v3984_v33 = vpack.c.bf16 %v2988_v14, %v2987_v6 }
 0x3ac   : > { %v2981_v58 = vpop.xlane.xlu0 %2980 }
 0x3ad   : > { %3985 = vmatpush3.bf16.msra.mxu1 %v3984_v33  ;;  %v2989_v39 = vmul.f32 0.00390625, %v2981_v58 }
 0x3ae   : > { %3986 = vmatprep.subr.bf16.mxu1 %v4471_v36  ;;  %v3217_v36 = vmul.f32 0.1, %v5560_v20  ;;  %v3218_v20 = vmul.f32 0.1, %v5562_v28 }
 0x3b0   : > { %v2986_v44 = vpop.xlane.xlu0 %2985 }
 0x3b1   : > { %v2990_v41 = vmul.f32 0.00390625, %v2986_v44  ;;  %v3196_v44 = vld [vmem:[%s5617_s19] sm:$0xff] }
 0x3b3   : > { %v3987_v62 = vpack.c.bf16 %v2990_v41, %v2989_v39  ;;  %v3201_v39 = vld [vmem:[%s5617_s19 + $0x30] sm:$0xff] }
 0x3b5   : > { %3988 = vmatpush3.bf16.msra.mxu1 %v3987_v62 }
 0x3b8   : > { %3823 = vmatmul.mubr.msk.f32.vlgmr.msra.gmra.mrb[12].mxu1 %vm809_vm5, %v2991_v22 }
 0x3b9   : > { %3827 = vmatprep.mubr.msk.f32.mxu1 %vm3070_vm1, %v3066_v53 }
 0x48b   : > { %v3061_v9 = vpop.f32.mrb[12].mxu1 }
 0x48c   : > { %v3065_v1 = vmax.f32 %v3061_v9, 0.0  ;;  %v3824_v45 = vpop.f32.mrb[13].mxu1  ;;  %v3200_v9 = vld [vmem:[%s5617_s19 + $0x28] sm:$0xff] }
 0x48e   : > { %3825 = vmatprep.subr.msk.mxu1 %vm3083_vm2, %v3065_v1 }
 0x48f   : > { %3826 = vmatpush3.msk.msra.mxu1 %vm3083_vm2, %v3065_v1 }
 0x490   : > { %3828 = vmatmul.mubr.msk.f32.vlgmr.msra.gmra.mrb[14].mxu1 %vm3070_vm1, %v3067_v52  ;;  %v3197_v52 = vld [vmem:[%s5617_s19 + $0x8] sm:$0xff] }
 0x491   : > { %3830 = vmatprep.mubr.msk.f32.mxu1 %vm3070_vm1, %v3068_v7 }
 0x494   : > { %3831 = vmatmul.mubr.msk.f32.gmra.mrb[16].mxu1 %vm3070_vm1, %v3069_v10 }
 0x563   : > { %v3829_v55 = vpop.f32.mrb[14].mxu1 }
 0x564   : > { %v3600_v51 = vmul.f32 -1.442695, %v3829_v55  ;;  %v3153_v37 = vpop.f32.mrb[15].mxu1 }
 0x565   : > { %v3599_v21 = vmul.f32 -1.442695, %v3153_v37  ;;  %v3198_v37 = vld [vmem:[%s5617_s19 + $0x10] sm:$0xff] }
 0x566   : > { %4436 = vpow2.f32 %v3600_v51 }
 0x567   : > { %4438 = vpow2.f32 %v3599_v21  ;;  %v3832_v60 = vpop.f32.mrb[16].mxu1 }
 0x568   : > { %v3602_v19 = vmul.f32 -1.442695, %v3832_v60  ;;  %v3163_v31 = vpop.f32.mrb[17].mxu1 }
 0x569   : > { %v3601_v27 = vmul.f32 -1.442695, %v3163_v31 }
 0x56a   : > { %4440 = vpow2.f32 %v3602_v19  ;;  %v3205_v19 = vld [vmem:[%s5617_s19 + $0x60] sm:$0xff] }
 0x56b   : > { %4442 = vpow2.f32 %v3601_v27 }
 0x570   : > { %v4437_v48 = vpop.eup %4436 }
 0x571   : > { %v4439_v42 = vpop.eup %4438  ;;  %v3185_v26 = vadd.f32 1.0, %v4437_v48 }
 0x572   : > { %v3184_v25 = vadd.f32 1.0, %v4439_v42 }
 0x573   : > { %4444 = vrcp.f32 %v3185_v26  ;;  %v3202_v26 = vld [vmem:[%s5617_s19 + $0x40] sm:$0xff] }
 0x574   : > { %v4441_v46 = vpop.eup %4440  ;;  %4446 = vrcp.f32 %v3184_v25  ;;  %v3203_v25 = vld [vmem:[%s5617_s19 + $0x48] sm:$0xff] }
 0x575   : > { %v4443_v0 = vpop.eup %4442  ;;  %v3187_v12 = vadd.f32 1.0, %v4441_v46 }
 0x576   : > { %v3186_v17 = vadd.f32 1.0, %v4443_v0 }
 0x578   : > { %4448 = vrcp.f32 %v3186_v17 }
 0x579   : > { %4450 = vrcp.f32 %v3187_v12 }
 0x57d   : > { %v4445_v35 = vpop.eup %4444 }
 0x57e   : > { %v4447_v30 = vpop.eup %4446  ;;  %3227 = vperm.xlu0 %4108, %v4445_v35   ;;  %v3204_v35 = vld [vmem:[%s5617_s19 + $0x50] sm:$0xff] }
 0x57f   : > { %3222 = vperm.xlu1 %4109, %v4447_v30  }
 0x582   : > { %v4449_v63 = vpop.eup %4448 }
 0x583   : > { %3232 = vperm.xlu1 %4109, %v4449_v63   ;;  %v4451_v8 = vpop.eup %4450 }
 0x587   : > { %3237 = vperm.xlu1 %4109, %v4451_v8   ;;  %v3207_v8 = vld [vmem:[%s5617_s19 + $0x70] sm:$0xff] }
 0x5fd   : > { %v3228_v56 = vpop.permute.xlu0 %3227 }
 0x5fe   : > { %v3243_v59 = vmul.f32 %v3228_v56, %v3211_v43  ;;  %v3244_v54 = vmul.f32 %v3228_v56, %v3212_v40  ;;  %v3223_v23 = vpop.permute.xlu1 %3222  ;;  %v3245_v38 = vmul.f32 %v3228_v56, %v3213_v24 }
 0x5ff   : > { %v3240_v61 = vmul.f32 %v3223_v23, %v3208_v5  ;;  %v3241_v16 = vmul.f32 %v3223_v23, %v3209_v32  ;;  %v3242_v18 = vmul.f32 %v3223_v23, %v3210_v49 }
 0x600   : > { %3272 = vrot.lane.b32.xlu0 %v3244_v54, %s4473_s12  ;;  %3270 = vrot.lane.b32.xlu1 %v3243_v59, %s4473_s12  ;;  %v3206_v54 = vld [vmem:[%s5617_s19 + $0x68] sm:$0xff] }
 0x602   : > { %v3233_v50 = vpop.permute.xlu1 %3232 }
 0x603   : > { %v3246_v13 = vmul.f32 %v3233_v50, %v3214_v3  ;;  %v3247_v6 = vmul.f32 %v3233_v50, %v3215_v57  ;;  %v3248_v14 = vmul.f32 %v3233_v50, %v3216_v47 }
 0x604   : > { %3264 = vrot.lane.b32.xlu0 %v3240_v61, %s4473_s12  ;;  %3274 = vrot.lane.b32.xlu1 %v3245_v38, %s4473_s12 }
 0x606   : > { %v3238_v2 = vpop.permute.xlu1 %3237 }
 0x607   : > { %v3249_v4 = vmul.f32 %v3238_v2, %v3217_v36  ;;  %v3250_v33 = vmul.f32 %v3238_v2, %v3218_v20  ;;  %v3251_v58 = vmul.f32 %v3238_v2, %v3219_v29 }
 0x608   : > { %3268 = vrot.lane.b32.xlu0 %v3242_v18, %s4473_s12  ;;  %3266 = vrot.lane.b32.xlu1 %v3241_v16, %s4473_s12 }
 0x60c   : > { %3276 = vrot.lane.b32.xlu0 %v3246_v13, %s4473_s12  ;;  %3282 = vrot.lane.b32.xlu1 %v3249_v4, %s4473_s12 }
 0x610   : > { %3280 = vrot.lane.b32.xlu0 %v3248_v14, %s4473_s12  ;;  %3278 = vrot.lane.b32.xlu1 %v3247_v6, %s4473_s12 }
 0x614   : > { %3284 = vrot.lane.b32.xlu0 %v3250_v33, %s4473_s12  ;;  %3286 = vrot.lane.b32.xlu1 %v3251_v58, %s4473_s12 }
 0x672   : > { %v3273_v11 = vpop.permute.xlu0 %3272  ;;  %v3271_v34 = vpop.permute.xlu1 %3270 }
 0x673   : > { %v3312_v28 = vadd.f32 %v3271_v34, %v3199_v15  ;;  %v3291_v1 = vsel %vm3288_vm3, %v3271_v34, %v3273_v11 }
 0x674   : > { %v3313_v55 = vadd.f32 %v3291_v1, %v3200_v9 }
 0x675   : > { %3339 = vrot.lane.b32.xlu1 %v3312_v28, %s4470_s30 }
 0x676   : > { %v3265_v41 = vpop.permute.xlu0 %3264  ;;  %v3275_v62 = vpop.permute.xlu1 %3274 }
 0x677   : > { %v3309_v22 = vadd.f32 %v3265_v41, %v3196_v44  ;;  %v3292_v53 = vsel %vm3288_vm3, %v3273_v11, %v3275_v62 }
 0x678   : > { %v3314_v45 = vadd.f32 %v3292_v53, %v3201_v39 }
 0x679   : > { %3333 = vrot.lane.b32.xlu0 %v3309_v22, %s4470_s30 }
 0x67a   : > { %v3269_v7 = vpop.permute.xlu0 %3268  ;;  %v3267_v10 = vpop.permute.xlu1 %3266  ;;  %3343 = vrot.lane.b32.xlu1 %v3314_v45, %s4470_s30 }
 0x67b   : > { %v3289_v51 = vsel %vm3288_vm3, %v3265_v41, %v3267_v10  ;;  %v3290_v21 = vsel %vm3288_vm3, %v3267_v10, %v3269_v7 }
 0x67c   : > { %v3310_v60 = vadd.f32 %v3289_v51, %v3197_v52  ;;  %v3311_v48 = vadd.f32 %v3290_v21, %v3198_v37 }
 0x67d   : > { %3341 = vrot.lane.b32.xlu0 %v3313_v55, %s4470_s30 }
 0x67e   : > { %v3277_v31 = vpop.permute.xlu0 %3276  ;;  %v3283_v27 = vpop.permute.xlu1 %3282  ;;  %3335 = vrot.lane.b32.xlu1 %v3310_v60, %s4470_s30 }
 0x67f   : > { %v3318_v42 = vadd.f32 %v3283_v27, %v3205_v19  ;;  %v3315_v12 = vadd.f32 %v3277_v31, %v3202_v26 }
 0x681   : > { %3337 = vrot.lane.b32.xlu0 %v3311_v48, %s4470_s30 }
 0x682   : > { %v3281_v46 = vpop.permute.xlu0 %3280  ;;  %v3279_v0 = vpop.permute.xlu1 %3278  ;;  %3351 = vrot.lane.b32.xlu1 %v3318_v42, %s4470_s30 }
 0x683   : > { %v3293_v17 = vsel %vm3288_vm3, %v3277_v31, %v3279_v0  ;;  %v3294_v30 = vsel %vm3288_vm3, %v3279_v0, %v3281_v46 }
 0x684   : > { %v3316_v63 = vadd.f32 %v3293_v17, %v3203_v25  ;;  %v3317_v56 = vadd.f32 %v3294_v30, %v3204_v35 }
 0x685   : > { %3345 = vrot.lane.b32.xlu0 %v3315_v12, %s4470_s30 }
 0x686   : > { %v3285_v43 = vpop.permute.xlu0 %3284  ;;  %v3287_v40 = vpop.permute.xlu1 %3286  ;;  %3347 = vrot.lane.b32.xlu1 %v3316_v63, %s4470_s30 }
 0x687   : > { %v3296_v59 = vsel %vm3288_vm3, %v3285_v43, %v3287_v40  ;;  %v3295_v23 = vsel %vm3288_vm3, %v3283_v27, %v3285_v43 }
 0x688   : > { %v3320_v5 = vadd.f32 %v3296_v59, %v3207_v8  ;;  %v3319_v24 = vadd.f32 %v3295_v23, %v3206_v54 }
 0x689   : > { %3349 = vrot.lane.b32.xlu0 %v3317_v56, %s4470_s30 }
 0x68a   : > { %3355 = vrot.lane.b32.xlu1 %v3320_v5, %s4470_s30 }
 0x68d   : > { %3353 = vrot.lane.b32.xlu0 %v3319_v24, %s4470_s30 }
 0x6e7   : > { %v3340_v38 = vpop.permute.xlu1 %3339 }
 0x6eb   : > { %v3334_v61 = vpop.permute.xlu0 %3333 }
 0x6ec   : > { %v3344_v50 = vpop.permute.xlu1 %3343 }
 0x6ed   : > { %3382 = vst.msk [vmem:[%s5656_s22 + $0x28] sm:$0xff] %vm2967_vm15, %v3344_v50 }
 0x6ef   : > { %v3342_v32 = vpop.permute.xlu0 %3341 }
 0x6f0   : > { %v3359_v49 = vsel %vm2699_vm14, %v3340_v38, %v3342_v32  ;;  %v3360_v16 = vsel %vm2699_vm14, %v3342_v32, %v3344_v50  ;;  %v3336_v18 = vpop.permute.xlu1 %3335 }
 0x6f1   : > { %3380 = vst [vmem:[%s5656_s22 + $0x18] sm:$0xff] %v3359_v49  ;;  %3381 = vst [vmem:[%s5656_s22 + $0x20] sm:$0xff] %v3360_v16  ;;  %v3357_v2 = vsel %vm2699_vm14, %v3334_v61, %v3336_v18 }
 0x6f2   : > { %3377 = vst [vmem:[%s5656_s22] sm:$0xff] %v3357_v2 }
 0x6f3   : > { %v3338_v3 = vpop.permute.xlu0 %3337 }
 0x6f4   : > { %v3358_v36 = vsel %vm2699_vm14, %v3336_v18, %v3338_v3  ;;  %3379 = vst.msk [vmem:[%s5656_s22 + $0x10] sm:$0xff] %vm2967_vm15, %v3338_v3  ;;  %v3352_v13 = vpop.permute.xlu1 %3351 }
 0x6f5   : > { %3378 = vst [vmem:[%s5656_s22 + $0x8] sm:$0xff] %v3358_v36 }
 0x6f7   : > { %v3346_v4 = vpop.permute.xlu0 %3345 }
 0x6f8   : > { %v3348_v57 = vpop.permute.xlu1 %3347 }
 0x6f9   : > { %v3361_v47 = vsel %vm2699_vm14, %v3346_v4, %v3348_v57 }
 0x6fa   : > { %3383 = vst [vmem:[%s5656_s22 + $0x30] sm:$0xff] %v3361_v47 }
 0x6fb   : > { %v3350_v6 = vpop.permute.xlu0 %3349 }
 0x6fc   : > { %v3362_v14 = vsel %vm2699_vm14, %v3348_v57, %v3350_v6  ;;  %3385 = vst.msk [vmem:[%s5656_s22 + $0x40] sm:$0xff] %vm2967_vm15, %v3350_v6  ;;  %v3356_v29 = vpop.permute.xlu1 %3355 }
 0x6fd   : > { %3384 = vst [vmem:[%s5656_s22 + $0x38] sm:$0xff] %v3362_v14  ;;  %3388 = vst.msk [vmem:[%s5656_s22 + $0x58] sm:$0xff] %vm2967_vm15, %v3356_v29 }
 0x6ff   : > { %v3354_v20 = vpop.permute.xlu0 %3353 }
 0x700   : > { %v3363_v33 = vsel %vm2699_vm14, %v3352_v13, %v3354_v20  ;;  %v3364_v58 = vsel %vm2699_vm14, %v3354_v20, %v3356_v29 }
 0x701   : > { %3386 = vst [vmem:[%s5656_s22 + $0x48] sm:$0xff] %v3363_v33  ;;  %3387 = vst [vmem:[%s5656_s22 + $0x50] sm:$0xff] %v3364_v58 }
 0x702 PF: > { %s21_s17 = sadd.s32 1, %s4458_s17  }
 0x703   : > { %p18_p4 = scmp.ge.s32.totalorder %s21_s17, 4  }
 0x705   :  { %20 = sbr.rel (!%p18_p4) target bundleno = 1 (0x1), region = 105 }

// kernel: residual_block.2
= control target key start
LH: loop header
LB: loop body
LE: loop exit
PB: predicated region body
PF: predicated region fallthrough
CT: control target
= control target key end

     0   :  { %s9165_s18 = smov 0   ;;  %s11143_s0 = inlined_call_operand.vmem [shape: f32[2,32,512], index: 0, kind: input, shape index: {}]   ;;  %s11144_s1 = inlined_call_operand.vmem [shape: f32[25,32,32], index: 1, kind: input, shape index: {}]   ;;  %s11145_s2 = inlined_call_operand.vmem [shape: f32[1,320], index: 2, kind: input, shape index: {}]   ;;  %s11146_s3 = inlined_call_operand.vmem [shape: f32[2,32,320], index: 3, kind: output, shape index: {0}]   ;;  %s11147_s4 = inlined_call_operand.vmem [shape: f32[2,32,1], index: 4, kind: output, shape index: {1}]   ;;  %s11148_s5 = inlined_call_operand.vmem [shape: f32[2,32,1], index: 5, kind: output, shape index: {2}]  }
   0x1 LB: > { %s6696_s19 = sadd.s32 4294967295, %s9108_s18   ;;  %p6700_p0 = scmp.ge.s32.totalorder %s9108_s18, 1  ;;  %s9108_s18 = sphi %s9165_s18, %s16_s18  }
   0x2   : > { %p192_p1 = scmp.lt.s32.totalorder %s9108_s18, 3 }
   0x4   : > { %p193_p2 = pnand %p6700_p0, %p192_p1 }
   0x6   : > { %196 = sbr.rel (%p193_p2) target bundleno = 856 (0x358), region = 32 }
   0xd   : > { %p230_p3 = scmp.lt.s32.totalorder %s6696_s19, 1  ;;  %s9110_s24 = smov 107   ;;  %v11156_v18 = vmov 0.0   ;;  %vm1726_vm0 = vcmask 875520   ;;  %vm311_vm1 = vcmask 1039360   ;;  %vm332_vm2 = vcmask 261120  }
   0xe   : > { %s9111_s25 = smov 127   ;;  %1823 = vmatprep.mubr.f32.mxu0 %v11156_v18  ;;  %409 = vmatprep.mubr.f32.mxu1 %v11156_v18  ;;  %s9113_s26 = smov 106   ;;  %v6776_v58 = vld [vmem:[%s11144_s1 + $0xc0] sm:$0xff]  ;;  %vm1974_vm3 = vcmask 867328   ;;  %vm2222_vm4 = vcmask 859136   ;;  %vm2470_vm5 = vcmask 850944  }
   0xf   : > { %s11187_s19 = smov (!%p230_p3, %s6696_s19), 1  ;;  %s9114_s27 = smov 105   ;;  %vm734_vm6 = vcmask 1031168   ;;  %vm2718_vm7 = vcmask 719872   ;;  %vm2966_vm8 = vcmask 711680   ;;  %vm982_vm9 = vcmask 1022976  }
  0x10   : > { %s7006_s20 = sshll.u32 %s11187_s19, 7  ;;  %s9115_s28 = smov 104   ;;  %vm3214_vm10 = vcmask 703488   ;;  %vm1230_vm11 = vcmask 1014784   ;;  %vm3462_vm12 = vcmask 695296   ;;  %vm3710_vm13 = vcmask 687104  }
  0x11   : > { %s9179_s23 = scalar_lea.vmem %s11143_s0, %s7006_s20  ;;  %s9116_s29 = smov 126   ;;  %vm1478_vm14 = vcmask 883712   ;;  %vm3958_vm15 = vcmask 556032  }
  0x12   : > { %v9182_v0 = vld [vmem:[%s9179_s23 + $0x8] sm:$0xff]  ;;  %v9185_v1 = vld [vmem:[%s9179_s23 + $0x10] sm:$0xff]  ;;  %v9188_v2 = vld [vmem:[%s9179_s23] sm:$0xff]  ;;  %s9117_s30 = smov 88   ;;  %s9118_s6 = smov 87  }
  0x13   : > { %v9192_v3 = vpack.i.bf16 %v9185_v1, %v9182_v0  ;;  %v9195_v4 = vld [vmem:[%s9179_s23 + $0x20] sm:$0xff]  ;;  %v9198_v5 = vld [vmem:[%s9179_s23 + $0x28] sm:$0xff]  ;;  %v9201_v6 = vld [vmem:[%s9179_s23 + $0x30] sm:$0xff]  ;;  %s9119_s7 = smov 125   ;;  %s9120_s8 = smov 86  }
  0x14   : > { %v9205_v7 = vpack.i.bf16 %v9195_v4, %v9188_v2  ;;  %v9208_v8 = vld [vmem:[%s9179_s23 + $0x48] sm:$0xff]  ;;  %v9211_v9 = vld [vmem:[%s9179_s23 + $0x50] sm:$0xff]  ;;  %v9216_v10 = vpack.i.bf16 %v9201_v6, %v9198_v5  ;;  %v9230_v14 = vld [vmem:[%s9179_s23 + $0x40] sm:$0xff]  ;;  %s9121_s9 = smov 124   ;;  %s9122_s12 = smov 85  }
  0x15   : > { %8282 = vrot.lane.b32.xlu0 %v9192_v3, %s9110_s24  ;;  %v9221_v11 = vpack.i.bf16 %v9211_v9, %v9208_v8  ;;  %v9224_v12 = vld [vmem:[%s9179_s23 + $0x68] sm:$0xff]  ;;  %v9227_v13 = vld [vmem:[%s9179_s23 + $0x70] sm:$0xff]  ;;  %v9233_v15 = vld [vmem:[%s9179_s23 + $0x60] sm:$0xff]  ;;  %s9123_s21 = smov 84   ;;  %s9125_s17 = smov 68  }
  0x16   : > { %8292 = vrot.lane.b32.xlu1 %v9205_v7, %s9110_s24  ;;  %v9238_v16 = vpack.i.bf16 %v9227_v13, %v9224_v12  ;;  %v9243_v17 = vpack.i.bf16 %v9233_v15, %v9230_v14  ;;  %s9127_s15 = smov 66   ;;  %s9129_s13 = smov 64  }
  0x17   : > { %s9130_s22 = smov 48   ;;  %s9132_s20 = smov 46  }
  0x19   : > { %8287 = vrot.lane.b32.xlu0 %v9216_v10, %s9110_s24 }
  0x1a   : > { %8297 = vrot.lane.b32.xlu1 %v9221_v11, %s9110_s24 }
  0x1d   : > { %8302 = vrot.lane.b32.xlu0 %v9238_v16, %s9110_s24 }
  0x1e   : > { %8307 = vrot.lane.b32.xlu1 %v9243_v17, %s9110_s24 }
  0x21   : > { %8312 = vrot.lane.b32.xlu0 %v9192_v3, %s9111_s25 }
  0x22   : > { %8317 = vrot.lane.b32.xlu1 %v9216_v10, %s9111_s25 }
  0x25   : > { %8322 = vrot.lane.b32.xlu0 %v9205_v7, %s9111_s25 }
  0x26   : > { %8327 = vrot.lane.b32.xlu1 %v9221_v11, %s9111_s25 }
  0x29   : > { %8332 = vrot.lane.b32.xlu0 %v9238_v16, %s9111_s25 }
  0x2a   : > { %8337 = vrot.lane.b32.xlu1 %v9243_v17, %s9111_s25 }
  0x2d   : > { %8342 = vrot.lane.b32.xlu0 %v9192_v3, %s9113_s26 }
  0x2e   : > { %8347 = vrot.lane.b32.xlu1 %v9216_v10, %s9113_s26 }
  0x31   : > { %8352 = vrot.lane.b32.xlu0 %v9205_v7, %s9113_s26 }
  0x32   : > { %8357 = vrot.lane.b32.xlu1 %v9221_v11, %s9113_s26 }
  0x35   : > { %8362 = vrot.lane.b32.xlu0 %v9238_v16, %s9113_s26 }
  0x36   : > { %8367 = vrot.lane.b32.xlu1 %v9243_v17, %s9113_s26 }
  0x39   : > { %8372 = vrot.lane.b32.xlu0 %v9192_v3, %s9114_s27 }
  0x3a   : > { %8377 = vrot.lane.b32.xlu1 %v9216_v10, %s9114_s27 }
  0x3d   : > { %8382 = vrot.lane.b32.xlu0 %v9205_v7, %s9114_s27 }
  0x3e   : > { %8387 = vrot.lane.b32.xlu1 %v9221_v11, %s9114_s27 }
  0x41   : > { %8392 = vrot.lane.b32.xlu0 %v9238_v16, %s9114_s27 }
  0x42   : > { %8397 = vrot.lane.b32.xlu1 %v9243_v17, %s9114_s27  ;;  %s9124_s27 = smov 108  }
  0x45   : > { %8402 = vrot.lane.b32.xlu0 %v9192_v3, %s9115_s28 }
  0x46   : > { %8407 = vrot.lane.b32.xlu1 %v9216_v10, %s9115_s28 }
  0x49   : > { %8412 = vrot.lane.b32.xlu0 %v9205_v7, %s9115_s28 }
  0x4a   : > { %8417 = vrot.lane.b32.xlu1 %v9221_v11, %s9115_s28 }
  0x4d   : > { %8422 = vrot.lane.b32.xlu0 %v9238_v16, %s9115_s28 }
  0x4e   : > { %8427 = vrot.lane.b32.xlu1 %v9243_v17, %s9115_s28 }
  0x51   : > { %8432 = vrot.lane.b32.xlu0 %v9192_v3, %s9116_s29 }
  0x52   : > { %8437 = vrot.lane.b32.xlu1 %v9216_v10, %s9116_s29 }
  0x55   : > { %8442 = vrot.lane.b32.xlu0 %v9205_v7, %s9116_s29 }
  0x56   : > { %8447 = vrot.lane.b32.xlu1 %v9221_v11, %s9116_s29 }
  0x59   : > { %8452 = vrot.lane.b32.xlu0 %v9238_v16, %s9116_s29 }
  0x5a   : > { %8457 = vrot.lane.b32.xlu1 %v9243_v17, %s9116_s29  ;;  %s9128_s29 = smov 65  }
  0x5d   : > { %8462 = vrot.lane.b32.xlu0 %v9192_v3, %s9117_s30 }
  0x5e   : > { %8467 = vrot.lane.b32.xlu1 %v9216_v10, %s9117_s30 }
  0x61   : > { %8472 = vrot.lane.b32.xlu0 %v9205_v7, %s9117_s30 }
  0x62   : > { %8477 = vrot.lane.b32.xlu1 %v9221_v11, %s9117_s30 }
  0x65   : > { %8482 = vrot.lane.b32.xlu0 %v9238_v16, %s9117_s30 }
  0x66   : > { %8487 = vrot.lane.b32.xlu1 %v9243_v17, %s9117_s30  ;;  %s9134_s30 = smov 44  }
  0x69   : > { %8492 = vrot.lane.b32.xlu0 %v9192_v3, %s9118_s6 }
  0x6a   : > { %8497 = vrot.lane.b32.xlu1 %v9216_v10, %s9118_s6 }
  0x6d   : > { %8502 = vrot.lane.b32.xlu0 %v9205_v7, %s9118_s6 }
  0x6e   : > { %8507 = vrot.lane.b32.xlu1 %v9192_v3, %s9119_s7 }
  0x71   : > { %8512 = vrot.lane.b32.xlu0 %v9216_v10, %s9119_s7 }
  0x72   : > { %8517 = vrot.lane.b32.xlu1 %v9205_v7, %s9119_s7 }
  0x75   : > { %8522 = vrot.lane.b32.xlu0 %v9221_v11, %s9118_s6 }
  0x76   : > { %8527 = vrot.lane.b32.xlu1 %v9238_v16, %s9118_s6 }
  0x79   : > { %8532 = vrot.lane.b32.xlu0 %v9243_v17, %s9118_s6  ;;  %s9126_s6 = smov 67  }
  0x7a   : > { %8537 = vrot.lane.b32.xlu1 %v9221_v11, %s9119_s7 }
  0x7d   : > { %8542 = vrot.lane.b32.xlu0 %v9238_v16, %s9119_s7 }
  0x7e   : > { %8547 = vrot.lane.b32.xlu1 %v9243_v17, %s9119_s7 }
  0x81   : > { %8552 = vrot.lane.b32.xlu0 %v9192_v3, %s9120_s8 }
  0x82   : > { %8557 = vrot.lane.b32.xlu1 %v9216_v10, %s9120_s8 }
  0x85   : > { %8562 = vrot.lane.b32.xlu0 %v9205_v7, %s9120_s8 }
  0x86   : > { %8567 = vrot.lane.b32.xlu1 %v9221_v11, %s9120_s8 }
  0x87   : > { %v8283_v19 = vpop.permute.xlu0 %8282 }
  0x88   : > { %v8293_v20 = vpop.permute.xlu1 %8292  ;;  %v8285_v21 = vunpack.i.h.bf16 %v8283_v19  ;;  %v8284_v22 = vunpack.i.l.bf16 %v8283_v19 }
  0x89   : > { %v8294_v23 = vunpack.i.l.bf16 %v8293_v20  ;;  %8572 = vrot.lane.b32.xlu0 %v9238_v16, %s9120_s8  ;;  %v8295_v25 = vunpack.i.h.bf16 %v8293_v20 }
  0x8a   : > { %8577 = vrot.lane.b32.xlu1 %v9243_v17, %s9120_s8  ;;  %v1728_v30 = vsel %vm1726_vm0, %v8284_v22, %v8285_v21  ;;  %s8247_s8 = smul.u32 96, %s11187_s19 }
  0x8b   : > { %v8288_v24 = vpop.permute.xlu0 %8287  ;;  %v1727_v31 = vsel %vm1726_vm0, %v8294_v23, %v8284_v22 }
  0x8c   : > { %v8290_v26 = vunpack.i.h.bf16 %v8288_v24  ;;  %v8289_v27 = vunpack.i.l.bf16 %v8288_v24  ;;  %v8298_v28 = vpop.permute.xlu1 %8297  ;;  %s11099_s14 = scalar_lea.vmem %s11146_s3, %s8247_s8 }
  0x8d   : > { %v8300_v29 = vunpack.i.h.bf16 %v8298_v28  ;;  %8582 = vrot.lane.b32.xlu0 %v9192_v3, %s9121_s9  ;;  %v8299_v32 = vunpack.i.l.bf16 %v8298_v28 }
  0x8e   : > { %8587 = vrot.lane.b32.xlu1 %v9216_v10, %s9121_s9  ;;  %v1730_v33 = vsel %vm1726_vm0, %v8289_v27, %v8290_v26  ;;  %v1729_v34 = vsel %vm1726_vm0, %v8295_v25, %v8289_v27  ;;  %v9311_v35 = vpack.c.bf16 %v8290_v26, %v8285_v21  ;;  %v6777_v26 = vld [vmem:[%s11144_s1 + $0xc8] sm:$0xff] }
  0x8f   : > { %v8303_v36 = vpop.permute.xlu0 %8302  ;;  %v7655_v37 = vpack.c.bf16 %v1730_v33, %v1728_v30  ;;  %v7657_v38 = vpack.c.bf16 %v1729_v34, %v1727_v31  ;;  %v1732_v44 = vsel %vm1726_vm0, %v8299_v32, %v8300_v29 }
  0x90   : > { %v8305_v39 = vunpack.i.h.bf16 %v8303_v36  ;;  %v8304_v40 = vunpack.i.l.bf16 %v8303_v36  ;;  %v8308_v41 = vpop.permute.xlu1 %8307 }
  0x91   : > { %v8310_v42 = vunpack.i.h.bf16 %v8308_v41  ;;  %v8309_v43 = vunpack.i.l.bf16 %v8308_v41  ;;  %7656 = vmatprep.subr.bf16.mxu0 %v7655_v37  ;;  %8592 = vrot.lane.b32.xlu0 %v9205_v7, %s9121_s9 }
  0x92   : > { %8597 = vrot.lane.b32.xlu1 %v9221_v11, %s9121_s9  ;;  %7658 = vmatpush1.bf16.msra.mxu0 %v7657_v38  ;;  %v1734_v45 = vsel %vm1726_vm0, %v8304_v40, %v8305_v39  ;;  %v9319_v46 = vpack.c.bf16 %v8305_v39, %v8300_v29 }
  0x93   : > { %v9321_v47 = vpop.permute.xlu0 %8312  ;;  %v7659_v48 = vpack.c.bf16 %v1734_v45, %v1732_v44  ;;  %v1731_v49 = vsel %vm1726_vm0, %v8309_v43, %v8299_v32  ;;  %v1733_v50 = vsel %vm1726_vm0, %v8310_v42, %v8304_v40  ;;  %v6778_v43 = vld [vmem:[%s11144_s1 + $0xd0] sm:$0xff]  ;;  %vm4206_vm0 = vcmask 547840  }
  0x94   : > { %v8315_v51 = vunpack.i.h.bf16 %v9321_v47  ;;  %v8314_v52 = vunpack.i.l.bf16 %v9321_v47  ;;  %v8318_v53 = vpop.permute.xlu1 %8317  ;;  %v7661_v54 = vpack.c.bf16 %v1733_v50, %v1731_v49 }
  0x95   : > { %v8320_v55 = vunpack.i.h.bf16 %v8318_v53  ;;  %v8319_v56 = vunpack.i.l.bf16 %v8318_v53  ;;  %8602 = vrot.lane.b32.xlu0 %v9238_v16, %s9121_s9  ;;  %7660 = vmatprep.subr.bf16.mxu0 %v7659_v48  ;;  %v9367_v48 = vld [vmem:[%s11144_s1 + $0x20] sm:$0xff] }
  0x96   : > { %8607 = vrot.lane.b32.xlu1 %v9243_v17, %s9121_s9  ;;  %7662 = vmatpush1.bf16.msra.mxu0 %v7661_v54  ;;  %v313_v57 = vsel %vm311_vm1, %v8314_v52, %v8315_v51  ;;  %s9131_s9 = smov 47  }
  0x97   : > { %v8323_v59 = vpop.permute.xlu0 %8322  ;;  %v315_v60 = vsel %vm311_vm1, %v8319_v56, %v8320_v55  ;;  %v7567_v47 = vpack.c.bf16 %v8320_v55, %v8315_v51 }
  0x98   : > { %v8325_v61 = vunpack.i.h.bf16 %v8323_v59  ;;  %v8324_v62 = vunpack.i.l.bf16 %v8323_v59  ;;  %v8328_v63 = vpop.permute.xlu1 %8327  ;;  %v7559_v19 = vpack.c.bf16 %v315_v60, %v313_v57 }
  0x99   : > { %8612 = vrot.lane.b32.xlu0 %v9192_v3, %s9122_s12  ;;  %6780 = vmatmul.mubr.msk.f32.vlgmr.msra.gmra.mrb[0].mxu0 %vm332_vm2, %v6776_v58  ;;  %v8330_v20 = vunpack.i.h.bf16 %v8328_v63  ;;  %v8329_v21 = vunpack.i.l.bf16 %v8328_v63  ;;  %v6779_v58 = vld [vmem:[%s11144_s1 + $0xd8] sm:$0xff]  ;;  %v9389_v63 = vld [vmem:[%s11144_s1 + $0x28] sm:$0xff] }
  0x9a   : > { %8617 = vrot.lane.b32.xlu1 %v9216_v10, %s9122_s12  ;;  %7560 = vmatprep.subr.bf16.mxu1 %v7559_v19  ;;  %v312_v22 = vsel %vm311_vm1, %v8324_v62, %v8314_v52  ;;  %v314_v23 = vsel %vm311_vm1, %v8325_v61, %v8319_v56 }
  0x9b   : > { %v8333_v24 = vpop.permute.xlu0 %8332  ;;  %v7561_v25 = vpack.c.bf16 %v314_v23, %v312_v22  ;;  %1829 = vmatprep.mubr.f32.mxu0 %v11156_v18  ;;  %v317_v32 = vsel %vm311_vm1, %v8329_v21, %v8330_v20 }
  0x9c   : > { %v8335_v27 = vunpack.i.h.bf16 %v8333_v24  ;;  %v8334_v28 = vunpack.i.l.bf16 %v8333_v24  ;;  %v8338_v29 = vpop.permute.xlu1 %8337  ;;  %v7575_v24 = vpack.c.bf16 %v9198_v5, %v9182_v0 }
  0x9d   : > { %v8340_v30 = vunpack.i.h.bf16 %v8338_v29  ;;  %v8339_v31 = vunpack.i.l.bf16 %v8338_v29  ;;  %8622 = vrot.lane.b32.xlu0 %v9205_v7, %s9122_s12  ;;  %7562 = vmatpush1.bf16.msra.mxu1 %v7561_v25 }
  0x9e   : > { %8627 = vrot.lane.b32.xlu1 %v9221_v11, %s9122_s12  ;;  %v319_v33 = vsel %vm311_vm1, %v8334_v28, %v8335_v27  ;;  %6781 = vmatmul.mubr.msk.f32.gmra.mrb[2].mxu0 %vm332_vm2, %v6777_v26  ;;  %v7571_v57 = vpack.c.bf16 %v8335_v27, %v8330_v20  ;;  %v9404_v27 = vld [vmem:[%s11144_s1 + $0x30] sm:$0xff] }
  0x9f   : > { %v8343_v34 = vpop.permute.xlu0 %8342  ;;  %v7563_v36 = vpack.c.bf16 %v319_v33, %v317_v32  ;;  %v316_v37 = vsel %vm311_vm1, %v8339_v31, %v8329_v21  ;;  %v318_v38 = vsel %vm311_vm1, %v8340_v30, %v8334_v28  ;;  %1835 = vmatprep.mubr.f32.mxu0 %v11156_v18  ;;  %vm4454_vm1 = vcmask 539648  }
  0xa0   : > { %v8345_v39 = vunpack.i.h.bf16 %v8343_v34  ;;  %v8344_v40 = vunpack.i.l.bf16 %v8343_v34  ;;  %v8348_v41 = vpop.permute.xlu1 %8347  ;;  %v7565_v42 = vpack.c.bf16 %v318_v38, %v316_v37 }
  0xa1   : > { %v8350_v44 = vunpack.i.h.bf16 %v8348_v41  ;;  %v8349_v45 = vunpack.i.l.bf16 %v8348_v41  ;;  %8632 = vrot.lane.b32.xlu0 %v9238_v16, %s9122_s12  ;;  %7564 = vmatprep.subr.bf16.mxu1 %v7563_v36 }
  0xa2   : > { %8637 = vrot.lane.b32.xlu1 %v9243_v17, %s9122_s12  ;;  %7566 = vmatpush1.bf16.msra.mxu1 %v7565_v42  ;;  %v1976_v49 = vsel %vm1974_vm3, %v8344_v40, %v8345_v39  ;;  %s9133_s12 = smov 45  }
  0xa3   : > { %v8353_v50 = vpop.permute.xlu0 %8352  ;;  %7568 = vmatprep.subr.bf16.mxu1 %v7567_v47  ;;  %v1978_v52 = vsel %vm1974_vm3, %v8349_v45, %v8350_v44  ;;  %6782 = vmatmul.mubr.msk.f32.gmra.mrb[4].mxu0 %vm332_vm2, %v6778_v43  ;;  %v9373_v56 = vpack.c.bf16 %v8350_v44, %v8345_v39  ;;  %v6788_v43 = vld [vmem:[%s11144_s1 + $0xe0] sm:$0xff] }
  0xa4   : > { %v8355_v53 = vunpack.i.h.bf16 %v8353_v50  ;;  %v8354_v54 = vunpack.i.l.bf16 %v8353_v50  ;;  %v8358_v51 = vpop.permute.xlu1 %8357  ;;  %v7671_v55 = vpack.c.bf16 %v1978_v52, %v1976_v49  ;;  %1841 = vmatprep.mubr.f32.mxu0 %v11156_v18 }
  0xa5   : > { %8642 = vrot.lane.b32.xlu0 %v9192_v3, %s9123_s21  ;;  %6712 = vmatmul.mubr.msk.f32.vlgmr.msra.gmra.mrb[0].mxu1 %vm332_vm2, %v9367_v48  ;;  %v8360_v61 = vunpack.i.h.bf16 %v8358_v51  ;;  %v8359_v62 = vunpack.i.l.bf16 %v8358_v51 }
  0xa6   : > { %v1975_v59 = vsel %vm1974_vm3, %v8354_v54, %v8344_v40  ;;  %v1977_v60 = vsel %vm1974_vm3, %v8355_v53, %v8349_v45  ;;  %8647 = vrot.lane.b32.xlu1 %v9216_v10, %s9123_s21  ;;  %7672 = vmatprep.subr.bf16.mxu0 %v7671_v55  ;;  %v6711_v40 = vld [vmem:[%s11144_s1 + $0x38] sm:$0xff] }
  0xa7   : > { %7570 = vmatpush3.bf16.msra.mxu1 %v7567_v47  ;;  %v8363_v19 = vpop.permute.xlu0 %8362  ;;  %415 = vmatprep.mubr.f32.mxu1 %v11156_v18  ;;  %v7673_v20 = vpack.c.bf16 %v1977_v60, %v1975_v59  ;;  %v1980_v0 = vsel %vm1974_vm3, %v8359_v62, %v8360_v61  ;;  %v7577_v60 = vpack.c.bf16 %v9195_v4, %v9188_v2 }
  0xa8   : > { %v8365_v21 = vunpack.i.h.bf16 %v8363_v19  ;;  %v8364_v22 = vunpack.i.l.bf16 %v8363_v19  ;;  %v8368_v23 = vpop.permute.xlu1 %8367  ;;  %7572 = vmatprep.subr.bf16.mxu1 %v7571_v57  ;;  %6783 = vmatmul.mubr.msk.f32.gmra.mrb[6].mxu0 %vm332_vm2, %v6779_v58  ;;  %v6789_v58 = vld [vmem:[%s11144_s1 + $0xe8] sm:$0xff] }
  0xa9   : > { %v8370_v25 = vunpack.i.h.bf16 %v8368_v23  ;;  %v8369_v26 = vunpack.i.l.bf16 %v8368_v23  ;;  %8652 = vrot.lane.b32.xlu0 %v9205_v7, %s9123_s21  ;;  %6713 = vmatmul.mubr.msk.f32.gmra.mrb[2].mxu1 %vm332_vm2, %v9389_v63 }
  0xaa   : > { %8657 = vrot.lane.b32.xlu1 %v9192_v3, %s9124_s27  ;;  %7674 = vmatpush1.bf16.msra.mxu0 %v7673_v20  ;;  %v1982_v5 = vsel %vm1974_vm3, %v8364_v22, %v8365_v21  ;;  %v9408_v28 = vpack.c.bf16 %v8365_v21, %v8360_v61 }
  0xab   : > { %v1981_v29 = vsel %vm1974_vm3, %v8370_v25, %v8364_v22  ;;  %v1979_v30 = vsel %vm1974_vm3, %v8369_v26, %v8359_v62  ;;  %7574 = vmatpush3.bf16.msra.mxu1 %v7571_v57  ;;  %v8373_v31 = vpop.permute.xlu0 %8372  ;;  %421 = vmatprep.mubr.f32.mxu1 %v11156_v18  ;;  %v7675_v32 = vpack.c.bf16 %v1982_v5, %v1980_v0  ;;  %v6790_v0 = vld [vmem:[%s11144_s1 + $0xf0] sm:$0xff]  ;;  %vm4702_vm3 = vcmask 531456  }
  0xac   : > { %v8375_v33 = vunpack.i.h.bf16 %v8373_v31  ;;  %v8374_v34 = vunpack.i.l.bf16 %v8373_v31  ;;  %v8378_v36 = vpop.permute.xlu1 %8377  ;;  %v7677_v37 = vpack.c.bf16 %v1981_v29, %v1979_v30  ;;  %2071 = vmatprep.mubr.f32.mxu0 %v11156_v18  ;;  %7576 = vmatprep.subr.bf16.mxu1 %v7575_v24  ;;  %v7581_v5 = vpack.c.bf16 %v9233_v15, %v9230_v14 }
  0xad   : > { %v8380_v38 = vunpack.i.h.bf16 %v8378_v36  ;;  %v8379_v39 = vunpack.i.l.bf16 %v8378_v36  ;;  %8662 = vrot.lane.b32.xlu0 %v9216_v10, %s9124_s27  ;;  %6714 = vmatmul.mubr.msk.f32.gmra.mrb[4].mxu1 %vm332_vm2, %v9404_v27 }
  0xae   : > { %8667 = vrot.lane.b32.xlu1 %v9205_v7, %s9124_s27  ;;  %7676 = vmatprep.subr.bf16.mxu0 %v7675_v32  ;;  %v2224_v41 = vsel %vm2222_vm4, %v8374_v34, %v8375_v33 }
  0xaf   : > { %7678 = vmatpush1.bf16.msra.mxu0 %v7677_v37  ;;  %v8383_v42 = vpop.permute.xlu0 %8382  ;;  %427 = vmatprep.mubr.f32.mxu1 %v11156_v18  ;;  %v2226_v44 = vsel %vm2222_vm4, %v8379_v39, %v8380_v38  ;;  %v9429_v52 = vpack.c.bf16 %v8380_v38, %v8375_v33  ;;  %v9483_v37 = vld [vmem:[%s11144_s1] sm:$0xff]  ;;  %v6791_v38 = vld [vmem:[%s11144_s1 + $0xf8] sm:$0xff] }
  0xb0   : > { %v8385_v45 = vunpack.i.h.bf16 %v8383_v42  ;;  %v8384_v47 = vunpack.i.l.bf16 %v8383_v42  ;;  %v8388_v49 = vpop.permute.xlu1 %8387  ;;  %v7687_v50 = vpack.c.bf16 %v2226_v44, %v2224_v41 }
  0xb1   : > { %8672 = vrot.lane.b32.xlu0 %v9221_v11, %s9123_s21  ;;  %6715 = vmatmul.mubr.msk.f32.gmra.mrb[6].mxu1 %vm332_vm2, %v6711_v40  ;;  %v8390_v51 = vunpack.i.h.bf16 %v8388_v49  ;;  %v8389_v55 = vunpack.i.l.bf16 %v8388_v49  ;;  %v9505_v49 = vld [vmem:[%s11144_s1 + $0x8] sm:$0xff] }
  0xb2   : > { %v2223_v53 = vsel %vm2222_vm4, %v8384_v47, %v8374_v34  ;;  %v2225_v54 = vsel %vm2222_vm4, %v8385_v45, %v8379_v39  ;;  %8677 = vrot.lane.b32.xlu1 %v9238_v16, %s9123_s21  ;;  %6792 = vmatmul.mubr.msk.f32.vlgmr.msra.gmra.mrb[0].mxu0 %vm332_vm2, %v6788_v43 }
  0xb3   : > { %7688 = vmatprep.subr.bf16.mxu0 %v7687_v50  ;;  %v8393_v57 = vpop.permute.xlu0 %8392  ;;  %7217 = vmatprep.mubr.msk.f32.mxu1 %vm332_vm2, %v9367_v48  ;;  %v7689_v59 = vpack.c.bf16 %v2225_v54, %v2223_v53  ;;  %v7579_v48 = vpack.c.bf16 %v9224_v12, %v9208_v8  ;;  %v2228_v2 = vsel %vm2222_vm4, %v8389_v55, %v8390_v51  ;;  %v6800_v50 = vld [vmem:[%s11144_s1 + $0x100] sm:$0xff] }
  0xb4   : > { %v8395_v61 = vunpack.i.h.bf16 %v8393_v57  ;;  %v8394_v62 = vunpack.i.l.bf16 %v8393_v57  ;;  %v8398_v19 = vpop.permute.xlu1 %8397  ;;  %2077 = vmatprep.mubr.f32.mxu0 %v11156_v18 }
  0xb5   : > { %v8400_v20 = vunpack.i.h.bf16 %v8398_v19  ;;  %v8399_v21 = vunpack.i.l.bf16 %v8398_v19  ;;  %8682 = vrot.lane.b32.xlu0 %v9243_v17, %s9123_s21  ;;  %7218 = vmatmul.mubr.msk.f32.vlgmr.msra.gmra.mrb[8].mxu1 %vm332_vm2, %v9389_v63 }
  0xb6   : > { %8687 = vrot.lane.b32.xlu1 %v9221_v11, %s9124_s27  ;;  %6793 = vmatmul.mubr.msk.f32.gmra.mrb[2].mxu0 %vm332_vm2, %v6789_v58  ;;  %v2230_v4 = vsel %vm2222_vm4, %v8394_v62, %v8395_v61  ;;  %v9458_v22 = vpack.c.bf16 %v8395_v61, %v8390_v51 }
  0xb7   : > { %v2229_v23 = vsel %vm2222_vm4, %v8400_v20, %v8394_v62  ;;  %v2227_v24 = vsel %vm2222_vm4, %v8399_v21, %v8389_v55  ;;  %7690 = vmatpush1.bf16.msra.mxu0 %v7689_v59  ;;  %7578 = vmatpush1.bf16.msra.mxu1 %v7577_v60  ;;  %v8403_v63 = vpop.permute.xlu0 %8402  ;;  %v7691_v25 = vpack.c.bf16 %v2230_v4, %v2228_v2  ;;  %v268_v21 = vld [vmem:[%s11144_s1 + $0x10] sm:$0xff]  ;;  %vm4950_vm4 = vcmask 523264  }
  0xb8   : > { %v8405_v8 = vunpack.i.h.bf16 %v8403_v63  ;;  %v8404_v12 = vunpack.i.l.bf16 %v8403_v63  ;;  %v8408_v26 = vpop.permute.xlu1 %8407  ;;  %7220 = vmatprep.mubr.msk.f32.mxu1 %vm332_vm2, %v9404_v27  ;;  %2083 = vmatprep.mubr.f32.mxu0 %v11156_v18  ;;  %v7693_v29 = vpack.c.bf16 %v2229_v23, %v2227_v24  ;;  %v7587_v55 = vpack.c.bf16 %v9227_v13, %v9211_v9 }
  0xb9   : > { %v8410_v30 = vunpack.i.h.bf16 %v8408_v26  ;;  %v8409_v31 = vunpack.i.l.bf16 %v8408_v26  ;;  %8692 = vrot.lane.b32.xlu0 %v9238_v16, %s9124_s27  ;;  %7221 = vmatmul.mubr.msk.f32.gmra.mrb[10].mxu1 %vm332_vm2, %v6711_v40  ;;  %v7583_v40 = vpack.c.bf16 %v9201_v6, %v9185_v1  ;;  %v269_v26 = vld [vmem:[%s11144_s1 + $0x18] sm:$0xff] }
  0xba   : > { %8697 = vrot.lane.b32.xlu1 %v9243_v17, %s9124_s27  ;;  %7580 = vmatprep.subr.bf16.mxu1 %v7579_v48  ;;  %v2472_v27 = vsel %vm2470_vm5, %v8404_v12, %v8405_v8 }
  0xbb   : > { %6794 = vmatmul.mubr.msk.f32.gmra.mrb[4].mxu0 %vm332_vm2, %v6790_v0  ;;  %7692 = vmatprep.subr.bf16.mxu0 %v7691_v25  ;;  %v8413_v32 = vpop.permute.xlu0 %8412  ;;  %v2474_v14 = vsel %vm2470_vm5, %v8409_v31, %v8410_v30  ;;  %v9478_v15 = vpack.c.bf16 %v8410_v30, %v8405_v8 }
  0xbc   : > { %7582 = vmatpush1.bf16.msra.mxu1 %v7581_v5  ;;  %7694 = vmatpush1.bf16.msra.mxu0 %v7693_v29  ;;  %v8415_v33 = vunpack.i.h.bf16 %v8413_v32  ;;  %v8414_v34 = vunpack.i.l.bf16 %v8413_v32  ;;  %v8418_v36 = vpop.permute.xlu1 %8417  ;;  %v7703_v39 = vpack.c.bf16 %v2474_v14, %v2472_v27  ;;  %v6801_v5 = vld [vmem:[%s11144_s1 + $0x108] sm:$0xff] }
  0xbd   : > { %595 = vmatprep.mubr.f32.mxu1 %v11156_v18  ;;  %2089 = vmatprep.mubr.f32.mxu0 %v11156_v18  ;;  %v8420_v43 = vunpack.i.h.bf16 %v8418_v36  ;;  %v8419_v44 = vunpack.i.l.bf16 %v8418_v36 }
  0xbe   : > { %v2471_v41 = vsel %vm2470_vm5, %v8414_v34, %v8404_v12  ;;  %v2473_v42 = vsel %vm2470_vm5, %v8415_v33, %v8409_v31  ;;  %8702 = vrot.lane.b32.xlu0 %v9192_v3, %s9125_s17  ;;  %8707 = vrot.lane.b32.xlu1 %v9216_v10, %s9125_s17 }
  0xbf   : > { %6720 = vmatmul.mubr.msk.f32.vlgmr.msra.gmra.mrb[0].mxu1 %vm332_vm2, %v9483_v37  ;;  %6795 = vmatmul.mubr.msk.f32.gmra.mrb[6].mxu0 %vm332_vm2, %v6791_v38  ;;  %v8423_v45 = vpop.permute.xlu0 %8422  ;;  %v7705_v53 = vpack.c.bf16 %v2473_v42, %v2471_v41  ;;  %v2476_v57 = vsel %vm2470_vm5, %v8419_v44, %v8420_v43 }
  0xc0   : > { %7704 = vmatprep.subr.bf16.mxu0 %v7703_v39  ;;  %v8425_v1 = vunpack.i.h.bf16 %v8423_v45  ;;  %v8424_v6 = vunpack.i.l.bf16 %v8423_v45  ;;  %v8428_v47 = vpop.permute.xlu1 %8427  ;;  %601 = vmatprep.mubr.f32.mxu1 %v11156_v18 }
  0xc1   : > { %v8430_v54 = vunpack.i.h.bf16 %v8428_v47  ;;  %v8429_v51 = vunpack.i.l.bf16 %v8428_v47  ;;  %2319 = vmatprep.mubr.f32.mxu0 %v11156_v18  ;;  %7584 = vmatprep.subr.bf16.mxu1 %v7583_v40  ;;  %v6803_v47 = vld [vmem:[%s11144_s1 + $0x118] sm:$0xff] }
  0xc2   : > { %8712 = vrot.lane.b32.xlu0 %v9205_v7, %s9125_s17  ;;  %8717 = vrot.lane.b32.xlu1 %v9221_v11, %s9125_s17  ;;  %v2478_v58 = vsel %vm2470_vm5, %v8424_v6, %v8425_v1  ;;  %v9519_v59 = vpack.c.bf16 %v8425_v1, %v8420_v43 }
  0xc3   : > { %v2477_v60 = vsel %vm2470_vm5, %v8430_v54, %v8424_v6  ;;  %v2475_v61 = vsel %vm2470_vm5, %v8429_v51, %v8419_v44  ;;  %6721 = vmatmul.mubr.msk.f32.gmra.mrb[2].mxu1 %vm332_vm2, %v9505_v49  ;;  %6804 = vmatmul.mubr.msk.f32.vlgmr.msra.gmra.mrb[0].mxu0 %vm332_vm2, %v6800_v50  ;;  %v9526_v9 = vpop.permute.xlu0 %8432  ;;  %v7707_v13 = vpack.c.bf16 %v2478_v58, %v2476_v57  ;;  %v9052_v50 = vld [vmem:[%s9179_s23 + $0x10] sm:$0xff]  ;;  %v9053_v54 = vld [vmem:[%s9179_s23 + $0x28] sm:$0xff]  ;;  %vm5210_vm5 = vcmask 392192  }
  0xc4   : > { %7706 = vmatpush1.bf16.msra.mxu0 %v7705_v53  ;;  %v8435_v62 = vunpack.i.h.bf16 %v9526_v9  ;;  %v8434_v19 = vunpack.i.l.bf16 %v9526_v9  ;;  %v9530_v20 = vpop.permute.xlu1 %8437  ;;  %607 = vmatprep.mubr.f32.mxu1 %v11156_v18  ;;  %v7709_v48 = vpack.c.bf16 %v2477_v60, %v2475_v61  ;;  %v9054_v51 = vld [vmem:[%s9179_s23 + $0x30] sm:$0xff]  ;;  %v6812_v9 = vld [vmem:[%s11144_s1 + $0x120] sm:$0xff] }
  0xc5   : > { %v8440_v2 = vunpack.i.h.bf16 %v9530_v20  ;;  %v8439_v4 = vunpack.i.l.bf16 %v9530_v20  ;;  %7586 = vmatpush3.bf16.msra.mxu1 %v7583_v40  ;;  %7708 = vmatprep.subr.bf16.mxu0 %v7707_v13  ;;  %v9055_v20 = vld [vmem:[%s9179_s23] sm:$0xff] }
  0xc6   : > { %8722 = vrot.lane.b32.xlu0 %v9238_v16, %s9125_s17  ;;  %8727 = vrot.lane.b32.xlu1 %v9243_v17, %s9125_s17  ;;  %v736_v23 = vsel %vm734_vm6, %v8434_v19, %v8435_v62 }
  0xc7   : > { %6722 = vmatmul.mubr.msk.f32.gmra.mrb[4].mxu1 %vm332_vm2, %v268_v21  ;;  %v8443_v24 = vpop.permute.xlu0 %8442  ;;  %7588 = vmatprep.subr.bf16.mxu1 %v7587_v55  ;;  %v738_v63 = vsel %vm734_vm6, %v8439_v4, %v8440_v2 }
  0xc8   : > { %7710 = vmatpush1.bf16.msra.mxu0 %v7709_v48  ;;  %v8445_v25 = vunpack.i.h.bf16 %v8443_v24  ;;  %v8444_v8 = vunpack.i.l.bf16 %v8443_v24  ;;  %v9549_v12 = vpop.permute.xlu1 %8447  ;;  %613 = vmatprep.mubr.f32.mxu1 %v11156_v18  ;;  %v7591_v0 = vpack.c.bf16 %v738_v63, %v736_v23  ;;  %v9056_v48 = vld [vmem:[%s9179_s23 + $0x20] sm:$0xff] }
  0xc9   : > { %7590 = vmatpush3.bf16.msra.mxu1 %v7587_v55  ;;  %2325 = vmatprep.mubr.f32.mxu0 %v11156_v18  ;;  %v8450_v31 = vunpack.i.h.bf16 %v9549_v12  ;;  %v8449_v27 = vunpack.i.l.bf16 %v9549_v12  ;;  %v9609_v55 = vpack.i.bf16 %v9054_v51, %v9053_v54 }
  0xca   : > { %v735_v29 = vsel %vm734_vm6, %v8444_v8, %v8434_v19  ;;  %v737_v30 = vsel %vm734_vm6, %v8445_v25, %v8439_v4  ;;  %8732 = vrot.lane.b32.xlu0 %v9192_v3, %s9126_s6  ;;  %8737 = vrot.lane.b32.xlu1 %v9216_v10, %s9126_s6  ;;  %v6802_v10 = vld [vmem:[%s11144_s1 + $0x110] sm:$0xff]  ;;  %v9057_v8 = vld [vmem:[%s9179_s23 + $0x48] sm:$0xff] }
  0xcb   : > { %6723 = vmatmul.mubr.msk.f32.gmra.mrb[6].mxu1 %vm332_vm2, %v269_v26  ;;  %7592 = vmatprep.subr.bf16.mxu1 %v7591_v0  ;;  %v9568_v32 = vpop.permute.xlu0 %8452  ;;  %v7593_v36 = vpack.c.bf16 %v737_v30, %v735_v29  ;;  %v740_v39 = vsel %vm734_vm6, %v8449_v27, %v8450_v31 }
  0xcc   : > { %6805 = vmatmul.mubr.msk.f32.gmra.mrb[2].mxu0 %vm332_vm2, %v6801_v5  ;;  %v8455_v14 = vunpack.i.h.bf16 %v9568_v32  ;;  %v8454_v33 = vunpack.i.l.bf16 %v9568_v32  ;;  %v8458_v34 = vpop.permute.xlu1 %8457  ;;  %7231 = vmatprep.mubr.msk.f32.mxu1 %vm332_vm2, %v9483_v37 }
  0xcd   : > { %v8460_v3 = vunpack.i.h.bf16 %v8458_v34  ;;  %v8459_v38 = vunpack.i.l.bf16 %v8458_v34  ;;  %2331 = vmatprep.mubr.f32.mxu0 %v11156_v18 }
  0xce   : > { %8742 = vrot.lane.b32.xlu0 %v9205_v7, %s9126_s6  ;;  %8747 = vrot.lane.b32.xlu1 %v9221_v11, %s9126_s6  ;;  %v742_v37 = vsel %vm734_vm6, %v8454_v33, %v8455_v14 }
  0xcf   : > { %v741_v40 = vsel %vm734_vm6, %v8460_v3, %v8454_v33  ;;  %v739_v41 = vsel %vm734_vm6, %v8459_v38, %v8449_v27  ;;  %7232 = vmatmul.mubr.msk.f32.vlgmr.msra.gmra.mrb[8].mxu1 %vm332_vm2, %v9505_v49  ;;  %v8463_v42 = vpop.permute.xlu0 %8462  ;;  %v7595_v7 = vpack.c.bf16 %v742_v37, %v740_v39  ;;  %v9051_v49 = vld [vmem:[%s9179_s23 + $0x8] sm:$0xff]  ;;  %v7603_v33 = vpack.c.bf16 %v8455_v14, %v8450_v31  ;;  %v9061_v37 = vld [vmem:[%s9179_s23 + $0x40] sm:$0xff] }
  0xd0   : > { %7594 = vmatpush1.bf16.msra.mxu1 %v7593_v36  ;;  %6806 = vmatmul.mubr.msk.f32.gmra.mrb[4].mxu0 %vm332_vm2, %v6802_v10  ;;  %v8465_v11 = vunpack.i.h.bf16 %v8463_v42  ;;  %v8464_v43 = vunpack.i.l.bf16 %v8463_v42  ;;  %v8468_v44 = vpop.permute.xlu1 %8467  ;;  %v7597_v45 = vpack.c.bf16 %v741_v40, %v739_v41  ;;  %v9605_v53 = vpack.i.bf16 %v9052_v50, %v9051_v49  ;;  %v6813_v3 = vld [vmem:[%s11144_s1 + $0x128] sm:$0xff]  ;;  %v9060_v10 = vld [vmem:[%s9179_s23 + $0x70] sm:$0xff]  ;;  %v9062_v40 = vld [vmem:[%s9179_s23 + $0x60] sm:$0xff] }
  0xd1   : > { %v8470_v1 = vunpack.i.h.bf16 %v8468_v44  ;;  %v8469_v6 = vunpack.i.l.bf16 %v8468_v44  ;;  %2337 = vmatprep.mubr.f32.mxu0 %v11156_v18  ;;  %7234 = vmatprep.mubr.msk.f32.mxu1 %vm332_vm2, %v268_v21  ;;  %v9059_v38 = vld [vmem:[%s9179_s23 + $0x68] sm:$0xff]  ;;  %v9662_v41 = vpack.i.bf16 %v9062_v40, %v9061_v37  ;;  %v6814_v49 = vld [vmem:[%s11144_s1 + $0x130] sm:$0xff]  ;;  %vm5470_vm6 = vcmask 384000  }
  0xd2   : > { %8752 = vrot.lane.b32.xlu0 %v9238_v16, %s9126_s6  ;;  %8757 = vrot.lane.b32.xlu1 %v9243_v17, %s9126_s6  ;;  %v2720_v57 = vsel %vm2718_vm7, %v8464_v43, %v8465_v11  ;;  %v7599_v16 = vpack.c.bf16 %v8440_v2, %v8435_v62  ;;  %v9628_v62 = vld [vmem:[%s11144_s1 + $0x40] sm:$0xff]  ;;  %v9632_v2 = vpack.i.bf16 %v9056_v48, %v9055_v20 }
  0xd3   : > { %7596 = vmatprep.subr.bf16.mxu1 %v7595_v7  ;;  %7235 = vmatmul.mubr.msk.f32.gmra.mrb[10].mxu1 %vm332_vm2, %v269_v26  ;;  %v8473_v58 = vpop.permute.xlu0 %8472  ;;  %v2722_v17 = vsel %vm2718_vm7, %v8469_v6, %v8470_v1  ;;  %v9618_v60 = vpack.c.bf16 %v8470_v1, %v8465_v11  ;;  %v9058_v26 = vld [vmem:[%s9179_s23 + $0x50] sm:$0xff]  ;;  %v9658_v39 = vpack.i.bf16 %v9060_v10, %v9059_v38  ;;  %v9679_v1 = vld [vmem:[%s11144_s1 + $0x48] sm:$0xff] }
  0xd4   : > { %6807 = vmatmul.mubr.msk.f32.gmra.mrb[6].mxu0 %vm332_vm2, %v6803_v47  ;;  %7598 = vmatpush1.bf16.msra.mxu1 %v7597_v45  ;;  %v8475_v61 = vunpack.i.h.bf16 %v8473_v58  ;;  %v8474_v13 = vunpack.i.l.bf16 %v8473_v58  ;;  %v8478_v19 = vpop.permute.xlu1 %8477  ;;  %v7719_v21 = vpack.c.bf16 %v2722_v17, %v2720_v57  ;;  %v9643_v0 = vpack.i.bf16 %v9058_v26, %v9057_v8  ;;  %v6731_v8 = vld [vmem:[%s11144_s1 + $0x58] sm:$0xff] }
  0xd5   : > { %7600 = vmatprep.subr.bf16.mxu1 %v7599_v16  ;;  %2567 = vmatprep.mubr.f32.mxu0 %v11156_v18  ;;  %v8480_v24 = vunpack.i.h.bf16 %v8478_v19  ;;  %v8479_v63 = vunpack.i.l.bf16 %v8478_v19  ;;  %v6730_v19 = vld [vmem:[%s11144_s1 + $0x50] sm:$0xff] }
  0xd6   : > { %v2719_v4 = vsel %vm2718_vm7, %v8474_v13, %v8464_v43  ;;  %v2721_v23 = vsel %vm2718_vm7, %v8475_v61, %v8469_v6  ;;  %8762 = vrot.lane.b32.xlu0 %v9605_v53, %s9127_s15  ;;  %8767 = vrot.lane.b32.xlu1 %v9609_v55, %s9127_s15 }
  0xd7   : > { %831 = vmatprep.mubr.f32.mxu1 %v11156_v18  ;;  %7720 = vmatprep.subr.bf16.mxu0 %v7719_v21  ;;  %v8483_v25 = vpop.permute.xlu0 %8482  ;;  %v7721_v5 = vpack.c.bf16 %v2721_v23, %v2719_v4  ;;  %v2724_v12 = vsel %vm2718_vm7, %v8479_v63, %v8480_v24  ;;  %v6815_v21 = vld [vmem:[%s11144_s1 + $0x138] sm:$0xff] }
  0xd8   : > { %6816 = vmatmul.mubr.msk.f32.vlgmr.msra.gmra.mrb[0].mxu0 %vm332_vm2, %v6812_v9  ;;  %6732 = vmatmul.mubr.msk.f32.vlgmr.msra.gmra.mrb[0].mxu1 %vm332_vm2, %v9628_v62  ;;  %v8485_v29 = vunpack.i.h.bf16 %v8483_v25  ;;  %v8484_v30 = vunpack.i.l.bf16 %v8483_v25  ;;  %v8488_v27 = vpop.permute.xlu1 %8487 }
  0xd9   : > { %7602 = vmatpush3.bf16.msra.mxu1 %v7599_v16  ;;  %v8490_v34 = vunpack.i.h.bf16 %v8488_v27  ;;  %v8489_v36 = vunpack.i.l.bf16 %v8488_v27  ;;  %2573 = vmatprep.mubr.f32.mxu0 %v11156_v18 }
  0xda   : > { %7604 = vmatprep.subr.bf16.mxu1 %v7603_v33  ;;  %8772 = vrot.lane.b32.xlu0 %v9632_v2, %s9127_s15  ;;  %v2726_v31 = vsel %vm2718_vm7, %v8484_v30, %v8485_v29  ;;  %v9668_v32 = vpack.c.bf16 %v8485_v29, %v8480_v24  ;;  %v6824_v29 = vld [vmem:[%s11144_s1 + $0x140] sm:$0xff] }
  0xdb   : > { %v2725_v14 = vsel %vm2718_vm7, %v8490_v34, %v8484_v30  ;;  %v2723_v42 = vsel %vm2718_vm7, %v8489_v36, %v8479_v63  ;;  %8777 = vrot.lane.b32.xlu1 %v9643_v0, %s9127_s15  ;;  %7722 = vmatpush1.bf16.msra.mxu0 %v7721_v5  ;;  %v8493_v7 = vpop.permute.xlu0 %8492  ;;  %v7723_v11 = vpack.c.bf16 %v2726_v31, %v2724_v12  ;;  %vm5730_vm7 = vcmask 375808  }
  0xdc   : > { %6817 = vmatmul.mubr.msk.f32.gmra.mrb[2].mxu0 %vm332_vm2, %v6813_v3  ;;  %v8495_v43 = vunpack.i.h.bf16 %v8493_v7  ;;  %v8494_v44 = vunpack.i.l.bf16 %v8493_v7  ;;  %v8498_v45 = vpop.permute.xlu1 %8497  ;;  %837 = vmatprep.mubr.f32.mxu1 %v11156_v18  ;;  %v7725_v50 = vpack.c.bf16 %v2725_v14, %v2723_v42  ;;  %v6825_v42 = vld [vmem:[%s11144_s1 + $0x148] sm:$0xff] }
  0xdd   : > { %7606 = vmatpush3.bf16.msra.mxu1 %v7603_v33  ;;  %v8500_v6 = vunpack.i.h.bf16 %v8498_v45  ;;  %v8499_v47 = vunpack.i.l.bf16 %v8498_v45  ;;  %2579 = vmatprep.mubr.f32.mxu0 %v11156_v18 }
  0xde   : > { %8782 = vrot.lane.b32.xlu0 %v9658_v39, %s9127_s15  ;;  %7724 = vmatprep.subr.bf16.mxu0 %v7723_v11  ;;  %v2968_v54 = vsel %vm2966_vm8, %v8494_v44, %v8495_v43 }
  0xdf   : > { %8787 = vrot.lane.b32.xlu1 %v9662_v41, %s9127_s15  ;;  %6733 = vmatmul.mubr.msk.f32.gmra.mrb[2].mxu1 %vm332_vm2, %v9679_v1  ;;  %v8503_v51 = vpop.permute.xlu0 %8502  ;;  %v2970_v57 = vsel %vm2966_vm8, %v8499_v47, %v8500_v6  ;;  %v9693_v58 = vpack.c.bf16 %v8500_v6, %v8495_v43 }
  0xe0   : > { %6818 = vmatmul.mubr.msk.f32.gmra.mrb[4].mxu0 %vm332_vm2, %v6814_v49  ;;  %v8505_v16 = vunpack.i.h.bf16 %v8503_v51  ;;  %v8504_v17 = vunpack.i.l.bf16 %v8503_v51  ;;  %v9696_v61 = vpop.permute.xlu1 %8507  ;;  %843 = vmatprep.mubr.f32.mxu1 %v11156_v18  ;;  %v7735_v13 = vpack.c.bf16 %v2970_v57, %v2968_v54 }
  0xe1   : > { %7726 = vmatpush1.bf16.msra.mxu0 %v7725_v50  ;;  %2585 = vmatprep.mubr.f32.mxu0 %v11156_v18  ;;  %v8510_v48 = vunpack.i.h.bf16 %v9696_v61  ;;  %v8509_v4 = vunpack.i.l.bf16 %v9696_v61 }
  0xe2   : > { %v2967_v9 = vsel %vm2966_vm8, %v8504_v17, %v8494_v44  ;;  %v2969_v20 = vsel %vm2966_vm8, %v8505_v16, %v8499_v47  ;;  %8792 = vrot.lane.b32.xlu0 %v9605_v53, %s9128_s29  ;;  %7736 = vmatprep.subr.bf16.mxu0 %v7735_v13 }
  0xe3   : > { %8797 = vrot.lane.b32.xlu1 %v9609_v55, %s9128_s29  ;;  %6734 = vmatmul.mubr.msk.f32.gmra.mrb[4].mxu1 %vm332_vm2, %v6730_v19  ;;  %v9715_v23 = vpop.permute.xlu0 %8512  ;;  %v7737_v30 = vpack.c.bf16 %v2969_v20, %v2967_v9  ;;  %v984_v27 = vsel %vm982_vm9, %v8509_v4, %v8510_v48  ;;  %v6827_v20 = vld [vmem:[%s11144_s1 + $0x158] sm:$0xff] }
  0xe4   : > { %6819 = vmatmul.mubr.msk.f32.gmra.mrb[6].mxu0 %vm332_vm2, %v6815_v21  ;;  %v8515_v24 = vunpack.i.h.bf16 %v9715_v23  ;;  %v8514_v63 = vunpack.i.l.bf16 %v9715_v23  ;;  %v8518_v25 = vpop.permute.xlu1 %8517  ;;  %849 = vmatprep.mubr.f32.mxu1 %v11156_v18 }
  0xe5   : > { %v8520_v26 = vunpack.i.h.bf16 %v8518_v25  ;;  %v8519_v5 = vunpack.i.l.bf16 %v8518_v25  ;;  %2815 = vmatprep.mubr.f32.mxu0 %v11156_v18 }
  0xe6   : > { %8802 = vrot.lane.b32.xlu0 %v9632_v2, %s9128_s29  ;;  %v986_v33 = vsel %vm982_vm9, %v8514_v63, %v8515_v24 }
  0xe7   : > { %v985_v34 = vsel %vm982_vm9, %v8520_v26, %v8514_v63  ;;  %v983_v36 = vsel %vm982_vm9, %v8519_v5, %v8509_v4  ;;  %8807 = vrot.lane.b32.xlu1 %v9643_v0, %s9128_s29  ;;  %6735 = vmatmul.mubr.msk.f32.gmra.mrb[6].mxu1 %vm332_vm2, %v6731_v8  ;;  %v8523_v3 = vpop.permute.xlu0 %8522  ;;  %v7607_v38 = vpack.c.bf16 %v986_v33, %v984_v27 }
  0xe8   : > { %6828 = vmatmul.mubr.msk.f32.vlgmr.msra.gmra.mrb[0].mxu0 %vm332_vm2, %v6824_v29  ;;  %v8525_v10 = vunpack.i.h.bf16 %v8523_v3  ;;  %v8524_v37 = vunpack.i.l.bf16 %v8523_v3  ;;  %v8528_v40 = vpop.permute.xlu1 %8527  ;;  %7245 = vmatprep.mubr.msk.f32.mxu1 %vm332_vm2, %v9628_v62  ;;  %v7609_v12 = vpack.c.bf16 %v985_v34, %v983_v36  ;;  %v7615_v3 = vpack.c.bf16 %v8515_v24, %v8510_v48 }
  0xe9   : > { %7738 = vmatpush1.bf16.msra.mxu0 %v7737_v30  ;;  %v8530_v31 = vunpack.i.h.bf16 %v8528_v40  ;;  %v8529_v14 = vunpack.i.l.bf16 %v8528_v40  ;;  %7608 = vmatprep.subr.bf16.mxu1 %v7607_v38  ;;  %v6836_v38 = vld [vmem:[%s11144_s1 + $0x160] sm:$0xff] }
  0xea   : > { %8812 = vrot.lane.b32.xlu0 %v9658_v39, %s9128_s29  ;;  %v2972_v7 = vsel %vm2966_vm8, %v8524_v37, %v8525_v10  ;;  %2821 = vmatprep.mubr.f32.mxu0 %v11156_v18 }
  0xeb   : > { %8817 = vrot.lane.b32.xlu1 %v9662_v41, %s9128_s29  ;;  %7246 = vmatmul.mubr.msk.f32.vlgmr.msra.gmra.mrb[8].mxu1 %vm332_vm2, %v9679_v1  ;;  %v8533_v62 = vpop.permute.xlu0 %8532  ;;  %v2974_v11 = vsel %vm2966_vm8, %v8529_v14, %v8530_v31  ;;  %v9756_v43 = vpack.c.bf16 %v8530_v31, %v8525_v10  ;;  %v6826_v1 = vld [vmem:[%s11144_s1 + $0x150] sm:$0xff]  ;;  %v9803_v10 = vld [vmem:[%s11144_s1 + $0x60] sm:$0xff] }
  0xec   : > { %7610 = vmatpush1.bf16.msra.mxu1 %v7609_v12  ;;  %v8535_v44 = vunpack.i.h.bf16 %v8533_v62  ;;  %v8534_v45 = vunpack.i.l.bf16 %v8533_v62  ;;  %v9758_v6 = vpop.permute.xlu1 %8537  ;;  %v7739_v47 = vpack.c.bf16 %v2974_v11, %v2972_v7  ;;  %6829 = vmatmul.mubr.msk.f32.gmra.mrb[2].mxu0 %vm332_vm2, %v6825_v42 }
  0xed   : > { %7248 = vmatprep.mubr.msk.f32.mxu1 %vm332_vm2, %v6730_v19  ;;  %2827 = vmatprep.mubr.f32.mxu0 %v11156_v18  ;;  %v8540_v54 = vunpack.i.h.bf16 %v9758_v6  ;;  %v8539_v51 = vunpack.i.l.bf16 %v9758_v6 }
  0xee   : > { %v2971_v49 = vsel %vm2966_vm8, %v8534_v45, %v8524_v37  ;;  %v2973_v50 = vsel %vm2966_vm8, %v8535_v44, %v8529_v14  ;;  %8822 = vrot.lane.b32.xlu0 %v9605_v53, %s9129_s13  ;;  %7740 = vmatprep.subr.bf16.mxu0 %v7739_v47  ;;  %v9822_v44 = vld [vmem:[%s11144_s1 + $0x68] sm:$0xff]  ;;  %vm5990_vm8 = vcmask 367616  }
  0xef   : > { %8827 = vrot.lane.b32.xlu1 %v9609_v55, %s9129_s13  ;;  %v8543_v57 = vpop.permute.xlu0 %8542  ;;  %v7741_v16 = vpack.c.bf16 %v2973_v50, %v2971_v49  ;;  %7249 = vmatmul.mubr.msk.f32.gmra.mrb[10].mxu1 %vm332_vm2, %v6731_v8  ;;  %v988_v4 = vsel %vm982_vm9, %v8539_v51, %v8540_v54 }
  0xf0   : > { %v8545_v17 = vunpack.i.h.bf16 %v8543_v57  ;;  %v8544_v13 = vunpack.i.l.bf16 %v8543_v57  ;;  %v8548_v19 = vpop.permute.xlu1 %8547  ;;  %6830 = vmatmul.mubr.msk.f32.gmra.mrb[4].mxu0 %vm332_vm2, %v6826_v1  ;;  %1079 = vmatprep.mubr.f32.mxu1 %v11156_v18  ;;  %v9838_v57 = vld [vmem:[%s11144_s1 + $0x70] sm:$0xff] }
  0xf1   : > { %v8550_v21 = vunpack.i.h.bf16 %v8548_v19  ;;  %v8549_v9 = vunpack.i.l.bf16 %v8548_v19  ;;  %7742 = vmatpush1.bf16.msra.mxu0 %v7741_v16  ;;  %2833 = vmatprep.mubr.f32.mxu0 %v11156_v18 }
  0xf2   : > { %8832 = vrot.lane.b32.xlu0 %v9632_v2, %s9129_s13  ;;  %v990_v63 = vsel %vm982_vm9, %v8544_v13, %v8545_v17  ;;  %v7619_v14 = vpack.c.bf16 %v8545_v17, %v8540_v54 }
  0xf3   : > { %v989_v25 = vsel %vm982_vm9, %v8550_v21, %v8544_v13  ;;  %v987_v8 = vsel %vm982_vm9, %v8549_v9, %v8539_v51  ;;  %8837 = vrot.lane.b32.xlu1 %v9643_v0, %s9129_s13  ;;  %v8553_v26 = vpop.permute.xlu0 %8552  ;;  %v7611_v5 = vpack.c.bf16 %v990_v63, %v988_v4  ;;  %v6837_v51 = vld [vmem:[%s11144_s1 + $0x168] sm:$0xff]  ;;  %vm6250_vm9 = vcmask 359424  }
  0xf4   : > { %v8555_v29 = vunpack.i.h.bf16 %v8553_v26  ;;  %v8554_v30 = vunpack.i.l.bf16 %v8553_v26  ;;  %v8558_v27 = vpop.permute.xlu1 %8557  ;;  %v7613_v33 = vpack.c.bf16 %v989_v25, %v987_v8  ;;  %6831 = vmatmul.mubr.msk.f32.gmra.mrb[6].mxu0 %vm332_vm2, %v6827_v20 }
  0xf5   : > { %v8560_v34 = vunpack.i.h.bf16 %v8558_v27  ;;  %v8559_v36 = vunpack.i.l.bf16 %v8558_v27  ;;  %7612 = vmatprep.subr.bf16.mxu1 %v7611_v5  ;;  %3063 = vmatprep.mubr.f32.mxu0 %v11156_v18  ;;  %v6838_v27 = vld [vmem:[%s11144_s1 + $0x170] sm:$0xff] }
  0xf6   : > { %8842 = vrot.lane.b32.xlu0 %v9658_v39, %s9129_s13  ;;  %7614 = vmatpush1.bf16.msra.mxu1 %v7613_v33  ;;  %v3216_v61 = vsel %vm3214_vm10, %v8554_v30, %v8555_v29 }
  0xf7   : > { %8847 = vrot.lane.b32.xlu1 %v9662_v41, %s9129_s13  ;;  %v8563_v48 = vpop.permute.xlu0 %8562  ;;  %7616 = vmatprep.subr.bf16.mxu1 %v7615_v3  ;;  %v3218_v23 = vsel %vm3214_vm10, %v8559_v36, %v8560_v34  ;;  %v9809_v24 = vpack.c.bf16 %v8560_v34, %v8555_v29  ;;  %v6743_v29 = vld [vmem:[%s11144_s1 + $0x78] sm:$0xff] }
  0xf8   : > { %v8565_v37 = vunpack.i.h.bf16 %v8563_v48  ;;  %v8564_v40 = vunpack.i.l.bf16 %v8563_v48  ;;  %v8568_v12 = vpop.permute.xlu1 %8567  ;;  %v7751_v31 = vpack.c.bf16 %v3218_v23, %v3216_v61  ;;  %6840 = vmatmul.mubr.msk.f32.vlgmr.msra.gmra.mrb[0].mxu0 %vm332_vm2, %v6836_v38 }
  0xf9   : > { %6744 = vmatmul.mubr.msk.f32.vlgmr.msra.gmra.mrb[0].mxu1 %vm332_vm2, %v9803_v10  ;;  %3069 = vmatprep.mubr.f32.mxu0 %v11156_v18  ;;  %v8570_v62 = vunpack.i.h.bf16 %v8568_v12  ;;  %v8569_v11 = vunpack.i.l.bf16 %v8568_v12  ;;  %v6839_v12 = vld [vmem:[%s11144_s1 + $0x178] sm:$0xff] }
  0xfa   : > { %v3215_v42 = vsel %vm3214_vm10, %v8564_v40, %v8554_v30  ;;  %v3217_v7 = vsel %vm3214_vm10, %v8565_v37, %v8559_v36  ;;  %8852 = vrot.lane.b32.xlu0 %v9605_v53, %s9130_s22  ;;  %7752 = vmatprep.subr.bf16.mxu0 %v7751_v31 }
  0xfb   : > { %8857 = vrot.lane.b32.xlu1 %v9609_v55, %s9130_s22  ;;  %7618 = vmatpush3.bf16.msra.mxu1 %v7615_v3  ;;  %v8573_v45 = vpop.permute.xlu0 %8572  ;;  %v7753_v6 = vpack.c.bf16 %v3217_v7, %v3215_v42  ;;  %v3220_v16 = vsel %vm3214_vm10, %v8569_v11, %v8570_v62 }
  0xfc   : > { %v8575_v47 = vunpack.i.h.bf16 %v8573_v45  ;;  %v8574_v1 = vunpack.i.l.bf16 %v8573_v45  ;;  %v8578_v49 = vpop.permute.xlu1 %8577  ;;  %7620 = vmatprep.subr.bf16.mxu1 %v7619_v14  ;;  %1085 = vmatprep.mubr.f32.mxu1 %v11156_v18 }
  0xfd   : > { %v8580_v50 = vunpack.i.h.bf16 %v8578_v49  ;;  %v8579_v54 = vunpack.i.l.bf16 %v8578_v49  ;;  %6745 = vmatmul.mubr.msk.f32.gmra.mrb[2].mxu1 %vm332_vm2, %v9822_v44  ;;  %7754 = vmatpush1.bf16.msra.mxu0 %v7753_v6 }
  0xfe   : > { %8862 = vrot.lane.b32.xlu0 %v9632_v2, %s9130_s22  ;;  %1091 = vmatprep.mubr.f32.mxu1 %v11156_v18  ;;  %v3222_v17 = vsel %vm3214_vm10, %v8574_v1, %v8575_v47  ;;  %v9842_v13 = vpack.c.bf16 %v8575_v47, %v8570_v62 }
  0xff   : > { %v3221_v19 = vsel %vm3214_vm10, %v8580_v50, %v8574_v1  ;;  %v3219_v21 = vsel %vm3214_vm10, %v8579_v54, %v8569_v11  ;;  %8867 = vrot.lane.b32.xlu1 %v9643_v0, %s9130_s22  ;;  %7622 = vmatpush3.bf16.msra.mxu1 %v7619_v14  ;;  %v9848_v9 = vpop.permute.xlu0 %8582  ;;  %v7755_v20 = vpack.c.bf16 %v3222_v17, %v3220_v16 }
 0x100   : > { %v8585_v4 = vunpack.i.h.bf16 %v9848_v9  ;;  %v8584_v63 = vunpack.i.l.bf16 %v9848_v9  ;;  %v9852_v25 = vpop.permute.xlu1 %8587  ;;  %v7757_v8 = vpack.c.bf16 %v3221_v19, %v3219_v21  ;;  %6841 = vmatmul.mubr.msk.f32.gmra.mrb[2].mxu0 %vm332_vm2, %v6837_v51 }
 0x101   : > { %v8590_v26 = vunpack.i.h.bf16 %v9852_v25  ;;  %v8589_v5 = vunpack.i.l.bf16 %v9852_v25  ;;  %6746 = vmatmul.mubr.msk.f32.gmra.mrb[4].mxu1 %vm332_vm2, %v9838_v57  ;;  %7756 = vmatprep.subr.bf16.mxu0 %v7755_v20 }
 0x102   : > { %8872 = vrot.lane.b32.xlu0 %v9658_v39, %s9130_s22  ;;  %7758 = vmatpush1.bf16.msra.mxu0 %v7757_v8  ;;  %v1232_v30 = vsel %vm1230_vm11, %v8584_v63, %v8585_v4 }
 0x103   : > { %8877 = vrot.lane.b32.xlu1 %v9662_v41, %s9130_s22  ;;  %v8593_v33 = vpop.permute.xlu0 %8592  ;;  %1097 = vmatprep.mubr.f32.mxu1 %v11156_v18  ;;  %v1234_v34 = vsel %vm1230_vm11, %v8589_v5, %v8590_v26  ;;  %v7631_v21 = vpack.c.bf16 %v8590_v26, %v8585_v4 }
 0x104   : > { %v8595_v36 = vunpack.i.h.bf16 %v8593_v33  ;;  %v8594_v3 = vunpack.i.l.bf16 %v8593_v33  ;;  %v9874_v38 = vpop.permute.xlu1 %8597  ;;  %v7623_v61 = vpack.c.bf16 %v1234_v34, %v1232_v30  ;;  %3075 = vmatprep.mubr.f32.mxu0 %v11156_v18 }
 0x105   : > { %6747 = vmatmul.mubr.msk.f32.gmra.mrb[6].mxu1 %vm332_vm2, %v6743_v29  ;;  %6842 = vmatmul.mubr.msk.f32.gmra.mrb[4].mxu0 %vm332_vm2, %v6838_v27  ;;  %v8600_v37 = vunpack.i.h.bf16 %v9874_v38  ;;  %v8599_v40 = vunpack.i.l.bf16 %v9874_v38  ;;  %v6849_v27 = vld [vmem:[%s11144_s1 + $0x188] sm:$0xff] }
 0x106   : > { %v1231_v48 = vsel %vm1230_vm11, %v8594_v3, %v8584_v63  ;;  %v1233_v23 = vsel %vm1230_vm11, %v8595_v36, %v8589_v5  ;;  %8882 = vrot.lane.b32.xlu0 %v9605_v53, %s9131_s9  ;;  %7624 = vmatprep.subr.bf16.mxu1 %v7623_v61  ;;  %v9919_v63 = vld [vmem:[%s11144_s1 + $0x80] sm:$0xff] }
 0x107   : > { %8887 = vrot.lane.b32.xlu1 %v9609_v55, %s9131_s9  ;;  %v8603_v31 = vpop.permute.xlu0 %8602  ;;  %7259 = vmatprep.mubr.msk.f32.mxu1 %vm332_vm2, %v9803_v10  ;;  %v7625_v14 = vpack.c.bf16 %v1233_v23, %v1231_v48  ;;  %v1236_v6 = vsel %vm1230_vm11, %v8599_v40, %v8600_v37 }
 0x108   : > { %v8605_v42 = vunpack.i.h.bf16 %v8603_v31  ;;  %v8604_v7 = vunpack.i.l.bf16 %v8603_v31  ;;  %v8608_v62 = vpop.permute.xlu1 %8607  ;;  %3081 = vmatprep.mubr.f32.mxu0 %v11156_v18  ;;  %v6850_v31 = vld [vmem:[%s11144_s1 + $0x190] sm:$0xff] }
 0x109   : > { %v8610_v11 = vunpack.i.h.bf16 %v8608_v62  ;;  %v8609_v45 = vunpack.i.l.bf16 %v8608_v62  ;;  %7260 = vmatmul.mubr.msk.f32.vlgmr.msra.gmra.mrb[8].mxu1 %vm332_vm2, %v9822_v44  ;;  %6843 = vmatmul.mubr.msk.f32.gmra.mrb[6].mxu0 %vm332_vm2, %v6839_v12 }
 0x10a   : > { %8892 = vrot.lane.b32.xlu0 %v9632_v2, %s9131_s9  ;;  %7626 = vmatpush1.bf16.msra.mxu1 %v7625_v14  ;;  %v1238_v10 = vsel %vm1230_vm11, %v8604_v7, %v8605_v42  ;;  %v7635_v30 = vpack.c.bf16 %v8605_v42, %v8600_v37  ;;  %v9948_v14 = vld [vmem:[%s11144_s1 + $0x88] sm:$0xff] }
 0x10b   : > { %v1237_v47 = vsel %vm1230_vm11, %v8610_v11, %v8604_v7  ;;  %v1235_v1 = vsel %vm1230_vm11, %v8609_v45, %v8599_v40  ;;  %8897 = vrot.lane.b32.xlu1 %v9643_v0, %s9131_s9  ;;  %v8613_v49 = vpop.permute.xlu0 %8612  ;;  %7262 = vmatprep.mubr.msk.f32.mxu1 %vm332_vm2, %v9838_v57  ;;  %v7627_v44 = vpack.c.bf16 %v1238_v10, %v1236_v6  ;;  %v6848_v57 = vld [vmem:[%s11144_s1 + $0x180] sm:$0xff] }
 0x10c   : > { %v7629_v50 = vpack.c.bf16 %v1237_v47, %v1235_v1  ;;  %v8615_v54 = vunpack.i.h.bf16 %v8613_v49  ;;  %v8614_v51 = vunpack.i.l.bf16 %v8613_v49  ;;  %v8618_v16 = vpop.permute.xlu1 %8617  ;;  %3311 = vmatprep.mubr.f32.mxu0 %v11156_v18  ;;  %v253_v47 = vld [vmem:[%s9179_s23 + $0x18] sm:$0xff] }
 0x10d   : > { %v8620_v17 = vunpack.i.h.bf16 %v8618_v16  ;;  %v8619_v19 = vunpack.i.l.bf16 %v8618_v16  ;;  %7628 = vmatprep.subr.bf16.mxu1 %v7627_v44  ;;  %7263 = vmatmul.mubr.msk.f32.gmra.mrb[10].mxu1 %vm332_vm2, %v6743_v29  ;;  %v257_v1 = vld [vmem:[%s9179_s23 + $0x38] sm:$0xff] }
 0x10e   : > { %8902 = vrot.lane.b32.xlu0 %v9658_v39, %s9131_s9  ;;  %7630 = vmatpush1.bf16.msra.mxu1 %v7629_v50  ;;  %v3464_v20 = vsel %vm3462_vm12, %v8614_v51, %v8615_v54  ;;  %v265_v16 = vld [vmem:[%s9179_s23 + $0x78] sm:$0xff] }
 0x10f   : > { %v9921_v25 = vpack.c.bf16 %v8620_v17, %v8615_v54  ;;  %8907 = vrot.lane.b32.xlu1 %v9662_v41, %s9131_s9  ;;  %v8623_v9 = vpop.permute.xlu0 %8622  ;;  %7632 = vmatprep.subr.bf16.mxu1 %v7631_v21  ;;  %v3466_v4 = vsel %vm3462_vm12, %v8619_v19, %v8620_v17 }
 0x110   : > { %v8625_v8 = vunpack.i.h.bf16 %v8623_v9  ;;  %v8624_v26 = vunpack.i.l.bf16 %v8623_v9  ;;  %v8628_v5 = vpop.permute.xlu1 %8627  ;;  %1327 = vmatprep.mubr.f32.mxu1 %v11156_v18  ;;  %6852 = vmatmul.mubr.msk.f32.vlgmr.msra.gmra.mrb[0].mxu0 %vm332_vm2, %v6848_v57  ;;  %v7767_v29 = vpack.c.bf16 %v3466_v4, %v3464_v20  ;;  %v9977_v57 = vld [vmem:[%s11144_s1 + $0x90] sm:$0xff]  ;;  %v9981_v20 = vpack.i.bf16 %v257_v1, %v253_v47 }
 0x111   : > { %6756 = vmatmul.mubr.msk.f32.vlgmr.msra.gmra.mrb[0].mxu1 %vm332_vm2, %v9919_v63  ;;  %3317 = vmatprep.mubr.f32.mxu0 %v11156_v18  ;;  %v8630_v36 = vunpack.i.h.bf16 %v8628_v5  ;;  %v8629_v3 = vunpack.i.l.bf16 %v8628_v5 }
 0x112   : > { %v3463_v33 = vsel %vm3462_vm12, %v8624_v26, %v8614_v51  ;;  %v3465_v34 = vsel %vm3462_vm12, %v8625_v8, %v8619_v19  ;;  %8912 = vrot.lane.b32.xlu0 %v9605_v53, %s9132_s20  ;;  %7768 = vmatprep.subr.bf16.mxu0 %v7767_v29  ;;  %v261_v51 = vld [vmem:[%s9179_s23 + $0x58] sm:$0xff] }
 0x113   : > { %v7769_v38 = vpack.c.bf16 %v3465_v34, %v3463_v33  ;;  %8917 = vrot.lane.b32.xlu1 %v9609_v55, %s9132_s20  ;;  %7634 = vmatpush3.bf16.msra.mxu1 %v7631_v21  ;;  %v8633_v61 = vpop.permute.xlu0 %8632  ;;  %v3468_v7 = vsel %vm3462_vm12, %v8629_v3, %v8630_v36  ;;  %v9972_v21 = vld [vmem:[%s11144_s1 + $0x198] sm:$0xff]  ;;  %v9988_v26 = vpack.i.bf16 %v265_v16, %v261_v51  ;;  %v10003_v34 = vld [vmem:[%s11144_s1 + $0x1a0] sm:$0xff] }
 0x114   : > { %v8635_v48 = vunpack.i.h.bf16 %v8633_v61  ;;  %v8634_v23 = vunpack.i.l.bf16 %v8633_v61  ;;  %v8638_v37 = vpop.permute.xlu1 %8637  ;;  %7636 = vmatprep.subr.bf16.mxu1 %v7635_v30  ;;  %6853 = vmatmul.mubr.msk.f32.gmra.mrb[2].mxu0 %vm332_vm2, %v6849_v27 }
 0x115   : > { %v8640_v40 = vunpack.i.h.bf16 %v8638_v37  ;;  %v8639_v12 = vunpack.i.l.bf16 %v8638_v37  ;;  %7770 = vmatpush1.bf16.msra.mxu0 %v7769_v38  ;;  %3323 = vmatprep.mubr.f32.mxu0 %v11156_v18 }
 0x116   : > { %v9950_v42 = vpack.c.bf16 %v8635_v48, %v8630_v36  ;;  %8922 = vrot.lane.b32.xlu0 %v9632_v2, %s9132_s20  ;;  %1333 = vmatprep.mubr.f32.mxu1 %v11156_v18  ;;  %v3470_v62 = vsel %vm3462_vm12, %v8634_v23, %v8635_v48  ;;  %v6755_v36 = vld [vmem:[%s11144_s1 + $0x98] sm:$0xff] }
 0x117   : > { %v3469_v11 = vsel %vm3462_vm12, %v8640_v40, %v8634_v23  ;;  %v3467_v45 = vsel %vm3462_vm12, %v8639_v12, %v8629_v3  ;;  %8927 = vrot.lane.b32.xlu1 %v9643_v0, %s9132_s20  ;;  %7638 = vmatpush3.bf16.msra.mxu1 %v7635_v30  ;;  %v8643_v6 = vpop.permute.xlu0 %8642  ;;  %v7771_v10 = vpack.c.bf16 %v3470_v62, %v3468_v7 }
 0x118   : > { %v7773_v49 = vpack.c.bf16 %v3469_v11, %v3467_v45  ;;  %v8645_v44 = vunpack.i.h.bf16 %v8643_v6  ;;  %v8644_v50 = vunpack.i.l.bf16 %v8643_v6  ;;  %v8648_v54 = vpop.permute.xlu1 %8647  ;;  %6854 = vmatmul.mubr.msk.f32.gmra.mrb[4].mxu0 %vm332_vm2, %v6850_v31  ;;  %6757 = vmatmul.mubr.msk.f32.gmra.mrb[2].mxu1 %vm332_vm2, %v9948_v14  ;;  %v10027_v11 = vld [vmem:[%s11144_s1 + $0x1a8] sm:$0xff] }
 0x119   : > { %v8650_v17 = vunpack.i.h.bf16 %v8648_v54  ;;  %v8649_v19 = vunpack.i.l.bf16 %v8648_v54  ;;  %7772 = vmatprep.subr.bf16.mxu0 %v7771_v10  ;;  %3329 = vmatprep.mubr.f32.mxu0 %v11156_v18 }
 0x11a   : > { %8932 = vrot.lane.b32.xlu0 %v9658_v39, %s9132_s20  ;;  %7774 = vmatpush1.bf16.msra.mxu0 %v7773_v49  ;;  %v3712_v9 = vsel %vm3710_vm13, %v8644_v50, %v8645_v44 }
 0x11b   : > { %v9984_v4 = vpack.c.bf16 %v8650_v17, %v8645_v44  ;;  %8937 = vrot.lane.b32.xlu1 %v9662_v41, %s9132_s20  ;;  %v8653_v8 = vpop.permute.xlu0 %8652  ;;  %1339 = vmatprep.mubr.f32.mxu1 %v11156_v18  ;;  %v3714_v5 = vsel %vm3710_vm13, %v8649_v19, %v8650_v17 }
 0x11c   : > { %v8655_v29 = vunpack.i.h.bf16 %v8653_v8  ;;  %v8654_v30 = vunpack.i.l.bf16 %v8653_v8  ;;  %v9992_v27 = vpop.permute.xlu1 %8657  ;;  %6855 = vmatmul.mubr.msk.f32.gmra.mrb[6].mxu0 %vm332_vm2, %v9972_v21  ;;  %v7783_v33 = vpack.c.bf16 %v3714_v5, %v3712_v9  ;;  %6758 = vmatmul.mubr.msk.f32.gmra.mrb[4].mxu1 %vm332_vm2, %v9977_v57 }
 0x11d   : > { %3559 = vmatprep.mubr.f32.mxu0 %v11156_v18  ;;  %1345 = vmatprep.mubr.f32.mxu1 %v11156_v18  ;;  %v8660_v61 = vunpack.i.h.bf16 %v9992_v27  ;;  %v8659_v48 = vunpack.i.l.bf16 %v9992_v27  ;;  %v10105_v27 = vld [vmem:[%s11144_s1 + $0x1c8] sm:$0xff] }
 0x11e   : > { %v3711_v3 = vsel %vm3710_vm13, %v8654_v30, %v8644_v50  ;;  %v3713_v38 = vsel %vm3710_vm13, %v8655_v29, %v8649_v19  ;;  %8942 = vrot.lane.b32.xlu0 %v9981_v20, %s9130_s22  ;;  %7784 = vmatprep.subr.bf16.mxu0 %v7783_v33  ;;  %v10070_v29 = vld [vmem:[%s11144_s1 + $0x1b8] sm:$0xff] }
 0x11f   : > { %v7785_v23 = vpack.c.bf16 %v3713_v38, %v3711_v3  ;;  %8947 = vrot.lane.b32.xlu1 %v9988_v26, %s9130_s22  ;;  %v10016_v37 = vpop.permute.xlu0 %8662  ;;  %v1480_v45 = vsel %vm1478_vm14, %v8659_v48, %v8660_v61 }
 0x120   : > { %v8665_v40 = vunpack.i.h.bf16 %v10016_v37  ;;  %v8664_v12 = vunpack.i.l.bf16 %v10016_v37  ;;  %v8668_v31 = vpop.permute.xlu1 %8667  ;;  %6864 = vmatmul.mubr.msk.f32.vlgmr.msra.gmra.mrb[0].mxu0 %vm332_vm2, %v10003_v34  ;;  %6759 = vmatmul.mubr.msk.f32.gmra.mrb[6].mxu1 %vm332_vm2, %v6755_v36  ;;  %v9064_v37 = vld [vmem:[%s9179_s23 + $0x30] sm:$0xff] }
 0x121   : > { %v8670_v7 = vunpack.i.h.bf16 %v8668_v31  ;;  %v8669_v62 = vunpack.i.l.bf16 %v8668_v31  ;;  %7786 = vmatpush1.bf16.msra.mxu0 %v7785_v23  ;;  %3565 = vmatprep.mubr.f32.mxu0 %v11156_v18 }
 0x122   : > { %8952 = vrot.lane.b32.xlu0 %v9605_v53, %s9133_s12  ;;  %7273 = vmatprep.mubr.msk.f32.mxu1 %vm332_vm2, %v9919_v63  ;;  %v1482_v6 = vsel %vm1478_vm14, %v8664_v12, %v8665_v40 }
 0x123   : > { %v1481_v10 = vsel %vm1478_vm14, %v8670_v7, %v8664_v12  ;;  %v1479_v47 = vsel %vm1478_vm14, %v8669_v62, %v8659_v48  ;;  %8957 = vrot.lane.b32.xlu1 %v9609_v55, %s9133_s12  ;;  %v8673_v1 = vpop.permute.xlu0 %8672  ;;  %v7639_v53 = vpack.c.bf16 %v1482_v6, %v1480_v45  ;;  %v10051_v55 = vld [vmem:[%s11144_s1 + $0x1b0] sm:$0xff] }
 0x124   : > { %v7641_v49 = vpack.c.bf16 %v1481_v10, %v1479_v47  ;;  %v8675_v44 = vunpack.i.h.bf16 %v8673_v1  ;;  %v8674_v63 = vunpack.i.l.bf16 %v8673_v1  ;;  %v8678_v50 = vpop.permute.xlu1 %8677  ;;  %6865 = vmatmul.mubr.msk.f32.gmra.mrb[2].mxu0 %vm332_vm2, %v10027_v11  ;;  %7274 = vmatmul.mubr.msk.f32.vlgmr.msra.gmra.mrb[8].mxu1 %vm332_vm2, %v9948_v14  ;;  %v7647_v47 = vpack.c.bf16 %v8665_v40, %v8660_v61  ;;  %v9063_v61 = vld [vmem:[%s9179_s23 + $0x28] sm:$0xff] }
 0x125   : > { %v8680_v54 = vunpack.i.h.bf16 %v8678_v50  ;;  %v8679_v51 = vunpack.i.l.bf16 %v8678_v50  ;;  %7640 = vmatprep.subr.bf16.mxu1 %v7639_v53  ;;  %3571 = vmatprep.mubr.f32.mxu0 %v11156_v18  ;;  %v9006_v40 = vpack.i.bf16 %v9064_v37, %v9063_v61 }
 0x126   : > { %8962 = vrot.lane.b32.xlu0 %v9632_v2, %s9133_s12  ;;  %7642 = vmatpush1.bf16.msra.mxu1 %v7641_v49  ;;  %v3716_v16 = vsel %vm3710_vm13, %v8674_v63, %v8675_v44 }
 0x127   : > { %v10056_v17 = vpack.c.bf16 %v8680_v54, %v8675_v44  ;;  %8967 = vrot.lane.b32.xlu1 %v9981_v20, %s9131_s9  ;;  %v8683_v14 = vpop.permute.xlu0 %8682  ;;  %v3718_v19 = vsel %vm3710_vm13, %v8679_v51, %v8680_v54  ;;  %7276 = vmatprep.mubr.msk.f32.mxu1 %vm332_vm2, %v9977_v57  ;;  %v10114_v54 = vld [vmem:[%s11144_s1 + $0xa0] sm:$0xff] }
 0x128   : > { %v8685_v9 = vunpack.i.h.bf16 %v8683_v14  ;;  %v8684_v8 = vunpack.i.l.bf16 %v8683_v14  ;;  %v8688_v5 = vpop.permute.xlu1 %8687  ;;  %6866 = vmatmul.mubr.msk.f32.gmra.mrb[4].mxu0 %vm332_vm2, %v10051_v55  ;;  %v7787_v2 = vpack.c.bf16 %v3718_v19, %v3716_v16  ;;  %7277 = vmatmul.mubr.msk.f32.gmra.mrb[10].mxu1 %vm332_vm2, %v6755_v36 }
 0x129   : > { %3577 = vmatprep.mubr.f32.mxu0 %v11156_v18  ;;  %1575 = vmatprep.mubr.f32.mxu1 %v11156_v18  ;;  %v8690_v33 = vunpack.i.h.bf16 %v8688_v5  ;;  %v8689_v3 = vunpack.i.l.bf16 %v8688_v5 }
 0x12a   : > { %v3715_v57 = vsel %vm3710_vm13, %v8684_v8, %v8674_v63  ;;  %v3717_v30 = vsel %vm3710_vm13, %v8685_v9, %v8679_v51  ;;  %8972 = vrot.lane.b32.xlu0 %v9643_v0, %s9133_s12  ;;  %7788 = vmatprep.subr.bf16.mxu0 %v7787_v2  ;;  %v10085_v0 = vld [vmem:[%s11144_s1 + $0x1c0] sm:$0xff] }
 0x12b   : > { %v7789_v36 = vpack.c.bf16 %v3717_v30, %v3715_v57  ;;  %8977 = vrot.lane.b32.xlu1 %v9658_v39, %s9133_s12  ;;  %v8693_v38 = vpop.permute.xlu0 %8692  ;;  %v1484_v39 = vsel %vm1478_vm14, %v8689_v3, %v8690_v33  ;;  %v10130_v30 = vld [vmem:[%s11144_s1 + $0x1d0] sm:$0xff] }
 0x12c   : > { %v8695_v48 = vunpack.i.h.bf16 %v8693_v38  ;;  %v8694_v23 = vunpack.i.l.bf16 %v8693_v38  ;;  %v8698_v12 = vpop.permute.xlu1 %8697  ;;  %6867 = vmatmul.mubr.msk.f32.gmra.mrb[6].mxu0 %vm332_vm2, %v10070_v29 }
 0x12d   : > { %v8700_v31 = vunpack.i.h.bf16 %v8698_v12  ;;  %v8699_v7 = vunpack.i.l.bf16 %v8698_v12  ;;  %7790 = vmatpush1.bf16.msra.mxu0 %v7789_v36  ;;  %3807 = vmatprep.mubr.f32.mxu0 %v11156_v18 }
 0x12e   : > { %8982 = vrot.lane.b32.xlu0 %v9662_v41, %s9133_s12  ;;  %v1486_v62 = vsel %vm1478_vm14, %v8694_v23, %v8695_v48  ;;  %v7651_v5 = vpack.c.bf16 %v8695_v48, %v8690_v33  ;;  %v10135_v33 = vld [vmem:[%s11144_s1 + $0xa8] sm:$0xff] }
 0x12f   : > { %v1485_v45 = vsel %vm1478_vm14, %v8700_v31, %v8694_v23  ;;  %v1483_v6 = vsel %vm1478_vm14, %v8699_v7, %v8689_v3  ;;  %8987 = vrot.lane.b32.xlu1 %v9988_v26, %s9131_s9  ;;  %v7643_v10 = vpack.c.bf16 %v1486_v62, %v1484_v39  ;;  %v9065_v7 = vld [vmem:[%s9179_s23 + $0x8] sm:$0xff]  ;;  %v9066_v39 = vld [vmem:[%s9179_s23 + $0x10] sm:$0xff] }
 0x130   : > { %v7645_v41 = vpack.c.bf16 %v1485_v45, %v1483_v6  ;;  %v8703_v1 = vpop.permute.xlu0 %8702  ;;  %v8708_v53 = vpop.permute.xlu1 %8707  ;;  %6876 = vmatmul.mubr.msk.f32.vlgmr.msra.gmra.mrb[0].mxu0 %vm332_vm2, %v10085_v0  ;;  %v9001_v62 = vpack.i.bf16 %v9066_v39, %v9065_v7 }
 0x131   : > { %v8705_v49 = vunpack.i.h.bf16 %v8703_v1  ;;  %v8704_v44 = vunpack.i.l.bf16 %v8703_v1  ;;  %v8710_v63 = vunpack.i.h.bf16 %v8708_v53  ;;  %v8709_v50 = vunpack.i.l.bf16 %v8708_v53  ;;  %7644 = vmatprep.subr.bf16.mxu1 %v7643_v10  ;;  %3813 = vmatprep.mubr.f32.mxu0 %v11156_v18  ;;  %v9068_v1 = vld [vmem:[%s9179_s23 + $0x70] sm:$0xff] }
 0x132   : > { %8992 = vrot.lane.b32.xlu0 %v9981_v20, %s9132_s20  ;;  %7646 = vmatpush1.bf16.msra.mxu1 %v7645_v41  ;;  %v9067_v41 = vld [vmem:[%s9179_s23 + $0x68] sm:$0xff] }
 0x133   : > { %v10116_v51 = vpack.c.bf16 %v8710_v63, %v8705_v49  ;;  %8997 = vrot.lane.b32.xlu1 %v9988_v26, %s9132_s20  ;;  %7648 = vmatprep.subr.bf16.mxu1 %v7647_v47  ;;  %v3960_v16 = vsel %vm3958_vm15, %v8704_v44, %v8705_v49  ;;  %v3962_v14 = vsel %vm3958_vm15, %v8709_v50, %v8710_v63  ;;  %v10153_v49 = vld [vmem:[%s11144_s1 + $0xb0] sm:$0xff] }
 0x134   : > { %v8713_v19 = vpop.permute.xlu0 %8712  ;;  %v8718_v9 = vpop.permute.xlu1 %8717  ;;  %6877 = vmatmul.mubr.msk.f32.gmra.mrb[2].mxu0 %vm332_vm2, %v10105_v27  ;;  %v7799_v8 = vpack.c.bf16 %v3962_v14, %v3960_v16  ;;  %v9026_v53 = vpack.i.bf16 %v9068_v1, %v9067_v41  ;;  %v10194_v1 = vld [vmem:[%s11144_s1 + $0x1e0] sm:$0xff] }
 0x135   : > { %v8715_v2 = vunpack.i.h.bf16 %v8713_v19  ;;  %v8714_v57 = vunpack.i.l.bf16 %v8713_v19  ;;  %6768 = vmatmul.mubr.msk.f32.vlgmr.msra.gmra.mrb[0].mxu1 %vm332_vm2, %v10114_v54  ;;  %3819 = vmatprep.mubr.f32.mxu0 %v11156_v18  ;;  %v8720_v3 = vunpack.i.h.bf16 %v8718_v9  ;;  %v8719_v36 = vunpack.i.l.bf16 %v8718_v9  ;;  %v9069_v9 = vld [vmem:[%s9179_s23] sm:$0xff] }
 0x136   : > { %7800 = vmatprep.subr.bf16.mxu0 %v7799_v8  ;;  %7650 = vmatpush3.bf16.msra.mxu1 %v7647_v47  ;;  %v9070_v8 = vld [vmem:[%s9179_s23 + $0x20] sm:$0xff] }
 0x137   : > { %v3959_v38 = vsel %vm3958_vm15, %v8714_v57, %v8704_v44  ;;  %v3961_v48 = vsel %vm3958_vm15, %v8715_v2, %v8709_v50  ;;  %9007 = vrot.lane.b32.xlu1 %v9006_v40, %s9134_s30  ;;  %7652 = vmatprep.subr.bf16.mxu1 %v7651_v5  ;;  %v10158_v44 = vld [vmem:[%s11144_s1 + $0x1d8] sm:$0xff]  ;;  %v3964_v63 = vsel %vm3958_vm15, %v8719_v36, %v8720_v3 }
 0x138   : > { %v7801_v23 = vpack.c.bf16 %v3961_v48, %v3959_v38  ;;  %v8723_v12 = vpop.permute.xlu0 %8722  ;;  %v8728_v31 = vpop.permute.xlu1 %8727  ;;  %1581 = vmatprep.mubr.f32.mxu1 %v11156_v18  ;;  %6878 = vmatmul.mubr.msk.f32.gmra.mrb[4].mxu0 %vm332_vm2, %v10130_v30  ;;  %v6767_v48 = vld [vmem:[%s11144_s1 + $0xb8] sm:$0xff] }
 0x139   : > { %v8725_v45 = vunpack.i.h.bf16 %v8723_v12  ;;  %v8724_v6 = vunpack.i.l.bf16 %v8723_v12  ;;  %v8730_v10 = vunpack.i.h.bf16 %v8728_v31  ;;  %v8729_v47 = vunpack.i.l.bf16 %v8728_v31  ;;  %6769 = vmatmul.mubr.msk.f32.gmra.mrb[2].mxu1 %vm332_vm2, %v10135_v33  ;;  %3825 = vmatprep.mubr.f32.mxu0 %v11156_v18 }
 0x13a   : > { %7802 = vmatpush1.bf16.msra.mxu0 %v7801_v23  ;;  %7654 = vmatpush3.bf16.msra.mxu1 %v7651_v5  ;;  %v9011_v5 = vpack.i.bf16 %v9070_v8, %v9069_v9  ;;  %v9074_v9 = vld [vmem:[%s9179_s23 + $0x60] sm:$0xff] }
 0x13b   : > { %v10161_v50 = vpack.c.bf16 %v8725_v45, %v8720_v3  ;;  %v3965_v61 = vsel %vm3958_vm15, %v8730_v10, %v8724_v6  ;;  %v3963_v37 = vsel %vm3958_vm15, %v8729_v47, %v8719_v36  ;;  %9017 = vrot.lane.b32.xlu1 %v9981_v20, %s9133_s12  ;;  %7664 = vmatprep.subr.bf16.mxu1 %v9311_v35 }
 0x13c   : > { %v7805_v40 = vpack.c.bf16 %v3965_v61, %v3963_v37  ;;  %v8733_v16 = vpop.permute.xlu0 %8732  ;;  %v8738_v14 = vpop.permute.xlu1 %8737  ;;  %1587 = vmatprep.mubr.f32.mxu1 %v11156_v18  ;;  %9002 = vrot.lane.b32.xlu0 %v9001_v62, %s9134_s30  ;;  %v3966_v19 = vsel %vm3958_vm15, %v8724_v6, %v8725_v45  ;;  %v9071_v45 = vld [vmem:[%s9179_s23 + $0x48] sm:$0xff]  ;;  %v9072_v6 = vld [vmem:[%s9179_s23 + $0x50] sm:$0xff] }
 0x13d   : > { %v8735_v2 = vunpack.i.h.bf16 %v8733_v16  ;;  %v8734_v57 = vunpack.i.l.bf16 %v8733_v16  ;;  %v8740_v3 = vunpack.i.h.bf16 %v8738_v14  ;;  %v8739_v36 = vunpack.i.l.bf16 %v8738_v14  ;;  %6770 = vmatmul.mubr.msk.f32.gmra.mrb[4].mxu1 %vm332_vm2, %v10153_v49  ;;  %6879 = vmatmul.mubr.msk.f32.gmra.mrb[6].mxu0 %vm332_vm2, %v10158_v44 }
 0x13e   : > { %v7803_v38 = vpack.c.bf16 %v3966_v19, %v3964_v63  ;;  %1593 = vmatprep.mubr.f32.mxu1 %v11156_v18  ;;  %4055 = vmatprep.mubr.f32.mxu0 %v11156_v18  ;;  %v9021_v10 = vpack.i.bf16 %v9072_v6, %v9071_v45  ;;  %v9073_v19 = vld [vmem:[%s9179_s23 + $0x40] sm:$0xff] }
 0x13f   : > { %v10182_v23 = vpack.c.bf16 %v8740_v3, %v8735_v2  ;;  %9027 = vrot.lane.b32.xlu1 %v9026_v53, %s9134_s30  ;;  %v4208_v12 = vsel %vm4206_vm0, %v8734_v57, %v8735_v2  ;;  %v4210_v31 = vsel %vm4206_vm0, %v8739_v36, %v8740_v3  ;;  %v9031_v8 = vpack.i.bf16 %v9074_v9, %v9073_v19  ;;  %v10213_v3 = vld [vmem:[%s11144_s1 + $0x1e8] sm:$0xff] }
 0x140   : > { %7804 = vmatprep.subr.bf16.mxu0 %v7803_v38  ;;  %v8743_v7 = vpop.permute.xlu0 %8742  ;;  %v8748_v39 = vpop.permute.xlu1 %8747  ;;  %9012 = vrot.lane.b32.xlu0 %v9011_v5, %s9134_s30  ;;  %v7815_v62 = vpack.c.bf16 %v4210_v31, %v4208_v12  ;;  %v9076_v9 = vld [vmem:[%s11144_s1 + $0xc8] sm:$0xff] }
 0x141   : > { %7806 = vmatpush1.bf16.msra.mxu0 %v7805_v40  ;;  %v8745_v47 = vunpack.i.h.bf16 %v8743_v7  ;;  %v8744_v41 = vunpack.i.l.bf16 %v8743_v7  ;;  %6771 = vmatmul.mubr.msk.f32.gmra.mrb[6].mxu1 %vm332_vm2, %v6767_v48  ;;  %v8750_v53 = vunpack.i.h.bf16 %v8748_v39  ;;  %v8749_v63 = vunpack.i.l.bf16 %v8748_v39 }
 0x142   : > { %7287 = vmatprep.mubr.msk.f32.mxu1 %vm332_vm2, %v10114_v54  ;;  %7816 = vmatprep.subr.bf16.mxu0 %v7815_v62 }
 0x143   : > { %v4207_v61 = vsel %vm4206_vm0, %v8744_v41, %v8734_v57  ;;  %v4209_v37 = vsel %vm4206_vm0, %v8745_v47, %v8739_v36  ;;  %9037 = vrot.lane.b32.xlu1 %v9988_v26, %s9133_s12  ;;  %v4212_v36 = vsel %vm4206_vm0, %v8749_v63, %v8750_v53  ;;  %v9075_v47 = vld [vmem:[%s11144_s1 + $0xc0] sm:$0xff]  ;;  %s7007_s12 = sshll.u32 %s11187_s19, 5 }
 0x144   : > { %v7817_v40 = vpack.c.bf16 %v4209_v37, %v4207_v61  ;;  %6888 = vmatmul.mubr.msk.f32.vlgmr.msra.gmra.mrb[0].mxu0 %vm332_vm2, %v10194_v1  ;;  %v8753_v16 = vpop.permute.xlu0 %8752  ;;  %v8758_v14 = vpop.permute.xlu1 %8757  ;;  %9022 = vrot.lane.b32.xlu0 %v9021_v10, %s9134_s30  ;;  %s244_s16 = scalar_lea.vmem %s11147_s4, %s7007_s12  ;;  %s249_s9 = scalar_lea.vmem %s11148_s5, %s7007_s12 }
 0x145   : > { %v8755_v54 = vunpack.i.h.bf16 %v8753_v16  ;;  %v8754_v5 = vunpack.i.l.bf16 %v8753_v16  ;;  %v8760_v2 = vunpack.i.h.bf16 %v8758_v14  ;;  %v8759_v57 = vunpack.i.l.bf16 %v8758_v14  ;;  %4061 = vmatprep.mubr.f32.mxu0 %v11156_v18  ;;  %7288 = vmatmul.mubr.msk.f32.vlgmr.msra.gmra.mrb[8].mxu1 %vm332_vm2, %v10135_v33  ;;  %v10255_v16 = vld [vmem:[%s11144_s1 + $0x1f8] sm:$0xff] }
 0x146   : > { %7666 = vmatpush3.bf16.msra.mxu1 %v9311_v35  ;;  %7818 = vmatpush1.bf16.msra.mxu0 %v7817_v40 }
 0x147   : > { %v10217_v38 = vpack.c.bf16 %v8755_v54, %v8750_v53  ;;  %v4213_v12 = vsel %vm4206_vm0, %v8760_v2, %v8754_v5  ;;  %v4211_v31 = vsel %vm4206_vm0, %v8759_v57, %v8749_v63  ;;  %7668 = vmatprep.subr.bf16.mxu1 %v9319_v46  ;;  %7290 = vmatprep.mubr.msk.f32.mxu1 %vm332_vm2, %v10153_v49  ;;  %v10233_v49 = vld [vmem:[%s11144_s1 + $0x1f0] sm:$0xff] }
 0x148   : > { %6889 = vmatmul.mubr.msk.f32.gmra.mrb[2].mxu0 %vm332_vm2, %v10213_v3  ;;  %v8763_v33 = vpop.permute.xlu0 %8762  ;;  %v8768_v7 = vpop.permute.xlu1 %8767  ;;  %9032 = vrot.lane.b32.xlu0 %v9031_v8, %s9134_s30  ;;  %v4214_v35 = vsel %vm4206_vm0, %v8754_v5, %v8755_v54  ;;  %v7821_v10 = vpack.c.bf16 %v4213_v12, %v4211_v31 }
 0x149   : > { %v8765_v39 = vunpack.i.h.bf16 %v8763_v33  ;;  %v8764_v62 = vunpack.i.l.bf16 %v8763_v33  ;;  %v8770_v45 = vunpack.i.h.bf16 %v8768_v7  ;;  %v8769_v6 = vunpack.i.l.bf16 %v8768_v7  ;;  %4067 = vmatprep.mubr.f32.mxu0 %v11156_v18  ;;  %7291 = vmatmul.mubr.msk.f32.gmra.mrb[10].mxu1 %vm332_vm2, %v6767_v48 }
 0x14a   : > { %7670 = vmatpush3.bf16.msra.mxu1 %v9319_v46  ;;  %7301 = vmatprep.mubr.msk.f32.mxu1 %vm332_vm2, %v9075_v47  ;;  %v7819_v41 = vpack.c.bf16 %v4214_v35, %v4212_v36  ;;  %v9078_v35 = vld [vmem:[%s11144_s1 + $0xd8] sm:$0xff] }
 0x14b   : > { %v10240_v53 = vpack.c.bf16 %v8770_v45, %v8765_v39  ;;  %7680 = vmatprep.subr.bf16.mxu1 %v9373_v56  ;;  %v4456_v48 = vsel %vm4454_vm1, %v8764_v62, %v8765_v39  ;;  %v4458_v63 = vsel %vm4454_vm1, %v8769_v6, %v8770_v45  ;;  %9047 = vrot.lane.b32.xlu1 %v9988_v26, %s9134_s30 }
 0x14c   : > { %6890 = vmatmul.mubr.msk.f32.gmra.mrb[4].mxu0 %vm332_vm2, %v10233_v49  ;;  %v8773_v46 = vpop.permute.xlu0 %8772  ;;  %7820 = vmatprep.subr.bf16.mxu0 %v7819_v41  ;;  %v7831_v14 = vpack.c.bf16 %v4458_v63, %v4456_v48 }
 0x14d   : > { %v8775_v61 = vunpack.i.h.bf16 %v8773_v46  ;;  %v8774_v37 = vunpack.i.l.bf16 %v8773_v46  ;;  %v8778_v40 = vpop.permute.xlu1 %8777  ;;  %4073 = vmatprep.mubr.f32.mxu0 %v11156_v18  ;;  %9042 = vrot.lane.b32.xlu0 %v9981_v20, %s9134_s30  ;;  %v9077_v20 = vld [vmem:[%s11144_s1 + $0xd0] sm:$0xff] }
 0x14e   : > { %v8780_v26 = vunpack.i.h.bf16 %v8778_v40  ;;  %v8779_v19 = vunpack.i.l.bf16 %v8778_v40  ;;  %7302 = vmatmul.mubr.msk.f32.vlgmr.msra.gmra.mrb[8].mxu1 %vm332_vm2, %v9076_v9  ;;  %7822 = vmatpush1.bf16.msra.mxu0 %v7821_v10 }
 0x14f   : > { %v4455_v8 = vsel %vm4454_vm1, %v8774_v37, %v8764_v62  ;;  %v4457_v54 = vsel %vm4454_vm1, %v8775_v61, %v8769_v6  ;;  %7682 = vmatpush3.bf16.msra.mxu1 %v9373_v56  ;;  %7304 = vmatprep.mubr.msk.f32.mxu1 %vm332_vm2, %v9077_v20  ;;  %v10275_v56 = vld [vmem:[%s11144_s1 + $0x200] sm:$0xff]  ;;  %v10299_v61 = vld [vmem:[%s11144_s1 + $0x208] sm:$0xff] }
 0x150   : > { %6891 = vmatmul.mubr.msk.f32.gmra.mrb[6].mxu0 %vm332_vm2, %v10255_v16  ;;  %7684 = vmatprep.subr.bf16.mxu1 %v9408_v28  ;;  %v8783_v5 = vpop.permute.xlu0 %8782  ;;  %v7833_v2 = vpack.c.bf16 %v4457_v54, %v4455_v8  ;;  %v4460_v31 = vsel %vm4454_vm1, %v8779_v19, %v8780_v26  ;;  %v9079_v62 = vld [vmem:[%s11144_s1 + $0xe0] sm:$0xff] }
 0x151   : > { %v8785_v57 = vunpack.i.h.bf16 %v8783_v5  ;;  %v8784_v36 = vunpack.i.l.bf16 %v8783_v5  ;;  %v8788_v12 = vpop.permute.xlu1 %8787  ;;  %4303 = vmatprep.mubr.f32.mxu0 %v11156_v18  ;;  %7832 = vmatprep.subr.bf16.mxu0 %v7831_v14  ;;  %v9080_v14 = vld [vmem:[%s11144_s1 + $0xe8] sm:$0xff] }
 0x152   : > { %v8790_v33 = vunpack.i.h.bf16 %v8788_v12  ;;  %v8789_v7 = vunpack.i.l.bf16 %v8788_v12  ;;  %7305 = vmatmul.mubr.msk.f32.gmra.mrb[10].mxu1 %vm332_vm2, %v9078_v35 }
 0x153   : > { %v10282_v39 = vpack.c.bf16 %v8785_v57, %v8780_v26  ;;  %7686 = vmatpush3.bf16.msra.mxu1 %v9408_v28  ;;  %7315 = vmatprep.mubr.msk.f32.mxu1 %vm332_vm2, %v9079_v62  ;;  %v4462_v45 = vsel %vm4454_vm1, %v8784_v36, %v8785_v57  ;;  %v9081_v26 = vld [vmem:[%s11144_s1 + $0xf0] sm:$0xff] }
 0x154   : > { %v4461_v6 = vsel %vm4454_vm1, %v8790_v33, %v8784_v36  ;;  %v4459_v10 = vsel %vm4454_vm1, %v8789_v7, %v8779_v19  ;;  %6900 = vmatmul.mubr.msk.f32.vlgmr.msra.gmra.mrb[0].mxu0 %vm332_vm2, %v10275_v56  ;;  %7696 = vmatprep.subr.bf16.mxu1 %v9429_v52  ;;  %v8793_v47 = vpop.permute.xlu0 %8792  ;;  %v7835_v28 = vpack.c.bf16 %v4462_v45, %v4460_v31  ;;  %v9082_v36 = vld [vmem:[%s11144_s1 + $0xf8] sm:$0xff]  ;;  %v9083_v33 = vld [vmem:[%s11144_s1 + $0x100] sm:$0xff] }
 0x155   : > { %v7837_v41 = vpack.c.bf16 %v4461_v6, %v4459_v10  ;;  %v8795_v48 = vunpack.i.h.bf16 %v8793_v47  ;;  %v8794_v63 = vunpack.i.l.bf16 %v8793_v47  ;;  %v8798_v46 = vpop.permute.xlu1 %8797  ;;  %4309 = vmatprep.mubr.f32.mxu0 %v11156_v18  ;;  %7834 = vmatpush1.bf16.msra.mxu0 %v7833_v2 }
 0x156   : > { %v8800_v37 = vunpack.i.h.bf16 %v8798_v46  ;;  %v8799_v40 = vunpack.i.l.bf16 %v8798_v46  ;;  %7316 = vmatmul.mubr.msk.f32.vlgmr.msra.gmra.mrb[8].mxu1 %vm332_vm2, %v9080_v14  ;;  %7836 = vmatprep.subr.bf16.mxu0 %v7835_v28  ;;  %v9085_v46 = vld [vmem:[%s11144_s1 + $0x110] sm:$0xff] }
 0x157   : > { %7698 = vmatpush3.bf16.msra.mxu1 %v9429_v52  ;;  %7318 = vmatprep.mubr.msk.f32.mxu1 %vm332_vm2, %v9081_v26  ;;  %v4704_v19 = vsel %vm4702_vm3, %v8794_v63, %v8795_v48  ;;  %v10321_v52 = vld [vmem:[%s11144_s1 + $0x210] sm:$0xff] }
 0x158   : > { %v10311_v9 = vpack.c.bf16 %v8800_v37, %v8795_v48  ;;  %6901 = vmatmul.mubr.msk.f32.gmra.mrb[2].mxu0 %vm332_vm2, %v10299_v61  ;;  %7700 = vmatprep.subr.bf16.mxu1 %v9458_v22  ;;  %v8803_v8 = vpop.permute.xlu0 %8802  ;;  %v4706_v54 = vsel %vm4702_vm3, %v8799_v40, %v8800_v37 }
 0x159   : > { %v8808_v20 = vpop.permute.xlu1 %8807  ;;  %4315 = vmatprep.mubr.f32.mxu0 %v11156_v18  ;;  %7838 = vmatpush1.bf16.msra.mxu0 %v7837_v41  ;;  %v7847_v5 = vpack.c.bf16 %v4706_v54, %v4704_v19  ;;  %v8805_v2 = vunpack.i.h.bf16 %v8803_v8  ;;  %v8804_v57 = vunpack.i.l.bf16 %v8803_v8  ;;  %v9084_v41 = vld [vmem:[%s11144_s1 + $0x108] sm:$0xff]  ;;  %v10364_v54 = vld [vmem:[%s11144_s1 + $0x220] sm:$0xff] }
 0x15a   : > { %7319 = vmatmul.mubr.msk.f32.gmra.mrb[10].mxu1 %vm332_vm2, %v9082_v36  ;;  %v8810_v12 = vunpack.i.h.bf16 %v8808_v20  ;;  %v8809_v31 = vunpack.i.l.bf16 %v8808_v20 }
 0x15b   : > { %7702 = vmatpush3.bf16.msra.mxu1 %v9458_v22  ;;  %7329 = vmatprep.mubr.msk.f32.mxu1 %vm332_vm2, %v9083_v33  ;;  %v10339_v22 = vld [vmem:[%s11144_s1 + $0x218] sm:$0xff]  ;;  %v4703_v6 = vsel %vm4702_vm3, %v8804_v57, %v8794_v63  ;;  %v4705_v10 = vsel %vm4702_vm3, %v8805_v2, %v8799_v40 }
 0x15c   : > { %6902 = vmatmul.mubr.msk.f32.gmra.mrb[4].mxu0 %vm332_vm2, %v10321_v52  ;;  %7712 = vmatprep.subr.bf16.mxu1 %v9478_v15  ;;  %v8813_v7 = vpop.permute.xlu0 %8812  ;;  %v4708_v63 = vsel %vm4702_vm3, %v8809_v31, %v8810_v12  ;;  %v7849_v14 = vpack.c.bf16 %v4705_v10, %v4703_v6  ;;  %v9086_v57 = vld [vmem:[%s11144_s1 + $0x118] sm:$0xff]  ;;  %v9088_v6 = vld [vmem:[%s11144_s1 + $0x128] sm:$0xff] }
 0x15d   : > { %v8815_v35 = vunpack.i.h.bf16 %v8813_v7  ;;  %v8814_v62 = vunpack.i.l.bf16 %v8813_v7  ;;  %v8818_v45 = vpop.permute.xlu1 %8817  ;;  %4321 = vmatprep.mubr.f32.mxu0 %v11156_v18  ;;  %7848 = vmatprep.subr.bf16.mxu0 %v7847_v5 }
 0x15e   : > { %v8820_v47 = vunpack.i.h.bf16 %v8818_v45  ;;  %v8819_v28 = vunpack.i.l.bf16 %v8818_v45  ;;  %7330 = vmatmul.mubr.msk.f32.vlgmr.msra.gmra.mrb[8].mxu1 %vm332_vm2, %v9084_v41  ;;  %v10389_v45 = vld [vmem:[%s11144_s1 + $0x228] sm:$0xff] }
 0x15f   : > { %v10347_v48 = vpack.c.bf16 %v8815_v35, %v8810_v12  ;;  %7714 = vmatpush3.bf16.msra.mxu1 %v9478_v15  ;;  %7332 = vmatprep.mubr.msk.f32.mxu1 %vm332_vm2, %v9085_v46  ;;  %v4710_v37 = vsel %vm4702_vm3, %v8814_v62, %v8815_v35  ;;  %v9087_v12 = vld [vmem:[%s11144_s1 + $0x120] sm:$0xff] }
 0x160   : > { %6903 = vmatmul.mubr.msk.f32.gmra.mrb[6].mxu0 %vm332_vm2, %v10339_v22  ;;  %7716 = vmatprep.subr.bf16.mxu1 %v9519_v59  ;;  %v8823_v40 = vpop.permute.xlu0 %8822  ;;  %v4709_v15 = vsel %vm4702_vm3, %v8820_v47, %v8814_v62  ;;  %v4707_v20 = vsel %vm4702_vm3, %v8819_v28, %v8809_v31  ;;  %v7851_v36 = vpack.c.bf16 %v4710_v37, %v4708_v63  ;;  %v9089_v47 = vld [vmem:[%s11144_s1 + $0x130] sm:$0xff] }
 0x161   : > { %v8825_v26 = vunpack.i.h.bf16 %v8823_v40  ;;  %v8824_v19 = vunpack.i.l.bf16 %v8823_v40  ;;  %v8828_v8 = vpop.permute.xlu1 %8827  ;;  %4551 = vmatprep.mubr.f32.mxu0 %v11156_v18  ;;  %v7853_v62 = vpack.c.bf16 %v4709_v15, %v4707_v20 }
 0x162   : > { %v8830_v5 = vunpack.i.h.bf16 %v8828_v8  ;;  %v8829_v2 = vunpack.i.l.bf16 %v8828_v8  ;;  %7333 = vmatmul.mubr.msk.f32.gmra.mrb[10].mxu1 %vm332_vm2, %v9086_v57  ;;  %v9091_v8 = vld [vmem:[%s11144_s1 + $0x140] sm:$0xff] }
 0x163   : > { %7718 = vmatpush3.bf16.msra.mxu1 %v9519_v59  ;;  %7343 = vmatprep.mubr.msk.f32.mxu1 %vm332_vm2, %v9087_v12  ;;  %v4952_v33 = vsel %vm4950_vm4, %v8824_v19, %v8825_v26 }
 0x164   : > { %v10377_v31 = vpack.c.bf16 %v8830_v5, %v8825_v26  ;;  %6912 = vmatmul.mubr.msk.f32.vlgmr.msra.gmra.mrb[0].mxu0 %vm332_vm2, %v10364_v54  ;;  %7728 = vmatprep.subr.bf16.mxu1 %v9618_v60  ;;  %v8833_v7 = vpop.permute.xlu0 %8832  ;;  %v4954_v35 = vsel %vm4950_vm4, %v8829_v2, %v8830_v5  ;;  %v9090_v26 = vld [vmem:[%s11144_s1 + $0x138] sm:$0xff] }
 0x165   : > { %v10383_v59 = vpop.permute.xlu1 %8837  ;;  %4557 = vmatprep.mubr.f32.mxu0 %v11156_v18  ;;  %7850 = vmatpush1.bf16.msra.mxu0 %v7849_v14  ;;  %v7863_v10 = vpack.c.bf16 %v4954_v35, %v4952_v33  ;;  %v8835_v41 = vunpack.i.h.bf16 %v8833_v7  ;;  %v8834_v46 = vunpack.i.l.bf16 %v8833_v7  ;;  %v9092_v7 = vld [vmem:[%s11144_s1 + $0x148] sm:$0xff] }
 0x166   : > { %7344 = vmatmul.mubr.msk.f32.vlgmr.msra.gmra.mrb[8].mxu1 %vm332_vm2, %v9088_v6  ;;  %7852 = vmatprep.subr.bf16.mxu0 %v7851_v36  ;;  %v11152_v37 = vunpack.i.h.bf16 %v10383_v59  ;;  %v8839_v40 = vunpack.i.l.bf16 %v10383_v59 }
 0x167   : > { %7730 = vmatpush3.bf16.msra.mxu1 %v9618_v60  ;;  %7346 = vmatprep.mubr.msk.f32.mxu1 %vm332_vm2, %v9089_v47  ;;  %v10409_v60 = vld [vmem:[%s11144_s1 + $0x230] sm:$0xff]  ;;  %v4951_v5 = vsel %vm4950_vm4, %v8834_v46, %v8824_v19  ;;  %v4953_v57 = vsel %vm4950_vm4, %v8835_v41, %v8829_v2 }
 0x168   : > { %6913 = vmatmul.mubr.msk.f32.gmra.mrb[2].mxu0 %vm332_vm2, %v10389_v45  ;;  %7732 = vmatprep.subr.bf16.mxu1 %v9668_v32  ;;  %v10403_v28 = vpop.permute.xlu0 %8842  ;;  %v4956_v19 = vsel %vm4950_vm4, %v8839_v40, %v11152_v37  ;;  %v9093_v47 = vld [vmem:[%s11144_s1 + $0x150] sm:$0xff]  ;;  %v7865_v46 = vpack.c.bf16 %v4953_v57, %v4951_v5  ;;  %v9095_v57 = vld [vmem:[%s11144_s1 + $0x160] sm:$0xff] }
 0x169   : > { %v8848_v63 = vpop.permute.xlu1 %8847  ;;  %4563 = vmatprep.mubr.f32.mxu0 %v11156_v18  ;;  %7854 = vmatpush1.bf16.msra.mxu0 %v7853_v62  ;;  %v11151_v14 = vunpack.i.h.bf16 %v10403_v28  ;;  %v8844_v15 = vunpack.i.l.bf16 %v10403_v28 }
 0x16a   : > { %7347 = vmatmul.mubr.msk.f32.gmra.mrb[10].mxu1 %vm332_vm2, %v9090_v26  ;;  %7864 = vmatprep.subr.bf16.mxu0 %v7863_v10  ;;  %v8850_v12 = vunpack.i.h.bf16 %v8848_v63  ;;  %v8849_v33 = vunpack.i.l.bf16 %v8848_v63 }
 0x16b   : > { %7734 = vmatpush3.bf16.msra.mxu1 %v9668_v32  ;;  %7357 = vmatprep.mubr.msk.f32.mxu1 %vm332_vm2, %v9091_v8  ;;  %v10437_v32 = vld [vmem:[%s11144_s1 + $0x238] sm:$0xff]  ;;  %v4958_v2 = vsel %vm4950_vm4, %v8844_v15, %v11151_v14  ;;  %v9100_v14 = vld [vmem:[%s11144_s1 + $0x188] sm:$0xff] }
 0x16c   : > { %6914 = vmatmul.mubr.msk.f32.gmra.mrb[4].mxu0 %vm332_vm2, %v10409_v60  ;;  %7744 = vmatprep.subr.bf16.mxu1 %v9693_v58  ;;  %v10427_v20 = vpop.permute.xlu0 %8852  ;;  %v4957_v26 = vsel %vm4950_vm4, %v8850_v12, %v8844_v15  ;;  %v4955_v8 = vsel %vm4950_vm4, %v8849_v33, %v8839_v40  ;;  %v7867_v5 = vpack.c.bf16 %v4958_v2, %v4956_v19  ;;  %v10495_v19 = vld [vmem:[%s11144_s1 + $0x248] sm:$0xff] }
 0x16d   : > { %v10431_v36 = vpop.permute.xlu1 %8857  ;;  %4569 = vmatprep.mubr.f32.mxu0 %v11156_v18  ;;  %v11150_v35 = vunpack.i.h.bf16 %v10427_v20  ;;  %v8854_v62 = vunpack.i.l.bf16 %v10427_v20  ;;  %v7869_v12 = vpack.c.bf16 %v4957_v26, %v4955_v8  ;;  %v9096_v2 = vld [vmem:[%s11144_s1 + $0x168] sm:$0xff]  ;;  %v9097_v26 = vld [vmem:[%s11144_s1 + $0x170] sm:$0xff] }
 0x16e   : > { %7358 = vmatmul.mubr.msk.f32.vlgmr.msra.gmra.mrb[8].mxu1 %vm332_vm2, %v9092_v7  ;;  %v11149_v6 = vunpack.i.h.bf16 %v10431_v36  ;;  %v8859_v10 = vunpack.i.l.bf16 %v10431_v36  ;;  %v9094_v7 = vld [vmem:[%s11144_s1 + $0x158] sm:$0xff] }
 0x16f   : > { %7746 = vmatpush3.bf16.msra.mxu1 %v9693_v58  ;;  %7360 = vmatprep.mubr.msk.f32.mxu1 %vm332_vm2, %v9093_v47  ;;  %v10467_v58 = vld [vmem:[%s11144_s1 + $0x240] sm:$0xff]  ;;  %v5212_v15 = vsel %vm5210_vm5, %v8854_v62, %v11150_v35 }
 0x170   : > { %6915 = vmatmul.mubr.msk.f32.gmra.mrb[6].mxu0 %vm332_vm2, %v10437_v32  ;;  %7748 = vmatprep.subr.bf16.mxu1 %v9756_v43  ;;  %v8863_v41 = vpop.permute.xlu0 %8862  ;;  %v5215_v40 = vsel %vm5210_vm5, %v8859_v10, %v11149_v6 }
 0x171   : > { %v10461_v63 = vpop.permute.xlu1 %8867  ;;  %4799 = vmatprep.mubr.f32.mxu0 %v11156_v18  ;;  %v7879_v47 = vpack.c.bf16 %v5215_v40, %v5212_v15  ;;  %v8865_v8 = vunpack.i.h.bf16 %v8863_v41 }
 0x172   : > { %7361 = vmatmul.mubr.msk.f32.gmra.mrb[10].mxu1 %vm332_vm2, %v9094_v7  ;;  %v8864_v7 = vunpack.i.l.bf16 %v8863_v41  ;;  %v8869_v15 = vunpack.i.l.bf16 %v10461_v63  ;;  %v9098_v41 = vld [vmem:[%s11144_s1 + $0x178] sm:$0xff] }
 0x173   : > { %7750 = vmatpush3.bf16.msra.mxu1 %v9756_v43  ;;  %7371 = vmatprep.mubr.msk.f32.mxu1 %vm332_vm2, %v9095_v57 }
 0x174   : > { %6924 = vmatmul.mubr.msk.f32.vlgmr.msra.gmra.mrb[0].mxu0 %vm332_vm2, %v10467_v58  ;;  %7760 = vmatprep.subr.bf16.mxu1 %v9809_v24  ;;  %v10489_v43 = vpop.permute.xlu0 %8872  ;;  %v5211_v6 = vsel %vm5210_vm5, %v8864_v7, %v8854_v62 }
 0x175   : > { %11165 = vst [vmem:[#allocation2_spill] sm:$0xff] %v10489_v43  ;;  %v8878_v33 = vpop.permute.xlu1 %8877  ;;  %4805 = vmatprep.mubr.f32.mxu0 %v11156_v18  ;;  %7866 = vmatpush1.bf16.msra.mxu0 %v7865_v46  ;;  %v11153_v40 = vunpack.i.h.bf16 %v10489_v43 }
 0x176   : > { %7372 = vmatmul.mubr.msk.f32.vlgmr.msra.gmra.mrb[8].mxu1 %vm332_vm2, %v9096_v2  ;;  %7868 = vmatprep.subr.bf16.mxu0 %v7867_v5  ;;  %v11154_v5 = vunpack.i.h.bf16 %v10461_v63  ;;  %v8874_v2 = vunpack.i.l.bf16 %v10489_v43  ;;  %v8879_v35 = vunpack.i.l.bf16 %v8878_v33 }
 0x177   : > { %7762 = vmatpush3.bf16.msra.mxu1 %v9809_v24  ;;  %7374 = vmatprep.mubr.msk.f32.mxu1 %vm332_vm2, %v9097_v26  ;;  %v10517_v24 = vld [vmem:[%s11144_s1 + $0x250] sm:$0xff] }
 0x178   : > { %6925 = vmatmul.mubr.msk.f32.gmra.mrb[2].mxu0 %vm332_vm2, %v10495_v19  ;;  %7764 = vmatprep.subr.bf16.mxu1 %v9842_v13  ;;  %v10509_v46 = vpop.permute.xlu0 %8882  ;;  %v5218_v62 = vsel %vm5210_vm5, %v8869_v15, %v11154_v5 }
 0x179   : > { %v10511_v57 = vpop.permute.xlu1 %8887  ;;  %4811 = vmatprep.mubr.f32.mxu0 %v11156_v18  ;;  %7870 = vmatpush1.bf16.msra.mxu0 %v7869_v12  ;;  %v9099_v12 = vld [vmem:[%s11144_s1 + $0x180] sm:$0xff]  ;;  %v8884_v7 = vunpack.i.l.bf16 %v10509_v46 }
 0x17a   : > { %7375 = vmatmul.mubr.msk.f32.gmra.mrb[10].mxu1 %vm332_vm2, %v9098_v41  ;;  %7880 = vmatprep.subr.bf16.mxu0 %v7879_v47  ;;  %v5214_v41 = vsel %vm5210_vm5, %v8865_v8, %v8859_v10  ;;  %v5221_v10 = vsel %vm5210_vm5, %v8874_v2, %v11153_v40  ;;  %v8889_v37 = vunpack.i.l.bf16 %v10511_v57  ;;  %v5217_v8 = vsel %vm5210_vm5, %v8879_v35, %v8869_v15 }
 0x17b   : > { %7766 = vmatpush3.bf16.msra.mxu1 %v9842_v13  ;;  %7385 = vmatprep.mubr.msk.f32.mxu1 %vm332_vm2, %v9099_v12  ;;  %v10545_v13 = vld [vmem:[%s11144_s1 + $0x258] sm:$0xff]  ;;  %v8880_v12 = vunpack.i.h.bf16 %v8878_v33  ;;  %v7881_v5 = vpack.c.bf16 %v5214_v41, %v5211_v6  ;;  %v11167_v6 = vunpack.i.h.bf16 %v10509_v46  ;;  %v11169_v15 = vmov 0.0  }
 0x17c   : > { %6926 = vmatmul.mubr.msk.f32.gmra.mrb[4].mxu0 %vm332_vm2, %v10517_v24  ;;  %7776 = vmatprep.subr.bf16.mxu1 %v9921_v25  ;;  %v10535_v26 = vpop.permute.xlu0 %8892  ;;  %11166 = vst [vmem:[#allocation3_spill] sm:$0xff] %v10545_v13 }
 0x17d   : > { %v10539_v47 = vpop.permute.xlu1 %8897  ;;  %4817 = vmatprep.mubr.f32.mxu0 %v11156_v18  ;;  %v5472_v41 = vsel %vm5470_vm6, %v8884_v7, %v11167_v6 }
 0x17e   : > { %7386 = vmatmul.mubr.msk.f32.vlgmr.msra.gmra.mrb[8].mxu1 %vm332_vm2, %v9100_v14  ;;  %v9101_v14 = vld [vmem:[%s11144_s1 + $0x190] sm:$0xff] }
 0x17f   : > { %7778 = vmatpush3.bf16.msra.mxu1 %v9921_v25  ;;  %7388 = vmatprep.mubr.msk.f32.mxu1 %vm332_vm2, %v9101_v14  ;;  %v10577_v25 = vld [vmem:[%s11144_s1 + $0x260] sm:$0xff]  ;;  %v5220_v14 = vsel %vm5210_vm5, %v8880_v12, %v8874_v2  ;;  %v8895_v12 = vunpack.i.h.bf16 %v10535_v26 }
 0x180   : > { %6927 = vmatmul.mubr.msk.f32.gmra.mrb[6].mxu0 %vm332_vm2, %v10545_v13  ;;  %7780 = vmatprep.subr.bf16.mxu1 %v9950_v42  ;;  %v10569_v40 = vpop.permute.xlu0 %8902  ;;  %v7883_v13 = vpack.c.bf16 %v5221_v10, %v5218_v62  ;;  %v7885_v35 = vpack.c.bf16 %v5220_v14, %v5217_v8 }
 0x181   : > { %v10571_v33 = vpop.permute.xlu1 %8907  ;;  %5047 = vmatprep.mubr.f32.mxu0 %v11156_v18  ;;  %v11168_v18 = vunpack.i.h.bf16 %v10511_v57  ;;  %v5474_v8 = vsel %vm5470_vm6, %v8895_v12, %v8889_v37 }
 0x182   : > { %7389 = vmatmul.mubr.msk.f32.gmra.mrb[10].mxu1 %vm332_vm2, %v9972_v21 }
 0x183   : > { %7782 = vmatpush3.bf16.msra.mxu1 %v9950_v42  ;;  %7399 = vmatprep.mubr.msk.f32.mxu1 %vm332_vm2, %v10003_v34  ;;  %v5475_v43 = vsel %vm5470_vm6, %v8889_v37, %v11168_v18  ;;  %v10603_v34 = vld [vmem:[%s11144_s1 + $0x268] sm:$0xff] }
 0x184   : > { %6936 = vmatmul.mubr.msk.f32.vlgmr.msra.gmra.mrb[0].mxu0 %vm332_vm2, %v10577_v25  ;;  %7792 = vmatprep.subr.bf16.mxu1 %v9984_v4  ;;  %v10595_v21 = vpop.permute.xlu0 %8912  ;;  %v7895_v18 = vpack.c.bf16 %v5475_v43, %v5472_v41  ;;  %v11159_v43 = vunpack.i.h.bf16 %v10569_v40 }
 0x185   : > { %v10597_v42 = vpop.permute.xlu1 %8917  ;;  %5053 = vmatprep.mubr.f32.mxu0 %v11169_v15  ;;  %7882 = vmatpush1.bf16.msra.mxu0 %v7881_v5  ;;  %v8894_v5 = vunpack.i.l.bf16 %v10535_v26  ;;  %v8915_v6 = vunpack.i.h.bf16 %v10595_v21  ;;  %v8914_v41 = vunpack.i.l.bf16 %v10595_v21 }
 0x186   : > { %7400 = vmatmul.mubr.msk.f32.vlgmr.msra.gmra.mrb[8].mxu1 %vm332_vm2, %v10027_v11  ;;  %7884 = vmatprep.subr.bf16.mxu0 %v7883_v13  ;;  %v8900_v11 = vunpack.i.h.bf16 %v10539_v47  ;;  %v8904_v13 = vunpack.i.l.bf16 %v10569_v40 }
 0x187   : > { %7794 = vmatpush3.bf16.msra.mxu1 %v9984_v4  ;;  %7402 = vmatprep.mubr.msk.f32.mxu1 %vm332_vm2, %v10051_v55  ;;  %v10623_v4 = vld [vmem:[%s11144_s1 + $0x270] sm:$0xff]  ;;  %v8899_v55 = vunpack.i.l.bf16 %v10539_v47  ;;  %v5471_v10 = vsel %vm5470_vm6, %v8894_v5, %v8884_v7 }
 0x188   : > { %6937 = vmatmul.mubr.msk.f32.gmra.mrb[2].mxu0 %vm332_vm2, %v10603_v34  ;;  %7796 = vmatprep.subr.bf16.mxu1 %v10056_v17  ;;  %v10613_v2 = vpop.permute.xlu0 %8922  ;;  %v5481_v7 = vsel %vm5470_vm6, %v8904_v13, %v11159_v43 }
 0x189   : > { %v10617_v62 = vpop.permute.xlu1 %8927  ;;  %5059 = vmatprep.mubr.f32.mxu0 %v11169_v15  ;;  %7886 = vmatpush1.bf16.msra.mxu0 %v7885_v35  ;;  %v5478_v37 = vsel %vm5470_vm6, %v8899_v55, %v8900_v11  ;;  %v8920_v35 = vunpack.i.h.bf16 %v10597_v42 }
 0x18a   : > { %7403 = vmatmul.mubr.msk.f32.gmra.mrb[10].mxu1 %vm332_vm2, %v10070_v29  ;;  %7896 = vmatprep.subr.bf16.mxu0 %v7895_v18  ;;  %v8910_v29 = vunpack.i.h.bf16 %v10571_v33  ;;  %v8919_v18 = vunpack.i.l.bf16 %v10597_v42  ;;  %v7899_v43 = vpack.c.bf16 %v5481_v7, %v5478_v37  ;;  %v8924_v37 = vunpack.i.l.bf16 %v10613_v2  ;;  %v6980_v42 = vld [vmem:[%s11144_s1 + $0x2e0] sm:$0xff] }
 0x18b   : > { %7798 = vmatpush3.bf16.msra.mxu1 %v10056_v17  ;;  %7413 = vmatprep.mubr.msk.f32.mxu1 %vm332_vm2, %v10085_v0  ;;  %v10647_v17 = vld [vmem:[%s11144_s1 + $0x278] sm:$0xff]  ;;  %v8909_v0 = vunpack.i.l.bf16 %v10571_v33  ;;  %v7897_v33 = vpack.c.bf16 %v5474_v8, %v5471_v10  ;;  %v5732_v10 = vsel %vm5730_vm7, %v8914_v41, %v8915_v6 }
 0x18c   : > { %6938 = vmatmul.mubr.msk.f32.gmra.mrb[4].mxu0 %vm332_vm2, %v10623_v4  ;;  %7808 = vmatprep.subr.bf16.mxu1 %v10116_v51  ;;  %v10637_v26 = vpop.permute.xlu0 %8932  ;;  %v5735_v8 = vsel %vm5730_vm7, %v8919_v18, %v8920_v35 }
 0x18d   : > { %v10641_v14 = vpop.permute.xlu1 %8937  ;;  %5065 = vmatprep.mubr.f32.mxu0 %v11169_v15  ;;  %v5477_v5 = vsel %vm5470_vm6, %v8909_v0, %v8899_v55  ;;  %v8925_v0 = vunpack.i.h.bf16 %v10613_v2  ;;  %v5731_v2 = vsel %vm5730_vm7, %v8924_v37, %v8914_v41 }
 0x18e   : > { %7414 = vmatmul.mubr.msk.f32.vlgmr.msra.gmra.mrb[8].mxu1 %vm332_vm2, %v10105_v27 }
 0x18f   : > { %7810 = vmatpush3.bf16.msra.mxu1 %v10116_v51  ;;  %7416 = vmatprep.mubr.msk.f32.mxu1 %vm332_vm2, %v10130_v30  ;;  %v10677_v51 = vld [vmem:[%s11144_s1 + $0x280] sm:$0xff]  ;;  %v5480_v30 = vsel %vm5470_vm6, %v8910_v29, %v8904_v13  ;;  %v7911_v13 = vpack.c.bf16 %v5735_v8, %v5732_v10 }
 0x190   : > { %6939 = vmatmul.mubr.msk.f32.gmra.mrb[6].mxu0 %vm332_vm2, %v10647_v17  ;;  %7812 = vmatprep.subr.bf16.mxu1 %v10161_v50  ;;  %v10669_v27 = vpop.permute.xlu0 %8942  ;;  %v7901_v55 = vpack.c.bf16 %v5480_v30, %v5477_v5  ;;  %v5734_v30 = vsel %vm5730_vm7, %v8925_v0, %v8919_v18  ;;  %v10773_v0 = vld [vmem:[%s11144_s1 + $0x2a0] sm:$0xff] }
 0x191   : > { %v10671_v12 = vpop.permute.xlu1 %8947  ;;  %5311 = vmatprep.mubr.f32.mxu0 %v11169_v15 }
 0x192   : > { %7417 = vmatmul.mubr.msk.f32.gmra.mrb[10].mxu1 %vm332_vm2, %v10158_v44 }
 0x193   : > { %7814 = vmatpush3.bf16.msra.mxu1 %v10161_v50  ;;  %7427 = vmatprep.mubr.msk.f32.mxu1 %vm332_vm2, %v10194_v1  ;;  %v10703_v1 = vld [vmem:[%s11144_s1 + $0x288] sm:$0xff] }
 0x194   : > { %6948 = vmatmul.mubr.msk.f32.vlgmr.msra.gmra.mrb[0].mxu0 %vm332_vm2, %v10677_v51  ;;  %7824 = vmatprep.subr.bf16.mxu1 %v10182_v23  ;;  %v10695_v44 = vpop.permute.xlu0 %8952 }
 0x195   : > { %v10697_v50 = vpop.permute.xlu1 %8957  ;;  %5317 = vmatprep.mubr.f32.mxu0 %v11169_v15  ;;  %7898 = vmatpush1.bf16.msra.mxu0 %v7897_v33  ;;  %v8934_v33 = vunpack.i.l.bf16 %v10637_v26  ;;  %v11164_v8 = vunpack.i.h.bf16 %v10695_v44 }
 0x196   : > { %7428 = vmatmul.mubr.msk.f32.vlgmr.msra.gmra.mrb[8].mxu1 %vm332_vm2, %v10213_v3  ;;  %7900 = vmatprep.subr.bf16.mxu0 %v7899_v43  ;;  %v8930_v3 = vunpack.i.h.bf16 %v10617_v62  ;;  %v11160_v43 = vunpack.i.h.bf16 %v10637_v26 }
 0x197   : > { %7826 = vmatpush3.bf16.msra.mxu1 %v10182_v23  ;;  %7430 = vmatprep.mubr.msk.f32.mxu1 %vm332_vm2, %v10233_v49  ;;  %v10723_v23 = vld [vmem:[%s11144_s1 + $0x290] sm:$0xff]  ;;  %v8929_v49 = vunpack.i.l.bf16 %v10617_v62 }
 0x198   : > { %6949 = vmatmul.mubr.msk.f32.gmra.mrb[2].mxu0 %vm332_vm2, %v10703_v1  ;;  %7828 = vmatprep.subr.bf16.mxu1 %v10217_v38  ;;  %v10713_v29 = vpop.permute.xlu0 %8962  ;;  %v5741_v18 = vsel %vm5730_vm7, %v8934_v33, %v11160_v43 }
 0x199   : > { %v10717_v7 = vpop.permute.xlu1 %8967  ;;  %5323 = vmatprep.mubr.f32.mxu0 %v11169_v15  ;;  %7902 = vmatpush1.bf16.msra.mxu0 %v7901_v55  ;;  %v5738_v41 = vsel %vm5730_vm7, %v8929_v49, %v8930_v3  ;;  %v8954_v55 = vunpack.i.l.bf16 %v10695_v44 }
 0x19a   : > { %7431 = vmatmul.mubr.msk.f32.gmra.mrb[10].mxu1 %vm332_vm2, %v10255_v16  ;;  %7912 = vmatprep.subr.bf16.mxu0 %v7911_v13  ;;  %v8940_v16 = vunpack.i.h.bf16 %v10641_v14  ;;  %v11163_v13 = vunpack.i.h.bf16 %v10697_v50 }
 0x19b   : > { %7830 = vmatpush3.bf16.msra.mxu1 %v10217_v38  ;;  %7441 = vmatprep.mubr.msk.f32.mxu1 %vm332_vm2, %v10275_v56  ;;  %v10745_v38 = vld [vmem:[%s11144_s1 + $0x298] sm:$0xff]  ;;  %v8939_v56 = vunpack.i.l.bf16 %v10641_v14  ;;  %v8959_v14 = vunpack.i.l.bf16 %v10697_v50 }
 0x19c   : > { %6950 = vmatmul.mubr.msk.f32.gmra.mrb[4].mxu0 %vm332_vm2, %v10723_v23  ;;  %7840 = vmatprep.subr.bf16.mxu1 %v10240_v53  ;;  %v10749_v10 = vpop.permute.xlu0 %8972  ;;  %v5740_v37 = vsel %vm5730_vm7, %v8940_v16, %v8934_v33  ;;  %v8945_v16 = vunpack.i.h.bf16 %v10669_v27 }
 0x19d   : > { %v10739_v5 = vpop.permute.xlu1 %8977  ;;  %5329 = vmatprep.mubr.f32.mxu0 %v11169_v15  ;;  %v5995_v33 = vsel %vm5990_vm8, %v8959_v14, %v11163_v13 }
 0x19e   : > { %7442 = vmatmul.mubr.msk.f32.vlgmr.msra.gmra.mrb[8].mxu1 %vm332_vm2, %v10299_v61  ;;  %v7913_v61 = vpack.c.bf16 %v5734_v30, %v5731_v2  ;;  %v5992_v2 = vsel %vm5990_vm8, %v8954_v55, %v11164_v8 }
 0x19f   : > { %7842 = vmatpush3.bf16.msra.mxu1 %v10240_v53  ;;  %7444 = vmatprep.mubr.msk.f32.mxu1 %vm332_vm2, %v10321_v52  ;;  %v5737_v53 = vsel %vm5730_vm7, %v8939_v56, %v8929_v49  ;;  %v7915_v52 = vpack.c.bf16 %v5741_v18, %v5738_v41  ;;  %v8944_v56 = vunpack.i.l.bf16 %v10669_v27  ;;  %v8965_v41 = vunpack.i.h.bf16 %v10713_v29 }
 0x1a0   : > { %6951 = vmatmul.mubr.msk.f32.gmra.mrb[6].mxu0 %vm332_vm2, %v10745_v38  ;;  %7844 = vmatprep.subr.bf16.mxu1 %v10282_v39  ;;  %v10790_v49 = vpop.permute.xlu0 %8982  ;;  %v8974_v18 = vunpack.i.l.bf16 %v10749_v10  ;;  %v8979_v27 = vunpack.i.l.bf16 %v10739_v5 }
 0x1a1   : > { %5571 = vmatprep.mubr.f32.mxu0 %v11169_v15  ;;  %v10777_v43 = vpop.permute.xlu1 %8987 }
 0x1a2   : > { %7445 = vmatmul.mubr.msk.f32.gmra.mrb[10].mxu1 %vm332_vm2, %v10339_v22  ;;  %v7917_v22 = vpack.c.bf16 %v5740_v37, %v5737_v53  ;;  %v11171_v53 = vunpack.i.h.bf16 %v10403_v28  ;;  %v11172_v28 = vunpack.i.h.bf16 %v10427_v20 }
 0x1a3   : > { %7846 = vmatpush3.bf16.msra.mxu1 %v10282_v39  ;;  %7455 = vmatprep.mubr.msk.f32.mxu1 %vm332_vm2, %v10364_v54  ;;  %v10799_v39 = vld [vmem:[%s11144_s1 + $0x2a8] sm:$0xff]  ;;  %v7927_v54 = vpack.c.bf16 %v5995_v33, %v5992_v2  ;;  %v8950_v2 = vunpack.i.h.bf16 %v10671_v12  ;;  %v8949_v33 = vunpack.i.l.bf16 %v10671_v12  ;;  %v11173_v12 = vunpack.i.h.bf16 %v10431_v36 }
 0x1a4   : > { %6960 = vmatmul.mubr.msk.f32.vlgmr.msra.gmra.mrb[0].mxu0 %vm332_vm2, %v10773_v0  ;;  %7856 = vmatprep.subr.bf16.mxu1 %v10311_v9  ;;  %v10825_v37 = vpop.permute.xlu0 %8992 }
 0x1a5   : > { %7914 = vmatpush1.bf16.msra.mxu0 %v7913_v61  ;;  %5577 = vmatprep.mubr.f32.mxu0 %v11169_v15  ;;  %v10806_v30 = vpop.permute.xlu1 %8997  ;;  %v11161_v61 = vunpack.i.h.bf16 %v10739_v5 }
 0x1a6   : > { %7916 = vmatprep.subr.bf16.mxu0 %v7915_v52  ;;  %7456 = vmatmul.mubr.msk.f32.vlgmr.msra.gmra.mrb[8].mxu1 %vm332_vm2, %v10389_v45  ;;  %v8964_v45 = vunpack.i.l.bf16 %v10713_v29  ;;  %v11170_v29 = vunpack.i.h.bf16 %v10383_v59  ;;  %v10847_v59 = vld [vmem:[%s11144_s1 + $0x2b8] sm:$0xff] }
 0x1a7   : > { %7858 = vmatpush3.bf16.msra.mxu1 %v10311_v9  ;;  %7458 = vmatprep.mubr.msk.f32.mxu1 %vm332_vm2, %v10409_v60  ;;  %v10819_v9 = vld [vmem:[%s11144_s1 + $0x2b0] sm:$0xff]  ;;  %v11162_v60 = vunpack.i.h.bf16 %v10749_v10  ;;  %v6001_v36 = vsel %vm5990_vm8, %v8979_v27, %v11161_v61 }
 0x1a8   : > { %6961 = vmatmul.mubr.msk.f32.gmra.mrb[2].mxu0 %vm332_vm2, %v10799_v39  ;;  %7860 = vmatprep.subr.bf16.mxu1 %v10347_v48  ;;  %v7875_v52 = vpack.c.bf16 %v11171_v53, %v11170_v29  ;;  %v8970_v53 = vunpack.i.h.bf16 %v10717_v7 }
 0x1a9   : > { %7918 = vmatpush1.bf16.msra.mxu0 %v7917_v22  ;;  %5583 = vmatprep.mubr.f32.mxu0 %v11169_v15  ;;  %v5216_v22 = vsel %vm5210_vm5, %v11173_v12, %v8945_v16  ;;  %v5998_v20 = vsel %vm5990_vm8, %v8974_v18, %v11162_v60  ;;  %v11175_v12 = vld [vmem:[#allocation2_spill] sm:$0xff] }
 0x1aa   : > { %7459 = vmatmul.mubr.msk.f32.gmra.mrb[10].mxu1 %vm332_vm2, %v10437_v32  ;;  %7928 = vmatprep.subr.bf16.mxu0 %v7927_v54  ;;  %v5991_v32 = vsel %vm5990_vm8, %v8964_v45, %v8954_v55  ;;  %v8985_v54 = vunpack.i.h.bf16 %v10790_v49  ;;  %v8984_v55 = vunpack.i.l.bf16 %v10790_v49  ;;  %v11176_v61 = vunpack.i.h.bf16 %v11175_v12 }
 0x1ab   : > { %7862 = vmatpush3.bf16.msra.mxu1 %v10347_v48  ;;  %7469 = vmatprep.mubr.msk.f32.mxu1 %vm332_vm2, %v10467_v58  ;;  %v5994_v48 = vsel %vm5990_vm8, %v8965_v41, %v8959_v14  ;;  %v5213_v58 = vsel %vm5210_vm5, %v11172_v28, %v8944_v56  ;;  %v10857_v14 = vpop.permute.xlu1 %9007  ;;  %v11174_v28 = vunpack.i.h.bf16 %v10461_v63  ;;  %v7931_v8 = vpack.c.bf16 %v6001_v36, %v5998_v20 }
 0x1ac   : > { %6962 = vmatmul.mubr.msk.f32.gmra.mrb[4].mxu0 %vm332_vm2, %v10819_v9  ;;  %7872 = vmatprep.subr.bf16.mxu1 %v10377_v31  ;;  %v9010_v16 = vunpack.i.h.bf16 %v10857_v14  ;;  %v9009_v56 = vunpack.i.l.bf16 %v10857_v14  ;;  %v7887_v45 = vpack.c.bf16 %v5216_v22, %v5213_v58  ;;  %v7929_v29 = vpack.c.bf16 %v5994_v48, %v5991_v32  ;;  %v11177_v22 = vld [vmem:[#allocation3_spill] sm:$0xff] }
 0x1ad   : > { %5589 = vmatprep.mubr.f32.mxu0 %v11169_v15  ;;  %v5222_v60 = vsel %vm5210_vm5, %v11176_v61, %v8950_v2  ;;  %v8969_v58 = vunpack.i.l.bf16 %v10717_v7  ;;  %v5997_v32 = vsel %vm5990_vm8, %v8984_v55, %v8974_v18  ;;  %v6000_v48 = vsel %vm5990_vm8, %v8985_v54, %v8979_v27  ;;  %v10917_v27 = vld [vmem:[%s11144_s1 + $0x2c8] sm:$0xff] }
 0x1ae   : > { %7470 = vmatmul.mubr.msk.f32.vlgmr.msra.gmra.mrb[8].mxu1 %vm332_vm2, %v10495_v19  ;;  %v10861_v41 = vpop.permute.xlu0 %9002  ;;  %v6255_v7 = vsel %vm6250_vm9, %v9009_v56, %v9010_v16  ;;  %v7933_v61 = vpack.c.bf16 %v6000_v48, %v5997_v32  ;;  %v8990_v2 = vunpack.i.h.bf16 %v10777_v43  ;;  %v11179_v55 = vunpack.i.h.bf16 %v10511_v57 }
 0x1af   : > { %7874 = vmatpush3.bf16.msra.mxu1 %v10377_v31  ;;  %v9005_v49 = vunpack.i.h.bf16 %v10861_v41  ;;  %v9004_v19 = vunpack.i.l.bf16 %v10861_v41  ;;  %7472 = vmatprep.mubr.msk.f32.mxu1 %vm332_vm2, %v10517_v24  ;;  %v10883_v31 = vld [vmem:[%s11144_s1 + $0x2c0] sm:$0xff]  ;;  %v5219_v24 = vsel %vm5210_vm5, %v11174_v28, %v8949_v33  ;;  %v10908_v18 = vpop.permute.xlu1 %9017  ;;  %v11178_v33 = vunpack.i.h.bf16 %v10509_v46  ;;  %v10939_v46 = vld [vmem:[%s11144_s1 + $0x2d0] sm:$0xff] }
 0x1b0   : > { %6963 = vmatmul.mubr.msk.f32.gmra.mrb[6].mxu0 %vm332_vm2, %v10847_v59  ;;  %7876 = vmatprep.subr.bf16.mxu1 %v7875_v52  ;;  %v5476_v20 = vsel %vm5470_vm6, %v11179_v55, %v8970_v53  ;;  %v11180_v53 = vunpack.i.h.bf16 %v10569_v40  ;;  %v9000_v40 = vunpack.i.h.bf16 %v10806_v30  ;;  %v11183_v55 = vunpack.i.h.bf16 %v10697_v50 }
 0x1b1   : > { %5831 = vmatprep.mubr.f32.mxu0 %v11169_v15  ;;  %v6252_v63 = vsel %vm6250_vm9, %v9004_v19, %v9005_v49  ;;  %v5473_v54 = vsel %vm5470_vm6, %v11178_v33, %v8969_v58  ;;  %v11184_v50 = vunpack.i.h.bf16 %v10749_v10 }
 0x1b2   : > { %7473 = vmatmul.mubr.msk.f32.gmra.mrb[10].mxu1 %vm332_vm2, %v11177_v22  ;;  %v9013_v13 = vpop.permute.xlu0 %9012  ;;  %v7943_v36 = vpack.c.bf16 %v6255_v7, %v6252_v63  ;;  %v7903_v57 = vpack.c.bf16 %v5476_v20, %v5473_v54  ;;  %v5482_v28 = vsel %vm5470_vm6, %v11180_v53, %v8990_v2  ;;  %v8999_v63 = vunpack.i.l.bf16 %v10806_v30 }
 0x1b3   : > { %7878 = vmatpush3.bf16.msra.mxu1 %v7875_v52  ;;  %7483 = vmatprep.mubr.msk.f32.mxu1 %vm332_vm2, %v10577_v25  ;;  %v8989_v25 = vunpack.i.l.bf16 %v10777_v43  ;;  %v7891_v52 = vpack.c.bf16 %v5222_v60, %v5219_v24  ;;  %v9015_v60 = vunpack.i.h.bf16 %v9013_v13  ;;  %v9020_v7 = vunpack.i.h.bf16 %v10908_v18 }
 0x1b4   : > { %6972 = vmatmul.mubr.msk.f32.vlgmr.msra.gmra.mrb[0].mxu0 %vm332_vm2, %v10883_v31  ;;  %7888 = vmatprep.subr.bf16.mxu1 %v7887_v45 }
 0x1b5   : > { %7930 = vmatpush1.bf16.msra.mxu0 %v7929_v29  ;;  %5837 = vmatprep.mubr.f32.mxu0 %v11169_v15  ;;  %v5479_v43 = vsel %vm5470_vm6, %v8900_v11, %v8989_v25  ;;  %v6254_v32 = vsel %vm6250_vm9, %v9015_v60, %v9009_v56  ;;  %v5739_v25 = vsel %vm5730_vm7, %v8930_v3, %v8999_v63 }
 0x1b6   : > { %7484 = vmatmul.mubr.msk.f32.vlgmr.msra.gmra.mrb[8].mxu1 %vm332_vm2, %v10603_v34  ;;  %7932 = vmatprep.subr.bf16.mxu0 %v7931_v8  ;;  %v10928_v29 = vpop.permute.xlu0 %9022  ;;  %v8994_v34 = vunpack.i.l.bf16 %v10825_v37  ;;  %v10945_v8 = vpop.permute.xlu1 %9027  ;;  %v7907_v12 = vpack.c.bf16 %v5482_v28, %v5479_v43  ;;  %v5996_v20 = vsel %vm5990_vm8, %v11183_v55, %v9020_v7  ;;  %v11185_v43 = vunpack.i.h.bf16 %v10739_v5 }
 0x1b7   : > { %7890 = vmatpush3.bf16.msra.mxu1 %v7887_v45  ;;  %7486 = vmatprep.mubr.msk.f32.mxu1 %vm332_vm2, %v10623_v4  ;;  %v8995_v4 = vunpack.i.h.bf16 %v10825_v37  ;;  %v9014_v45 = vunpack.i.l.bf16 %v9013_v13  ;;  %v9030_v24 = vunpack.i.h.bf16 %v10945_v8  ;;  %v9029_v47 = vunpack.i.l.bf16 %v10945_v8  ;;  %v10965_v13 = vld [vmem:[%s11144_s1 + $0x2d8] sm:$0xff] }
 0x1b8   : > { %6973 = vmatmul.mubr.msk.f32.gmra.mrb[2].mxu0 %vm332_vm2, %v10917_v27  ;;  %7892 = vmatprep.subr.bf16.mxu1 %v7891_v52  ;;  %v9025_v11 = vunpack.i.h.bf16 %v10928_v29  ;;  %v9024_v37 = vunpack.i.l.bf16 %v10928_v29  ;;  %v5733_v58 = vsel %vm5730_vm7, %v8915_v6, %v8994_v34  ;;  %v6994_v29 = vld [vmem:[%s11144_s1 + $0x310] sm:$0xff]  ;;  %v6995_v8 = vld [vmem:[%s11144_s1 + $0x318] sm:$0xff] }
 0x1b9   : > { %5843 = vmatprep.mubr.f32.mxu0 %v11169_v15  ;;  %7934 = vmatpush1.bf16.msra.mxu0 %v7933_v61  ;;  %v5736_v21 = vsel %vm5730_vm7, %v8920_v35, %v8995_v4  ;;  %v6261_v56 = vsel %vm6250_vm9, %v9029_v47, %v9030_v24  ;;  %v9019_v61 = vunpack.i.l.bf16 %v10908_v18  ;;  %v6981_v18 = vld [vmem:[%s11144_s1 + $0x2e8] sm:$0xff] }
 0x1ba   : > { %7487 = vmatmul.mubr.msk.f32.gmra.mrb[10].mxu1 %vm332_vm2, %v10647_v17  ;;  %7944 = vmatprep.subr.bf16.mxu0 %v7943_v36  ;;  %v9033_v17 = vpop.permute.xlu0 %9032  ;;  %v6258_v6 = vsel %vm6250_vm9, %v9024_v37, %v9025_v11  ;;  %v7919_v30 = vpack.c.bf16 %v5736_v21, %v5733_v58  ;;  %v9038_v33 = vpop.permute.xlu1 %9037 }
 0x1bb   : > { %7894 = vmatpush3.bf16.msra.mxu1 %v7891_v52  ;;  %7497 = vmatprep.mubr.msk.f32.mxu1 %vm332_vm2, %v10677_v51  ;;  %v6251_v51 = vsel %vm6250_vm9, %v9014_v45, %v9004_v19  ;;  %v9035_v48 = vunpack.i.h.bf16 %v9033_v17  ;;  %v9034_v22 = vunpack.i.l.bf16 %v9033_v17  ;;  %v7947_v19 = vpack.c.bf16 %v6261_v56, %v6258_v6 }
 0x1bc   : > { %6974 = vmatmul.mubr.msk.f32.gmra.mrb[4].mxu0 %vm332_vm2, %v10939_v46  ;;  %7904 = vmatprep.subr.bf16.mxu1 %v7903_v57  ;;  %v11181_v52 = vunpack.i.h.bf16 %v10637_v26  ;;  %v9040_v26 = vunpack.i.h.bf16 %v9038_v33  ;;  %v9039_v3 = vunpack.i.l.bf16 %v9038_v33 }
 0x1bd   : > { %5849 = vmatprep.mubr.f32.mxu0 %v11169_v15  ;;  %v6257_v35 = vsel %vm6250_vm9, %v9034_v22, %v9024_v37 }
 0x1be   : > { %7498 = vmatmul.mubr.msk.f32.vlgmr.msra.gmra.mrb[8].mxu1 %vm332_vm2, %v10703_v1  ;;  %v7945_v1 = vpack.c.bf16 %v6254_v32, %v6251_v51  ;;  %v5742_v2 = vsel %vm5730_vm7, %v11181_v52, %v9000_v40  ;;  %v6002_v4 = vsel %vm5990_vm8, %v11185_v43, %v9040_v26  ;;  %v9048_v60 = vpop.permute.xlu1 %9047  ;;  %v6485_v51 = vld [vmem:[%s11145_s2] sm:$0x7] }
 0x1bf   : > { %7906 = vmatpush3.bf16.msra.mxu1 %v7903_v57  ;;  %7500 = vmatprep.mubr.msk.f32.mxu1 %vm332_vm2, %v10723_v23  ;;  %v6260_v23 = vsel %vm6250_vm9, %v9035_v48, %v9029_v47  ;;  %v7923_v62 = vpack.c.bf16 %v5742_v2, %v5739_v25  ;;  %v9043_v36 = vpop.permute.xlu0 %9042  ;;  %v5999_v57 = vsel %vm5990_vm8, %v11184_v50, %v9039_v3  ;;  %v9049_v45 = vunpack.i.l.bf16 %v9048_v60 }
 0x1c0   : > { %6975 = vmatmul.mubr.msk.f32.gmra.mrb[6].mxu0 %vm332_vm2, %v10965_v13  ;;  %7908 = vmatprep.subr.bf16.mxu1 %v7907_v12  ;;  %v9044_v34 = vunpack.i.l.bf16 %v9043_v36  ;;  %v7939_v10 = vpack.c.bf16 %v6002_v4, %v5999_v57 }
 0x1c1   : > { %6091 = vmatprep.mubr.f32.mxu0 %v11169_v15  ;;  %v6259_v14 = vsel %vm6250_vm9, %v9025_v11, %v9049_v45 }
 0x1c2   : > { %7501 = vmatmul.mubr.msk.f32.gmra.mrb[10].mxu1 %vm332_vm2, %v10745_v38  ;;  %v7949_v38 = vpack.c.bf16 %v6260_v23, %v6257_v35  ;;  %v6253_v5 = vsel %vm6250_vm9, %v9005_v49, %v9044_v34 }
 0x1c3   : > { %7910 = vmatpush3.bf16.msra.mxu1 %v7907_v12  ;;  %7511 = vmatprep.mubr.msk.f32.mxu1 %vm332_vm2, %v10773_v0  ;;  %v11182_v0 = vunpack.i.h.bf16 %v10695_v44 }
 0x1c4   : > { %6984 = vmatmul.mubr.msk.f32.vlgmr.msra.gmra.mrb[0].mxu0 %vm332_vm2, %v6980_v42  ;;  %7920 = vmatprep.subr.bf16.mxu1 %v7919_v30 }
 0x1c5   : > { %6097 = vmatprep.mubr.f32.mxu0 %v11169_v15  ;;  %7946 = vmatpush1.bf16.msra.mxu0 %v7945_v1  ;;  %v5993_v54 = vsel %vm5990_vm8, %v11182_v0, %v9019_v61 }
 0x1c6   : > { %7512 = vmatmul.mubr.msk.f32.vlgmr.msra.gmra.mrb[8].mxu1 %vm332_vm2, %v10799_v39  ;;  %7948 = vmatprep.subr.bf16.mxu0 %v7947_v19  ;;  %v6982_v39 = vld [vmem:[%s11144_s1 + $0x2f0] sm:$0xff]  ;;  %v7935_v44 = vpack.c.bf16 %v5996_v20, %v5993_v54 }
 0x1c7   : > { %7922 = vmatpush3.bf16.msra.mxu1 %v7919_v30  ;;  %7514 = vmatprep.mubr.msk.f32.mxu1 %vm332_vm2, %v10819_v9  ;;  %v9045_v9 = vunpack.i.h.bf16 %v9043_v36 }
 0x1c8   : > { %6985 = vmatmul.mubr.msk.f32.gmra.mrb[2].mxu0 %vm332_vm2, %v6981_v18  ;;  %7924 = vmatprep.subr.bf16.mxu1 %v7923_v62 }
 0x1c9   : > { %6103 = vmatprep.mubr.f32.mxu0 %v11169_v15  ;;  %7950 = vmatpush1.bf16.msra.mxu0 %v7949_v38  ;;  %v6256_v53 = vsel %vm6250_vm9, %v9010_v16, %v9045_v9  ;;  %v6993_v16 = vld [vmem:[%s11144_s1 + $0x308] sm:$0xff] }
 0x1ca   : > { %7515 = vmatmul.mubr.msk.f32.gmra.mrb[10].mxu1 %vm332_vm2, %v10847_v59  ;;  %v6983_v59 = vld [vmem:[%s11144_s1 + $0x2f8] sm:$0xff] }
 0x1cb   : > { %7926 = vmatpush3.bf16.msra.mxu1 %v7923_v62  ;;  %7525 = vmatprep.mubr.msk.f32.mxu1 %vm332_vm2, %v10883_v31  ;;  %v9050_v31 = vunpack.i.h.bf16 %v9048_v60 }
 0x1cc   : > { %6986 = vmatmul.mubr.msk.f32.gmra.mrb[4].mxu0 %vm332_vm2, %v6982_v39  ;;  %7936 = vmatprep.subr.bf16.mxu1 %v7935_v44 }
 0x1cd   : > { %6109 = vmatprep.mubr.f32.mxu0 %v11169_v15  ;;  %v6262_v41 = vsel %vm6250_vm9, %v9030_v24, %v9050_v31 }
 0x1ce   : > { %7526 = vmatmul.mubr.msk.f32.vlgmr.msra.gmra.mrb[8].mxu1 %vm332_vm2, %v10917_v27  ;;  %v6992_v27 = vld [vmem:[%s11144_s1 + $0x300] sm:$0xff]  ;;  %v7955_v49 = vpack.c.bf16 %v6262_v41, %v6259_v14 }
 0x1cf   : > { %7938 = vmatpush3.bf16.msra.mxu1 %v7935_v44  ;;  %7528 = vmatprep.mubr.msk.f32.mxu1 %vm332_vm2, %v10939_v46  ;;  %v7951_v46 = vpack.c.bf16 %v6256_v53, %v6253_v5 }
 0x1d0   : > { %6987 = vmatmul.mubr.msk.f32.gmra.mrb[6].mxu0 %vm332_vm2, %v6983_v59  ;;  %7940 = vmatprep.subr.bf16.mxu1 %v7939_v10 }
 0x1d1   : > { %6351 = vmatprep.mubr.f32.mxu0 %v11169_v15 }
 0x1d2   : > { %7529 = vmatmul.mubr.msk.f32.gmra.mrb[10].mxu1 %vm332_vm2, %v10965_v13  ;;  %v6487_v13 = vlaneseq }
 0x1d3   : > { %7942 = vmatpush3.bf16.msra.mxu1 %v7939_v10  ;;  %7539 = vmatprep.mubr.msk.f32.mxu1 %vm332_vm2, %v6980_v42 }
 0x1d4   : > { %6996 = vmatmul.mubr.msk.f32.vlgmr.msra.gmra.mrb[0].mxu0 %vm332_vm2, %v6992_v27  ;;  %7952 = vmatprep.subr.bf16.mxu1 %v7951_v46  ;;  %v6488_v12 = vshrl.u32 %v6487_v13, 7 }
 0x1d5   : > { %6357 = vmatprep.mubr.f32.mxu0 %v11169_v15 }
 0x1d6   : > { %7540 = vmatmul.mubr.msk.f32.vlgmr.msra.gmra.mrb[8].mxu1 %vm332_vm2, %v6981_v18  ;;  %v6489_v58 = vsub.s32 0, %v6488_v12  ;;  %v6493_v32 = vsub.s32 1, %v6488_v12  ;;  %v6497_v42 = vsub.s32 2, %v6488_v12 }
 0x1d7   : > { %7954 = vmatpush3.bf16.msra.mxu1 %v7951_v46  ;;  %7542 = vmatprep.mubr.msk.f32.mxu1 %vm332_vm2, %v6982_v39 }
 0x1d8   : > { %6997 = vmatmul.mubr.msk.f32.gmra.mrb[2].mxu0 %vm332_vm2, %v6993_v16  ;;  %7956 = vmatprep.subr.bf16.mxu1 %v7955_v49  ;;  %v6490_v48 = vrot.slane %v6485_v51, %v6489_v58  ;;  %v6494_v63 = vrot.slane %v6485_v51, %v6493_v32  ;;  %v6498_v33 = vrot.slane %v6485_v51, %v6497_v42 }
 0x1d9   : > { %6363 = vmatprep.mubr.f32.mxu0 %v11169_v15 }
 0x1da   : > { %7543 = vmatmul.mubr.msk.f32.gmra.mrb[10].mxu1 %vm332_vm2, %v6983_v59 }
 0x1db   : > { %7958 = vmatpush3.bf16.msra.mxu1 %v7955_v49  ;;  %7553 = vmatprep.mubr.msk.f32.mxu1 %vm332_vm2, %v6992_v27 }
 0x1dc   : > { %6998 = vmatmul.mubr.msk.f32.gmra.mrb[4].mxu0 %vm332_vm2, %v6994_v29 }
 0x1dd   : > { %6369 = vmatprep.mubr.f32.mxu0 %v11169_v15 }
 0x1de   : > { %7554 = vmatmul.mubr.msk.f32.vlgmr.msra.gmra.mrb[8].mxu1 %vm332_vm2, %v6993_v16 }
 0x1df   : > { %7556 = vmatprep.mubr.msk.f32.mxu1 %vm332_vm2, %v6994_v29 }
 0x1e0   : > { %6999 = vmatmul.mubr.msk.f32.gmra.mrb[6].mxu0 %vm332_vm2, %v6995_v8 }
 0x1e2   : > { %7557 = vmatmul.mubr.msk.f32.gmra.mrb[10].mxu1 %vm332_vm2, %v6995_v8  ;;  %vm6534_vm2 = vcmask 7168  }
 0x208   : > { %v1577_v28 = vpop.f32.mrb[0].mxu1 }
 0x209   : > { %v1579_v24 = vpop.f32.mrb[1].mxu1 }
 0x20c   : > { %v1583_v47 = vpop.f32.mrb[2].mxu1 }
 0x20d   : > { %v1585_v11 = vpop.f32.mrb[3].mxu1 }
 0x210   : > { %v1589_v37 = vpop.f32.mrb[4].mxu1 }
 0x211   : > { %v1591_v40 = vpop.f32.mrb[5].mxu1 }
 0x214   : > { %v1595_v15 = vpop.f32.mrb[6].mxu1 }
 0x215   : > { %v1597_v17 = vpop.f32.mrb[7].mxu1 }
 0x2a7   : > { %v6353_v22 = vpop.f32.mrb[0].mxu0 }
 0x2a8   : > { %v7959_v21 = vadd.f32 %v6353_v22, %v1577_v28  ;;  %v6355_v6 = vpop.f32.mrb[1].mxu0 }
 0x2a9   : > { %v7960_v56 = vadd.f32 %v6355_v6, %v1579_v24 }
 0x2aa   : > { %6473 = vst [vmem:[%s11099_s14] sm:$0xff] %v7959_v21  ;;  %v6502_v1 = vmul.f32 %v7959_v21, %v6490_v48 }
 0x2ab   : > { %6474 = vst [vmem:[%s11099_s14 + $0x8] sm:$0xff] %v7960_v56  ;;  %v6503_v35 = vmul.f32 %v7960_v56, %v6494_v63  ;;  %v6359_v23 = vpop.f32.mrb[2].mxu0 }
 0x2ac   : > { %v6539_v30 = vmul.f32 %v6502_v1, %v6502_v1  ;;  %v7961_v19 = vadd.f32 %v6359_v23, %v1583_v47  ;;  %v6361_v7 = vpop.f32.mrb[3].mxu0 }
 0x2ad   : > { %v6514_v61 = vadd.f32 %v6503_v35, %v6502_v1  ;;  %v6540_v25 = vmul.f32 %v6503_v35, %v6503_v35  ;;  %v7962_v52 = vadd.f32 %v6361_v7, %v1585_v11 }
 0x2ae   : > { %6476 = vst [vmem:[%s11099_s14 + $0x18] sm:$0xff] %v7961_v19  ;;  %v6505_v2 = vmul.f32 %v7961_v19, %v6490_v48 }
 0x2af   : > { %6477 = vst [vmem:[%s11099_s14 + $0x20] sm:$0xff] %v7962_v52  ;;  %v6506_v38 = vmul.f32 %v7962_v52, %v6494_v63  ;;  %v6365_v18 = vpop.f32.mrb[4].mxu0  ;;  %v6551_v62 = vadd.f32 %v6540_v25, %v6539_v30 }
 0x2b0   : > { %v6542_v26 = vmul.f32 %v6505_v2, %v6505_v2  ;;  %v7963_v3 = vadd.f32 %v6365_v18, %v1589_v37  ;;  %v6367_v0 = vpop.f32.mrb[5].mxu0 }
 0x2b1   : > { %v6519_v54 = vadd.f32 %v6506_v38, %v6505_v2  ;;  %v6543_v55 = vmul.f32 %v6506_v38, %v6506_v38  ;;  %v7964_v20 = vadd.f32 %v6367_v0, %v1591_v40  ;;  %v7555_v36 = vpop.f32.mrb[8].mxu1 }
 0x2b2   : > { %6479 = vst [vmem:[%s11099_s14 + $0x30] sm:$0xff] %v7963_v3  ;;  %v6508_v39 = vmul.f32 %v7963_v3, %v6490_v48  ;;  %6478 = vst.msk [vmem:[%s11099_s14 + $0x28] sm:$0xff] %vm4950_vm4, %v7555_v36  ;;  %v6507_v44 = vmul.f32 %v7555_v36, %v6498_v33  ;;  %v6442_v9 = vpop.f32.mrb[9].mxu1 }
 0x2b3   : > { %6480 = vst [vmem:[%s11099_s14 + $0x38] sm:$0xff] %v7964_v20  ;;  %v6509_v34 = vmul.f32 %v7964_v20, %v6494_v63  ;;  %v6371_v50 = vpop.f32.mrb[6].mxu0  ;;  %6475 = vst.msk [vmem:[%s11099_s14 + $0x10] sm:$0xff] %vm4950_vm4, %v6442_v9  ;;  %v6504_v57 = vmul.f32 %v6498_v33, %v6442_v9  ;;  %v6556_v43 = vadd.f32 %v6543_v55, %v6542_v26 }
 0x2b4   : > { %v6545_v4 = vmul.f32 %v6508_v39, %v6508_v39  ;;  %v7965_v60 = vadd.f32 %v6371_v50, %v1595_v15  ;;  %v6520_v59 = vsel %vm4950_vm4, %v6507_v44, 0.0  ;;  %v6544_v10 = vmul.f32 %v6507_v44, %v6507_v44  ;;  %v6373_v31 = vpop.f32.mrb[7].mxu0 }
 0x2b5   : > { %v6524_v45 = vadd.f32 %v6509_v34, %v6508_v39  ;;  %v6546_v5 = vmul.f32 %v6509_v34, %v6509_v34  ;;  %v7966_v53 = vadd.f32 %v6373_v31, %v1597_v17  ;;  %v6515_v27 = vsel %vm4950_vm4, %v6504_v57, 0.0  ;;  %v7558_v46 = vpop.f32.mrb[10].mxu1 }
 0x2b6   : > { %6482 = vst [vmem:[%s11099_s14 + $0x48] sm:$0xff] %v7965_v60  ;;  %v6511_v14 = vmul.f32 %v7965_v60, %v6490_v48  ;;  %v6541_v41 = vmul.f32 %v6504_v57, %v6504_v57  ;;  %6484 = vst.msk [vmem:[%s11099_s14 + $0x58] sm:$0xff] %vm4950_vm4, %v7558_v46  ;;  %v6513_v16 = vmul.f32 %v7558_v46, %v6498_v33  ;;  %v6452_v49 = vpop.f32.mrb[11].mxu1  ;;  %v6557_v24 = vsel %vm4950_vm4, %v6544_v10, 0.0 }
 0x2b7   : > { %v6516_v29 = vadd.f32 %v6515_v27, %v6514_v61  ;;  %6483 = vst [vmem:[%s11099_s14 + $0x50] sm:$0xff] %v7966_v53  ;;  %v6512_v8 = vmul.f32 %v7966_v53, %v6494_v63  ;;  %6481 = vst.msk [vmem:[%s11099_s14 + $0x40] sm:$0xff] %vm4950_vm4, %v6452_v49  ;;  %v6510_v28 = vmul.f32 %v6498_v33, %v6452_v49 }
 0x2b8   : > { %v6521_v47 = vadd.f32 %v6520_v59, %v6519_v54  ;;  %v6548_v11 = vmul.f32 %v6511_v14, %v6511_v14  ;;  %v6530_v37 = vsel %vm4950_vm4, %v6513_v16, 0.0  ;;  %v6550_v40 = vmul.f32 %v6513_v16, %v6513_v16 }
 0x2b9   : > { %6517 = vadd.xlane.f32.xlu0 %v6516_v29  ;;  %v6552_v15 = vsel %vm4950_vm4, %v6541_v41, 0.0  ;;  %v6529_v17 = vadd.f32 %v6512_v8, %v6511_v14  ;;  %v6549_v13 = vmul.f32 %v6512_v8, %v6512_v8  ;;  %v6525_v12 = vsel %vm4950_vm4, %v6510_v28, 0.0 }
 0x2ba   : > { %v6547_v58 = vmul.f32 %v6510_v28, %v6510_v28  ;;  %v6526_v51 = vadd.f32 %v6525_v12, %v6524_v45  ;;  %v6553_v32 = vadd.f32 %v6552_v15, %v6551_v62  ;;  %v6558_v48 = vadd.f32 %v6557_v24, %v6556_v43 }
 0x2bb   : > { %v6561_v22 = vadd.f32 %v6546_v5, %v6545_v4  ;;  %v6531_v21 = vadd.f32 %v6530_v37, %v6529_v17  ;;  %v6566_v6 = vadd.f32 %v6549_v13, %v6548_v11  ;;  %v6567_v56 = vsel %vm4950_vm4, %v6550_v40, 0.0 }
 0x2bc   : > { %v6562_v63 = vsel %vm4950_vm4, %v6547_v58, 0.0  ;;  %6554 = vadd.xlane.f32.xlu1 %v6553_v32 }
 0x2bd   : > { %6559 = vadd.xlane.f32.xlu0 %v6558_v48  ;;  %v6563_v1 = vadd.f32 %v6562_v63, %v6561_v22  ;;  %v6568_v42 = vadd.f32 %v6567_v56, %v6566_v6 }
 0x2c0   : > { %6522 = vadd.xlane.f32.xlu1 %v6521_v47 }
 0x2c1   : > { %6527 = vadd.xlane.f32.xlu0 %v6526_v51 }
 0x2c4   : > { %6564 = vadd.xlane.f32.xlu1 %v6563_v1 }
 0x2c5   : > { %6532 = vadd.xlane.f32.xlu0 %v6531_v21 }
 0x2c9   : > { %6569 = vadd.xlane.f32.xlu0 %v6568_v42 }
 0x346   : > { %v6518_v35 = vpop.xlane.xlu0 %6517 }
 0x347   : > { %6535 = vst.msk [vmem:[%s244_s16] sm:$0xff] %vm6534_vm2, %v6518_v35 }
 0x349   : > { %v6555_v23 = vpop.xlane.xlu1 %6554 }
 0x34a   : > { %v6560_v30 = vpop.xlane.xlu0 %6559  ;;  %6571 = vst.msk [vmem:[%s249_s9] sm:$0xff] %vm6534_vm2, %v6555_v23 }
 0x34b   : > { %6572 = vst.msk [vmem:[%s249_s9 + $0x8] sm:$0xff] %vm6534_vm2, %v6560_v30 }
 0x34d   : > { %v6523_v19 = vpop.xlane.xlu1 %6522 }
 0x34e   : > { %v6528_v7 = vpop.xlane.xlu0 %6527  ;;  %6536 = vst.msk [vmem:[%s244_s16 + $0x8] sm:$0xff] %vm6534_vm2, %v6523_v19 }
 0x34f   : > { %6537 = vst.msk [vmem:[%s244_s16 + $0x10] sm:$0xff] %vm6534_vm2, %v6528_v7 }
 0x351   : > { %v6565_v61 = vpop.xlane.xlu1 %6564 }
 0x352   : > { %v6533_v25 = vpop.xlane.xlu0 %6532  ;;  %6573 = vst.msk [vmem:[%s249_s9 + $0x10] sm:$0xff] %vm6534_vm2, %v6565_v61 }
 0x353   : > { %6538 = vst.msk [vmem:[%s244_s16 + $0x18] sm:$0xff] %vm6534_vm2, %v6533_v25 }
 0x356   : > { %v6570_v52 = vpop.xlane.xlu0 %6569 }
 0x357   : > { %6574 = vst.msk [vmem:[%s249_s9 + $0x18] sm:$0xff] %vm6534_vm2, %v6570_v52 }
 0x358 PF: > { %s16_s18 = sadd.s32 1, %s9108_s18  }
 0x359   : > { %p13_p4 = scmp.ge.s32.totalorder %s16_s18, 4  }
 0x35b   :  { %15 = sbr.rel (!%p13_p4) target bundleno = 1 (0x1), region = 110 }

</bundles_post_ra>
